<compile_context>
chip_gen: v6e
topology: v6e:2x2x1
jax: 0.10.0
libtpu: 0.0.40
codegen_flags: <defaults>
</compile_context>

<pallas_src>
import functools
import math

import numpy as np
import jax
import jax.numpy as jnp
from jax.experimental import pallas as pl
from jax.experimental.pallas import tpu as pltpu


# Flip to jnp.bfloat16 on v6e/v7x to feed the MXU native bf16 operands
# (accumulation stays f32 via preferred_element_type). float32 = exact semantics.
MATMUL_DTYPE = jnp.float32


def _mm(a, b):
    return jnp.dot(a.astype(MATMUL_DTYPE), b.astype(MATMUL_DTYPE),
                   preferred_element_type=jnp.float32)


# ----------------------------------------------------------------------------
# Model config
# ----------------------------------------------------------------------------
class Args:
    input_size = 16
    hidden_size = 32
    hidden_size_2 = 32
    num_classes = 5
    block_list = "32"


# ----------------------------------------------------------------------------
# Fused kernel
# ----------------------------------------------------------------------------
def fused_kernel(mfcc_ref, spec_ref, slab_ref, o_ref, *, layout, cfg):
    f32 = jnp.float32
    B, T, Ci, H2, ncls, n_blocks = (cfg["B"], cfg["T"], cfg["Ci"],
                                    cfg["H2"], cfg["ncls"], cfg["n_blocks"])
    BH = B * T

    def prm(name):                      # static slice of the packed parameter slab
        off, r, c = layout[name]
        return slab_ref[off:off + r, 0:c]

    # ---- spectrogram.view(B, 128, T, 1) -> channels-last rows (b, h) ----------
    # spec_ref holds the free bitcast view (B*128, T); one tile-aligned transpose
    # (lanes zero-padded to 128) turns it into (h, b*128 + c).
    sp = spec_ref[...]                                            # (B*128, T)
    csp = sp.shape[0] // B                                        # 128 channels
    spp = jnp.concatenate([sp, jnp.zeros((B * csp, 128 - T), f32)], axis=-1)
    spt = jnp.transpose(spp)                                      # (128, B*128)
    xt = spt[0:T, :]                                              # (T, B*128)
    x = jnp.concatenate([xt[:, b * csp:(b + 1) * csp] for b in range(B)],
                        axis=0)                                   # (B*T, 128)

    # ---- ResNet blocks (BN folded into weights/bias) ---------------------------
    def shift_p(y):   # out[h] = y[h-1], zero row at h == 0
        return jnp.concatenate(
            [jnp.zeros((B, 1, y.shape[-1]), f32), y[:, :T - 1, :]], axis=1)

    def shift_m(y):   # out[h] = y[h+1], zero row at h == T-1
        return jnp.concatenate(
            [y[:, 1:, :], jnp.zeros((B, 1, y.shape[-1]), f32)], axis=1)

    def conv3x3(z2, w, b):              # z2 (B*T, Cin); w (3*Cin, Co); b (1, Co)
        cin = z2.shape[-1]
        co = w.shape[-1]
        a = _mm(z2, w[0:cin, :]).reshape(B, T, co)                # tap kh = 0
        m = (_mm(z2, w[cin:2 * cin, :]) + b).reshape(B, T, co)    # tap kh = 1
        c = _mm(z2, w[2 * cin:3 * cin, :]).reshape(B, T, co)      # tap kh = 2
        return shift_p(a) + m + shift_m(c)

    for i in range(n_blocks):
        w1 = prm(f"blk{i}_w1"); b1 = prm(f"blk{i}_b1")
        w0 = prm(f"blk{i}_w0"); b0 = prm(f"blk{i}_b0")
        w2 = prm(f"blk{i}_w2"); b2 = prm(f"blk{i}_b2")
        co = w0.shape[-1]
        t = jnp.maximum(conv3x3(x, w1, b1), 0.0)                  # relu(bn1(conv1))
        p0 = (_mm(x, w0) + b0).reshape(B, T, co)                  # bn0(conv0)
        p2 = conv3x3(t.reshape(BH, co), w2, b2)                   # bn2(conv2)
        x = (p0 + p2).reshape(BH, co)

    # ---- conv_after (1x1) + relu; output channels pre-permuted [even | odd] ----
    yall = jnp.maximum(_mm(x, prm("conv_after_w")) + prm("conv_after_b"), 0.0)

    # ---- PyTorch out.view(B, T, Ci) of the contiguous NCHW tensor --------------
    # One (128,128) tile-aligned transpose of the zero-padded (B*T, Ci) block,
    # then sublane/lane slicing + concat (requires Ci == 2*T, asserted in wrapper).
    ypad = jnp.concatenate([yall, jnp.zeros((BH, 128 - Ci), f32)], axis=-1)
    ypad = jnp.concatenate([ypad, jnp.zeros((128 - BH, 128), f32)], axis=0)
    yt = jnp.transpose(ypad)                                      # (128, 128)
    zrows = []
    for b in range(B):
        zl = yt[0:T, b * T:(b + 1) * T]                           # y_scr[b, :, 0:T]
        zr = yt[T:2 * T, b * T:(b + 1) * T]                       # y_scr[b, :, T:2T]
        zrows.append(jnp.concatenate([zl, zr], axis=-1))
    z = jnp.concatenate(zrows, axis=0)                            # (B*T, Ci), rows (b,t)

    # ---- combine + fc1 + fc2 ---------------------------------------------------
    x = mfcc_ref[...].reshape(BH, Ci) + z
    x = jnp.maximum(_mm(x, prm("fc1_w")) + prm("fc1_b"), 0.0)
    x = jnp.maximum(_mm(x, prm("fc2_w")) + prm("fc2_b"), 0.0)

    # ---- 2-layer bidirectional LSTM (PyTorch gate order i, f, g, o) ------------
    pf = prm("perm_f"); pb = prm("perm_b")      # (2B*T, B*T) step-major reorder
    qf = prm("gath_f"); qb = prm("gath_b")      # (B*T, 2B*T) gather back to (b,t)
    dmask = prm("dirmask")                      # (2B, 2H2) direction lane mask
    for layer in range(2):
        # Input projections + biases hoisted out of the recurrence.
        gx_f = _mm(x, prm(f"l{layer}_wih_f")) + prm(f"l{layer}_b_f")   # (B*T, 4H2)
        gx_b = _mm(x, prm(f"l{layer}_wih_b")) + prm(f"l{layer}_b_b")
        # Step-major, direction-stacked (also time-reverses the backward dir).
        gx = _mm(pf, gx_f) + _mm(pb, gx_b)                              # (2B*T, 4H2)
        whh = prm(f"l{layer}_whh")                                      # (2H2, 4H2)
        hlane = jnp.zeros((2 * B, 2 * H2), f32)
        c = jnp.zeros((2 * B, H2), f32)
        hs = []
        for s in range(T):                       # T static -> fully unrolled
            g = gx[2 * B * s:2 * B * (s + 1), :] + _mm(hlane, whh)      # (2B, 4H2)
            sg = jax.nn.sigmoid(g)
            th = jnp.tanh(g)
            i_g = sg[:, 0:H2]
            f_g = sg[:, H2:2 * H2]
            g_g = th[:, 2 * H2:3 * H2]
            o_g = sg[:, 3 * H2:4 * H2]
            c = f_g * c + i_g * g_g
            hcur = o_g * jnp.tanh(c)                                    # (2B, H2)
            hlane = jnp.concatenate([hcur, hcur], axis=-1) * dmask      # (2B, 2H2)
            hs.append(hcur)
        hsteps = jnp.concatenate(hs, axis=0)                            # (2B*T, H2)
        x = jnp.concatenate([_mm(qf, hsteps), _mm(qb, hsteps)], axis=-1)  # (B*T, 2H2)

    # ---- fc3 -------------------------------------------------------------------
    out = _mm(x, prm("fc3_w")) + prm("fc3_b")
    o_ref[...] = out.reshape(B, T, ncls)


# ----------------------------------------------------------------------------
# Parameter construction: random init, BN folding, permutation matrices,
# packing into one lane-padded (rows, 128) slab with 8-row-aligned entries.
# ----------------------------------------------------------------------------
def build_params(key, args, B, T):
    keys = iter(jax.random.split(key, 256))

    def nrm(shape, scale=0.05):
        return scale * jax.random.normal(next(keys), shape, jnp.float32)

    def uni(shape, lo, hi):
        return jax.random.uniform(next(keys), shape, jnp.float32, lo, hi)

    def bn_params(c):
        return (uni((c,), 0.5, 1.5), nrm((c,), 0.1), nrm((c,), 0.1), uni((c,), 0.5, 1.5))

    def fold_bn(conv_b, gamma, beta, rm, rv, eps=1e-5):
        s = gamma / jnp.sqrt(rv + eps)
        b = beta + (conv_b - rm) * s
        return s, b

    entries = []

    def add(name, arr):
        entries.append((name, jnp.asarray(arr, jnp.float32)))

    block_list = [128] + [int(b) for b in args.block_list.split(',')]
    specs = []
    for i in range(1, len(block_list)):
        specs.append((block_list[i - 1], block_list[i]))
        specs.append((block_list[i], block_list[i]))

    for idx, (cin, cout) in enumerate(specs):
        w0 = nrm((cin, cout)); b0c = nrm((cout,))
        s0, bb0 = fold_bn(b0c, *bn_params(cout))
        w1 = nrm((3, 3, cin, cout)); b1c = nrm((cout,))       # (kh, kw, in, out)
        s1, bb1 = fold_bn(b1c, *bn_params(cout))
        w2 = nrm((3, 3, cout, cout)); b2c = nrm((cout,))
        s2, bb2 = fold_bn(b2c, *bn_params(cout))
        # W == 1 with pad 1 => only the centre-width column of the 3x3 kernels
        # ever touches real data; BN scale folded into the weights.
        add(f'blk{idx}_w1', w1[:, 1].reshape(3 * cin, cout) * s1)
        add(f'blk{idx}_b1', bb1.reshape(1, cout))
        add(f'blk{idx}_w0', w0 * s0)
        add(f'blk{idx}_b0', bb0.reshape(1, cout))
        add(f'blk{idx}_w2', w2[:, 1].reshape(3 * cout, cout) * s2)
        add(f'blk{idx}_b2', bb2.reshape(1, cout))

    ci = args.input_size
    wc = nrm((block_list[-1], ci)); bc = nrm((ci,))
    # Pre-permute conv_after output channels to [even | odd] so the .view scramble
    # reduces to contiguous slices of one transposed block inside the kernel.
    perm = np.concatenate([np.arange(0, ci, 2), np.arange(1, ci, 2)])
    add('conv_after_w', wc[:, perm])
    add('conv_after_b', bc[perm].reshape(1, ci))

    hd = args.hidden_size
    h2 = args.hidden_size_2
    add('fc1_w', nrm((ci, hd), 0.1)); add('fc1_b', nrm((hd,), 0.1).reshape(1, hd))
    add('fc2_w', nrm((hd, hd), 0.1)); add('fc2_b', nrm((hd,), 0.1).reshape(1, hd))

    def lstm_dir(din, h):
        wih = nrm((4 * h, din), 0.1)
        whh = nrm((4 * h, h), 0.1)
        bih = nrm((4 * h,), 0.1)
        bhh = nrm((4 * h,), 0.1)
        return wih.T, whh.T, (bih + bhh).reshape(1, 4 * h)

    for layer, din in enumerate([hd, 2 * h2]):
        wif, whf, bf = lstm_dir(din, h2)
        wib, whb, bb_ = lstm_dir(din, h2)
        add(f'l{layer}_wih_f', wif); add(f'l{layer}_b_f', bf)
        add(f'l{layer}_wih_b', wib); add(f'l{layer}_b_b', bb_)
        add(f'l{layer}_whh', jnp.concatenate([whf, whb], axis=0))   # (2H2, 4H2)

    # Static row-reorder matrices for the recurrence (step-major, dir-stacked).
    pf = np.zeros((2 * B * T, B * T), np.float32)
    pb = np.zeros((2 * B * T, B * T), np.float32)
    qf = np.zeros((B * T, 2 * B * T), np.float32)
    qb = np.zeros((B * T, 2 * B * T), np.float32)
    for s in range(T):
        for b in range(B):
            pf[2 * B * s + b, b * T + s] = 1.0
            pb[2 * B * s + B + b, b * T + (T - 1 - s)] = 1.0
    for b in range(B):
        for t in range(T):
            qf[b * T + t, 2 * B * t + b] = 1.0
            qb[b * T + t, 2 * B * (T - 1 - t) + B + b] = 1.0
    dmask = np.zeros((2 * B, 2 * h2), np.float32)
    dmask[:B, :h2] = 1.0
    dmask[B:, h2:] = 1.0
    add('perm_f', pf); add('perm_b', pb)
    add('gath_f', qf); add('gath_b', qb)
    add('dirmask', dmask)

    add('fc3_w', nrm((2 * h2, args.num_classes), 0.1))
    add('fc3_b', nrm((args.num_classes,), 0.1).reshape(1, args.num_classes))

    # ---- pack into one (rows, 128) slab; every entry starts 8-row aligned ----
    layout = {}
    rows = []
    off = 0
    for name, a in entries:
        r, c = a.shape
        assert c <= 128
        layout[name] = (off, r, c)
        if c < 128:
            a = jnp.concatenate([a, jnp.zeros((r, 128 - c), jnp.float32)], axis=-1)
        pad_r = (-r) % 8
        if pad_r:
            a = jnp.concatenate([a, jnp.zeros((pad_r, 128), jnp.float32)], axis=0)
        rows.append(a)
        off += r + pad_r
    slab = jnp.concatenate(rows, axis=0)
    return slab, layout


def _estimate_cost(layout, B, T, H2, in_arrays, out_shape):
    BH = B * T
    flops = 0
    for _, (_, r, c) in layout.items():
        flops += 2 * BH * r * c
    flops += 2 * 2 * T * (2 * B) * (2 * H2) * (4 * H2)        # recurrent matmuls
    transcendentals = 2 * T * (2 * B) * (9 * H2)
    bytes_accessed = 4 * (sum(int(a.size) for a in in_arrays) + int(math.prod(out_shape)))
    return pl.CostEstimate(flops=int(flops), transcendentals=int(transcendentals),
                           bytes_accessed=int(bytes_accessed))


# ----------------------------------------------------------------------------
# Forward (single fused pallas_call; wrapper only does free bitcast reshapes)
# ----------------------------------------------------------------------------
def forward(params, args, mfcc, spectrogram):
    slab, layout = params
    B, T, c0 = spectrogram.shape
    assert c0 == 128, "spectrogram channels must equal block_list[0] == 128"
    assert mfcc.shape == (B, T, args.input_size)
    assert args.input_size == 2 * T, "fused .view path assumes input_size == 2*T"
    assert B * T <= 128

    n_blocks = 2 * len(args.block_list.split(','))
    cfg = dict(B=B, T=T, Ci=args.input_size, H2=args.hidden_size_2,
               ncls=args.num_classes, n_blocks=n_blocks)

    spec2 = jnp.reshape(spectrogram, (B * c0, T))   # free bitcast of PyTorch .view

    kernel = functools.partial(fused_kernel, layout=layout, cfg=cfg)
    cost = _estimate_cost(layout, B, T, args.hidden_size_2,
                          (mfcc, spec2, slab), (B, T, args.num_classes))
    return pl.pallas_call(
        kernel,
        out_shape=jax.ShapeDtypeStruct((B, T, args.num_classes), jnp.float32),
        grid=(1,),
        in_specs=[pl.BlockSpec((B, T, args.input_size), lambda i: (0, 0, 0)),
                  pl.BlockSpec((B * c0, T), lambda i: (0, 0)),
                  pl.BlockSpec(slab.shape, lambda i: (0, 0))],
        out_specs=pl.BlockSpec((B, T, args.num_classes), lambda i: (0, 0, 0)),
        compiler_params=pltpu.CompilerParams(dimension_semantics=("arbitrary",)),
        cost_estimate=cost,
    )(mfcc, spec2, slab)


if __name__ == "__main__":
    args = Args()
    B, T = 2, 8
    key = jax.random.PRNGKey(0)
    k_m, k_s, k_p = jax.random.split(key, 3)

    mfcc = jax.random.normal(k_m, (B, T, args.input_size), jnp.float32)
    spectrogram = jax.random.normal(k_s, (B, T, 128), jnp.float32)
    slab, layout = build_params(k_p, args, B, T)

    fwd = jax.jit(lambda m, s, sl: forward((sl, layout), args, m, s))
    out = fwd(mfcc, spectrogram, slab)
    jax.block_until_ready(out)
    assert out.shape == (B, T, args.num_classes), out.shape
    assert out.dtype == jnp.float32
    print("KERNEL_OK")
</pallas_src>

<mosaic_0001>
module attributes {stable_mosaic.version = 11 : i64} {
  func.func @fused_kernel(%arg0: i32, %arg1: memref<2x8x16xf32, #tpu.memory_space<vmem>>, %arg2: memref<256x8xf32, #tpu.memory_space<vmem>>, %arg3: memref<1512x128xf32, #tpu.memory_space<vmem>>, %arg4: memref<2x8x5xf32, #tpu.memory_space<vmem>>) attributes {dimension_semantics = [#tpu.dimension_semantics<arbitrary>], iteration_bounds = array<i64: 1>, scalar_prefetch = 0 : i64, scratch_operands = 0 : i64, tpu.core_type = #tpu.core_type<tc>, window_params = [{pipeline_mode = #tpu.pipeline_mode<synchronous>, transform_indices = @transform_0, window_bounds = array<i64: 2, 8, 16>}, {pipeline_mode = #tpu.pipeline_mode<synchronous>, transform_indices = @transform_1, window_bounds = array<i64: 256, 8>}, {pipeline_mode = #tpu.pipeline_mode<synchronous>, transform_indices = @transform_2, window_bounds = array<i64: 1512, 128>}, {pipeline_mode = #tpu.pipeline_mode<synchronous>, transform_indices = @transform_3, window_bounds = array<i64: 2, 8, 5>}]} {
    %c0 = arith.constant 0 : index
    %c0_0 = arith.constant 0 : index
    %0 = vector.load %arg2[%c0, %c0_0] : memref<256x8xf32, #tpu.memory_space<vmem>>, vector<256x8xf32>
    %cst = arith.constant 0.000000e+00 : f32
    %1 = vector.broadcast %cst : f32 to vector<256x120xf32>
    %2 = tpu.concatenate %0, %1 in 1 : vector<256x8xf32>, vector<256x120xf32> -> vector<256x128xf32>
    %3 = tpu.transpose %2, [1, 0] : vector<256x128xf32> -> vector<128x256xf32>
    %4 = vector.extract_strided_slice %3 {offsets = [0, 0], sizes = [8, 256], strides = [1, 1]} : vector<128x256xf32> to vector<8x256xf32>
    %5 = vector.extract_strided_slice %4 {offsets = [0, 0], sizes = [8, 128], strides = [1, 1]} : vector<8x256xf32> to vector<8x128xf32>
    %6 = vector.extract_strided_slice %4 {offsets = [0, 128], sizes = [8, 128], strides = [1, 1]} : vector<8x256xf32> to vector<8x128xf32>
    %7 = tpu.concatenate %5, %6 in 0 : vector<8x128xf32>, vector<8x128xf32> -> vector<16x128xf32>
    %c0_1 = arith.constant 0 : index
    %c0_2 = arith.constant 0 : index
    %8 = vector.load %arg3[%c0_1, %c0_2] : memref<1512x128xf32, #tpu.memory_space<vmem>>, vector<384x32xf32>
    %c384 = arith.constant 384 : index
    %c0_3 = arith.constant 0 : index
    %9 = vector.load %arg3[%c384, %c0_3] : memref<1512x128xf32, #tpu.memory_space<vmem>>, vector<1x32xf32>
    %c392 = arith.constant 392 : index
    %c0_4 = arith.constant 0 : index
    %10 = vector.load %arg3[%c392, %c0_4] : memref<1512x128xf32, #tpu.memory_space<vmem>>, vector<128x32xf32>
    %c520 = arith.constant 520 : index
    %c0_5 = arith.constant 0 : index
    %11 = vector.load %arg3[%c520, %c0_5] : memref<1512x128xf32, #tpu.memory_space<vmem>>, vector<1x32xf32>
    %c528 = arith.constant 528 : index
    %c0_6 = arith.constant 0 : index
    %12 = vector.load %arg3[%c528, %c0_6] : memref<1512x128xf32, #tpu.memory_space<vmem>>, vector<96x32xf32>
    %c624 = arith.constant 624 : index
    %c0_7 = arith.constant 0 : index
    %13 = vector.load %arg3[%c624, %c0_7] : memref<1512x128xf32, #tpu.memory_space<vmem>>, vector<1x32xf32>
    %14 = vector.extract_strided_slice %8 {offsets = [0, 0], sizes = [128, 32], strides = [1, 1]} : vector<384x32xf32> to vector<128x32xf32>
    %cst_8 = arith.constant dense<0.000000e+00> : vector<16x32xf32>
    %15 = tpu.matmul %7, %14, %cst_8 {dimension_numbers = #tpu.dot_dimension_numbers<[1], [0], [0], [1], [0, 0, 1, 1], [], []>} : vector<16x128xf32>, vector<128x32xf32>, vector<16x32xf32> -> vector<16x32xf32>
    %16 = vector.shape_cast %15 : vector<16x32xf32> to vector<2x8x32xf32>
    %17 = vector.extract_strided_slice %8 {offsets = [128, 0], sizes = [128, 32], strides = [1, 1]} : vector<384x32xf32> to vector<128x32xf32>
    %cst_9 = arith.constant dense<0.000000e+00> : vector<16x32xf32>
    %18 = tpu.matmul %7, %17, %cst_9 {dimension_numbers = #tpu.dot_dimension_numbers<[1], [0], [0], [1], [0, 0, 1, 1], [], []>} : vector<16x128xf32>, vector<128x32xf32>, vector<16x32xf32> -> vector<16x32xf32>
    %19 = vector.broadcast %9 : vector<1x32xf32> to vector<16x32xf32>
    %20 = arith.addf %18, %19 : vector<16x32xf32>
    %21 = vector.shape_cast %20 : vector<16x32xf32> to vector<2x8x32xf32>
    %22 = vector.extract_strided_slice %8 {offsets = [256, 0], sizes = [128, 32], strides = [1, 1]} : vector<384x32xf32> to vector<128x32xf32>
    %cst_10 = arith.constant dense<0.000000e+00> : vector<16x32xf32>
    %23 = tpu.matmul %7, %22, %cst_10 {dimension_numbers = #tpu.dot_dimension_numbers<[1], [0], [0], [1], [0, 0, 1, 1], [], []>} : vector<16x128xf32>, vector<128x32xf32>, vector<16x32xf32> -> vector<16x32xf32>
    %24 = vector.shape_cast %23 : vector<16x32xf32> to vector<2x8x32xf32>
    %cst_11 = arith.constant 0.000000e+00 : f32
    %25 = vector.broadcast %cst_11 : f32 to vector<2x1x32xf32>
    %26 = vector.extract_strided_slice %16 {offsets = [0, 0, 0], sizes = [2, 7, 32], strides = [1, 1, 1]} : vector<2x8x32xf32> to vector<2x7x32xf32>
    %27 = tpu.concatenate %25, %26 in 1 : vector<2x1x32xf32>, vector<2x7x32xf32> -> vector<2x8x32xf32>
    %28 = arith.addf %27, %21 : vector<2x8x32xf32>
    %29 = vector.extract_strided_slice %24 {offsets = [0, 1, 0], sizes = [2, 7, 32], strides = [1, 1, 1]} : vector<2x8x32xf32> to vector<2x7x32xf32>
    %cst_12 = arith.constant 0.000000e+00 : f32
    %30 = vector.broadcast %cst_12 : f32 to vector<2x1x32xf32>
    %31 = tpu.concatenate %29, %30 in 1 : vector<2x7x32xf32>, vector<2x1x32xf32> -> vector<2x8x32xf32>
    %32 = arith.addf %28, %31 : vector<2x8x32xf32>
    %cst_13 = arith.constant 0.000000e+00 : f32
    %33 = vector.broadcast %cst_13 : f32 to vector<2x8x32xf32>
    %34 = arith.maximumf %32, %33 : vector<2x8x32xf32>
    %cst_14 = arith.constant dense<0.000000e+00> : vector<16x32xf32>
    %35 = tpu.matmul %7, %10, %cst_14 {dimension_numbers = #tpu.dot_dimension_numbers<[1], [0], [0], [1], [0, 0, 1, 1], [], []>} : vector<16x128xf32>, vector<128x32xf32>, vector<16x32xf32> -> vector<16x32xf32>
    %36 = vector.broadcast %11 : vector<1x32xf32> to vector<16x32xf32>
    %37 = arith.addf %35, %36 : vector<16x32xf32>
    %38 = vector.shape_cast %37 : vector<16x32xf32> to vector<2x8x32xf32>
    %39 = vector.shape_cast %34 : vector<2x8x32xf32> to vector<16x32xf32>
    %40 = vector.extract_strided_slice %12 {offsets = [0, 0], sizes = [32, 32], strides = [1, 1]} : vector<96x32xf32> to vector<32x32xf32>
    %cst_15 = arith.constant dense<0.000000e+00> : vector<16x32xf32>
    %41 = tpu.matmul %39, %40, %cst_15 {dimension_numbers = #tpu.dot_dimension_numbers<[1], [0], [0], [1], [0, 0, 1, 1], [], []>} : vector<16x32xf32>, vector<32x32xf32>, vector<16x32xf32> -> vector<16x32xf32>
    %42 = vector.shape_cast %41 : vector<16x32xf32> to vector<2x8x32xf32>
    %43 = vector.extract_strided_slice %12 {offsets = [32, 0], sizes = [32, 32], strides = [1, 1]} : vector<96x32xf32> to vector<32x32xf32>
    %cst_16 = arith.constant dense<0.000000e+00> : vector<16x32xf32>
    %44 = tpu.matmul %39, %43, %cst_16 {dimension_numbers = #tpu.dot_dimension_numbers<[1], [0], [0], [1], [0, 0, 1, 1], [], []>} : vector<16x32xf32>, vector<32x32xf32>, vector<16x32xf32> -> vector<16x32xf32>
    %45 = vector.broadcast %13 : vector<1x32xf32> to vector<16x32xf32>
    %46 = arith.addf %44, %45 : vector<16x32xf32>
    %47 = vector.shape_cast %46 : vector<16x32xf32> to vector<2x8x32xf32>
    %48 = vector.extract_strided_slice %12 {offsets = [64, 0], sizes = [32, 32], strides = [1, 1]} : vector<96x32xf32> to vector<32x32xf32>
    %cst_17 = arith.constant dense<0.000000e+00> : vector<16x32xf32>
    %49 = tpu.matmul %39, %48, %cst_17 {dimension_numbers = #tpu.dot_dimension_numbers<[1], [0], [0], [1], [0, 0, 1, 1], [], []>} : vector<16x32xf32>, vector<32x32xf32>, vector<16x32xf32> -> vector<16x32xf32>
    %50 = vector.shape_cast %49 : vector<16x32xf32> to vector<2x8x32xf32>
    %cst_18 = arith.constant 0.000000e+00 : f32
    %51 = vector.broadcast %cst_18 : f32 to vector<2x1x32xf32>
    %52 = vector.extract_strided_slice %42 {offsets = [0, 0, 0], sizes = [2, 7, 32], strides = [1, 1, 1]} : vector<2x8x32xf32> to vector<2x7x32xf32>
    %53 = tpu.concatenate %51, %52 in 1 : vector<2x1x32xf32>, vector<2x7x32xf32> -> vector<2x8x32xf32>
    %54 = arith.addf %53, %47 : vector<2x8x32xf32>
    %55 = vector.extract_strided_slice %50 {offsets = [0, 1, 0], sizes = [2, 7, 32], strides = [1, 1, 1]} : vector<2x8x32xf32> to vector<2x7x32xf32>
    %cst_19 = arith.constant 0.000000e+00 : f32
    %56 = vector.broadcast %cst_19 : f32 to vector<2x1x32xf32>
    %57 = tpu.concatenate %55, %56 in 1 : vector<2x7x32xf32>, vector<2x1x32xf32> -> vector<2x8x32xf32>
    %58 = arith.addf %54, %57 : vector<2x8x32xf32>
    %59 = arith.addf %38, %58 : vector<2x8x32xf32>
    %60 = vector.shape_cast %59 : vector<2x8x32xf32> to vector<16x32xf32>
    %c632 = arith.constant 632 : index
    %c0_20 = arith.constant 0 : index
    %61 = vector.load %arg3[%c632, %c0_20] : memref<1512x128xf32, #tpu.memory_space<vmem>>, vector<96x32xf32>
    %c728 = arith.constant 728 : index
    %c0_21 = arith.constant 0 : index
    %62 = vector.load %arg3[%c728, %c0_21] : memref<1512x128xf32, #tpu.memory_space<vmem>>, vector<1x32xf32>
    %c736 = arith.constant 736 : index
    %c0_22 = arith.constant 0 : index
    %63 = vector.load %arg3[%c736, %c0_22] : memref<1512x128xf32, #tpu.memory_space<vmem>>, vector<32x32xf32>
    %c768 = arith.constant 768 : index
    %c0_23 = arith.constant 0 : index
    %64 = vector.load %arg3[%c768, %c0_23] : memref<1512x128xf32, #tpu.memory_space<vmem>>, vector<1x32xf32>
    %c776 = arith.constant 776 : index
    %c0_24 = arith.constant 0 : index
    %65 = vector.load %arg3[%c776, %c0_24] : memref<1512x128xf32, #tpu.memory_space<vmem>>, vector<96x32xf32>
    %c872 = arith.constant 872 : index
    %c0_25 = arith.constant 0 : index
    %66 = vector.load %arg3[%c872, %c0_25] : memref<1512x128xf32, #tpu.memory_space<vmem>>, vector<1x32xf32>
    %67 = vector.extract_strided_slice %61 {offsets = [0, 0], sizes = [32, 32], strides = [1, 1]} : vector<96x32xf32> to vector<32x32xf32>
    %cst_26 = arith.constant dense<0.000000e+00> : vector<16x32xf32>
    %68 = tpu.matmul %60, %67, %cst_26 {dimension_numbers = #tpu.dot_dimension_numbers<[1], [0], [0], [1], [0, 0, 1, 1], [], []>} : vector<16x32xf32>, vector<32x32xf32>, vector<16x32xf32> -> vector<16x32xf32>
    %69 = vector.shape_cast %68 : vector<16x32xf32> to vector<2x8x32xf32>
    %70 = vector.extract_strided_slice %61 {offsets = [32, 0], sizes = [32, 32], strides = [1, 1]} : vector<96x32xf32> to vector<32x32xf32>
    %cst_27 = arith.constant dense<0.000000e+00> : vector<16x32xf32>
    %71 = tpu.matmul %60, %70, %cst_27 {dimension_numbers = #tpu.dot_dimension_numbers<[1], [0], [0], [1], [0, 0, 1, 1], [], []>} : vector<16x32xf32>, vector<32x32xf32>, vector<16x32xf32> -> vector<16x32xf32>
    %72 = vector.broadcast %62 : vector<1x32xf32> to vector<16x32xf32>
    %73 = arith.addf %71, %72 : vector<16x32xf32>
    %74 = vector.shape_cast %73 : vector<16x32xf32> to vector<2x8x32xf32>
    %75 = vector.extract_strided_slice %61 {offsets = [64, 0], sizes = [32, 32], strides = [1, 1]} : vector<96x32xf32> to vector<32x32xf32>
    %cst_28 = arith.constant dense<0.000000e+00> : vector<16x32xf32>
    %76 = tpu.matmul %60, %75, %cst_28 {dimension_numbers = #tpu.dot_dimension_numbers<[1], [0], [0], [1], [0, 0, 1, 1], [], []>} : vector<16x32xf32>, vector<32x32xf32>, vector<16x32xf32> -> vector<16x32xf32>
    %77 = vector.shape_cast %76 : vector<16x32xf32> to vector<2x8x32xf32>
    %cst_29 = arith.constant 0.000000e+00 : f32
    %78 = vector.broadcast %cst_29 : f32 to vector<2x1x32xf32>
    %79 = vector.extract_strided_slice %69 {offsets = [0, 0, 0], sizes = [2, 7, 32], strides = [1, 1, 1]} : vector<2x8x32xf32> to vector<2x7x32xf32>
    %80 = tpu.concatenate %78, %79 in 1 : vector<2x1x32xf32>, vector<2x7x32xf32> -> vector<2x8x32xf32>
    %81 = arith.addf %80, %74 : vector<2x8x32xf32>
    %82 = vector.extract_strided_slice %77 {offsets = [0, 1, 0], sizes = [2, 7, 32], strides = [1, 1, 1]} : vector<2x8x32xf32> to vector<2x7x32xf32>
    %cst_30 = arith.constant 0.000000e+00 : f32
    %83 = vector.broadcast %cst_30 : f32 to vector<2x1x32xf32>
    %84 = tpu.concatenate %82, %83 in 1 : vector<2x7x32xf32>, vector<2x1x32xf32> -> vector<2x8x32xf32>
    %85 = arith.addf %81, %84 : vector<2x8x32xf32>
    %cst_31 = arith.constant 0.000000e+00 : f32
    %86 = vector.broadcast %cst_31 : f32 to vector<2x8x32xf32>
    %87 = arith.maximumf %85, %86 : vector<2x8x32xf32>
    %cst_32 = arith.constant dense<0.000000e+00> : vector<16x32xf32>
    %88 = tpu.matmul %60, %63, %cst_32 {dimension_numbers = #tpu.dot_dimension_numbers<[1], [0], [0], [1], [0, 0, 1, 1], [], []>} : vector<16x32xf32>, vector<32x32xf32>, vector<16x32xf32> -> vector<16x32xf32>
    %89 = vector.broadcast %64 : vector<1x32xf32> to vector<16x32xf32>
    %90 = arith.addf %88, %89 : vector<16x32xf32>
    %91 = vector.shape_cast %90 : vector<16x32xf32> to vector<2x8x32xf32>
    %92 = vector.shape_cast %87 : vector<2x8x32xf32> to vector<16x32xf32>
    %93 = vector.extract_strided_slice %65 {offsets = [0, 0], sizes = [32, 32], strides = [1, 1]} : vector<96x32xf32> to vector<32x32xf32>
    %cst_33 = arith.constant dense<0.000000e+00> : vector<16x32xf32>
    %94 = tpu.matmul %92, %93, %cst_33 {dimension_numbers = #tpu.dot_dimension_numbers<[1], [0], [0], [1], [0, 0, 1, 1], [], []>} : vector<16x32xf32>, vector<32x32xf32>, vector<16x32xf32> -> vector<16x32xf32>
    %95 = vector.shape_cast %94 : vector<16x32xf32> to vector<2x8x32xf32>
    %96 = vector.extract_strided_slice %65 {offsets = [32, 0], sizes = [32, 32], strides = [1, 1]} : vector<96x32xf32> to vector<32x32xf32>
    %cst_34 = arith.constant dense<0.000000e+00> : vector<16x32xf32>
    %97 = tpu.matmul %92, %96, %cst_34 {dimension_numbers = #tpu.dot_dimension_numbers<[1], [0], [0], [1], [0, 0, 1, 1], [], []>} : vector<16x32xf32>, vector<32x32xf32>, vector<16x32xf32> -> vector<16x32xf32>
    %98 = vector.broadcast %66 : vector<1x32xf32> to vector<16x32xf32>
    %99 = arith.addf %97, %98 : vector<16x32xf32>
    %100 = vector.shape_cast %99 : vector<16x32xf32> to vector<2x8x32xf32>
    %101 = vector.extract_strided_slice %65 {offsets = [64, 0], sizes = [32, 32], strides = [1, 1]} : vector<96x32xf32> to vector<32x32xf32>
    %cst_35 = arith.constant dense<0.000000e+00> : vector<16x32xf32>
    %102 = tpu.matmul %92, %101, %cst_35 {dimension_numbers = #tpu.dot_dimension_numbers<[1], [0], [0], [1], [0, 0, 1, 1], [], []>} : vector<16x32xf32>, vector<32x32xf32>, vector<16x32xf32> -> vector<16x32xf32>
    %103 = vector.shape_cast %102 : vector<16x32xf32> to vector<2x8x32xf32>
    %cst_36 = arith.constant 0.000000e+00 : f32
    %104 = vector.broadcast %cst_36 : f32 to vector<2x1x32xf32>
    %105 = vector.extract_strided_slice %95 {offsets = [0, 0, 0], sizes = [2, 7, 32], strides = [1, 1, 1]} : vector<2x8x32xf32> to vector<2x7x32xf32>
    %106 = tpu.concatenate %104, %105 in 1 : vector<2x1x32xf32>, vector<2x7x32xf32> -> vector<2x8x32xf32>
    %107 = arith.addf %106, %100 : vector<2x8x32xf32>
    %108 = vector.extract_strided_slice %103 {offsets = [0, 1, 0], sizes = [2, 7, 32], strides = [1, 1, 1]} : vector<2x8x32xf32> to vector<2x7x32xf32>
    %cst_37 = arith.constant 0.000000e+00 : f32
    %109 = vector.broadcast %cst_37 : f32 to vector<2x1x32xf32>
    %110 = tpu.concatenate %108, %109 in 1 : vector<2x7x32xf32>, vector<2x1x32xf32> -> vector<2x8x32xf32>
    %111 = arith.addf %107, %110 : vector<2x8x32xf32>
    %112 = arith.addf %91, %111 : vector<2x8x32xf32>
    %113 = vector.shape_cast %112 : vector<2x8x32xf32> to vector<16x32xf32>
    %c880 = arith.constant 880 : index
    %c0_38 = arith.constant 0 : index
    %114 = vector.load %arg3[%c880, %c0_38] : memref<1512x128xf32, #tpu.memory_space<vmem>>, vector<32x16xf32>
    %cst_39 = arith.constant dense<0.000000e+00> : vector<16x16xf32>
    %115 = tpu.matmul %113, %114, %cst_39 {dimension_numbers = #tpu.dot_dimension_numbers<[1], [0], [0], [1], [0, 0, 1, 1], [], []>} : vector<16x32xf32>, vector<32x16xf32>, vector<16x16xf32> -> vector<16x16xf32>
    %c912 = arith.constant 912 : index
    %c0_40 = arith.constant 0 : index
    %116 = vector.load %arg3[%c912, %c0_40] : memref<1512x128xf32, #tpu.memory_space<vmem>>, vector<1x16xf32>
    %117 = vector.broadcast %116 : vector<1x16xf32> to vector<16x16xf32>
    %118 = arith.addf %115, %117 : vector<16x16xf32>
    %cst_41 = arith.constant 0.000000e+00 : f32
    %119 = vector.broadcast %cst_41 : f32 to vector<16x16xf32>
    %120 = arith.maximumf %118, %119 : vector<16x16xf32>
    %cst_42 = arith.constant 0.000000e+00 : f32
    %121 = vector.broadcast %cst_42 : f32 to vector<16x112xf32>
    %122 = tpu.concatenate %120, %121 in 1 : vector<16x16xf32>, vector<16x112xf32> -> vector<16x128xf32>
    %cst_43 = arith.constant 0.000000e+00 : f32
    %123 = vector.broadcast %cst_43 : f32 to vector<112x128xf32>
    %124 = tpu.concatenate %122, %123 in 0 : vector<16x128xf32>, vector<112x128xf32> -> vector<128x128xf32>
    %125 = tpu.transpose %124, [1, 0] : vector<128x128xf32> -> vector<128x128xf32>
    %126 = vector.extract_strided_slice %125 {offsets = [0, 0], sizes = [8, 8], strides = [1, 1]} : vector<128x128xf32> to vector<8x8xf32>
    %127 = vector.extract_strided_slice %125 {offsets = [8, 0], sizes = [8, 8], strides = [1, 1]} : vector<128x128xf32> to vector<8x8xf32>
    %128 = tpu.concatenate %126, %127 in 1 : vector<8x8xf32>, vector<8x8xf32> -> vector<8x16xf32>
    %129 = vector.extract_strided_slice %125 {offsets = [0, 8], sizes = [8, 8], strides = [1, 1]} : vector<128x128xf32> to vector<8x8xf32>
    %130 = vector.extract_strided_slice %125 {offsets = [8, 8], sizes = [8, 8], strides = [1, 1]} : vector<128x128xf32> to vector<8x8xf32>
    %131 = tpu.concatenate %129, %130 in 1 : vector<8x8xf32>, vector<8x8xf32> -> vector<8x16xf32>
    %132 = tpu.concatenate %128, %131 in 0 : vector<8x16xf32>, vector<8x16xf32> -> vector<16x16xf32>
    %c0_44 = arith.constant 0 : index
    %c0_45 = arith.constant 0 : index
    %c0_46 = arith.constant 0 : index
    %133 = vector.load %arg1[%c0_44, %c0_45, %c0_46] : memref<2x8x16xf32, #tpu.memory_space<vmem>>, vector<2x8x16xf32>
    %134 = vector.shape_cast %133 : vector<2x8x16xf32> to vector<16x16xf32>
    %135 = arith.addf %134, %132 : vector<16x16xf32>
    %c920 = arith.constant 920 : index
    %c0_47 = arith.constant 0 : index
    %136 = vector.load %arg3[%c920, %c0_47] : memref<1512x128xf32, #tpu.memory_space<vmem>>, vector<16x32xf32>
    %cst_48 = arith.constant dense<0.000000e+00> : vector<16x32xf32>
    %137 = tpu.matmul %135, %136, %cst_48 {dimension_numbers = #tpu.dot_dimension_numbers<[1], [0], [0], [1], [0, 0, 1, 1], [], []>} : vector<16x16xf32>, vector<16x32xf32>, vector<16x32xf32> -> vector<16x32xf32>
    %c936 = arith.constant 936 : index
    %c0_49 = arith.constant 0 : index
    %138 = vector.load %arg3[%c936, %c0_49] : memref<1512x128xf32, #tpu.memory_space<vmem>>, vector<1x32xf32>
    %139 = vector.broadcast %138 : vector<1x32xf32> to vector<16x32xf32>
    %140 = arith.addf %137, %139 : vector<16x32xf32>
    %cst_50 = arith.constant 0.000000e+00 : f32
    %141 = vector.broadcast %cst_50 : f32 to vector<16x32xf32>
    %142 = arith.maximumf %140, %141 : vector<16x32xf32>
    %c944 = arith.constant 944 : index
    %c0_51 = arith.constant 0 : index
    %143 = vector.load %arg3[%c944, %c0_51] : memref<1512x128xf32, #tpu.memory_space<vmem>>, vector<32x32xf32>
    %cst_52 = arith.constant dense<0.000000e+00> : vector<16x32xf32>
    %144 = tpu.matmul %142, %143, %cst_52 {dimension_numbers = #tpu.dot_dimension_numbers<[1], [0], [0], [1], [0, 0, 1, 1], [], []>} : vector<16x32xf32>, vector<32x32xf32>, vector<16x32xf32> -> vector<16x32xf32>
    %c976 = arith.constant 976 : index
    %c0_53 = arith.constant 0 : index
    %145 = vector.load %arg3[%c976, %c0_53] : memref<1512x128xf32, #tpu.memory_space<vmem>>, vector<1x32xf32>
    %146 = vector.broadcast %145 : vector<1x32xf32> to vector<16x32xf32>
    %147 = arith.addf %144, %146 : vector<16x32xf32>
    %cst_54 = arith.constant 0.000000e+00 : f32
    %148 = vector.broadcast %cst_54 : f32 to vector<16x32xf32>
    %149 = arith.maximumf %147, %148 : vector<16x32xf32>
    %c1336 = arith.constant 1336 : index
    %c0_55 = arith.constant 0 : index
    %150 = vector.load %arg3[%c1336, %c0_55] : memref<1512x128xf32, #tpu.memory_space<vmem>>, vector<32x16xf32>
    %c1368 = arith.constant 1368 : index
    %c0_56 = arith.constant 0 : index
    %151 = vector.load %arg3[%c1368, %c0_56] : memref<1512x128xf32, #tpu.memory_space<vmem>>, vector<32x16xf32>
    %c1400 = arith.constant 1400 : index
    %c0_57 = arith.constant 0 : index
    %152 = vector.load %arg3[%c1400, %c0_57] : memref<1512x128xf32, #tpu.memory_space<vmem>>, vector<16x32xf32>
    %c1416 = arith.constant 1416 : index
    %c0_58 = arith.constant 0 : index
    %153 = vector.load %arg3[%c1416, %c0_58] : memref<1512x128xf32, #tpu.memory_space<vmem>>, vector<16x32xf32>
    %c1432 = arith.constant 1432 : index
    %c0_59 = arith.constant 0 : index
    %154 = vector.load %arg3[%c1432, %c0_59] : memref<1512x128xf32, #tpu.memory_space<vmem>>, vector<4x64xf32>
    %c984 = arith.constant 984 : index
    %c0_60 = arith.constant 0 : index
    %155 = vector.load %arg3[%c984, %c0_60] : memref<1512x128xf32, #tpu.memory_space<vmem>>, vector<32x128xf32>
    %cst_61 = arith.constant dense<0.000000e+00> : vector<16x128xf32>
    %156 = tpu.matmul %149, %155, %cst_61 {dimension_numbers = #tpu.dot_dimension_numbers<[1], [0], [0], [1], [0, 0, 1, 1], [], []>} : vector<16x32xf32>, vector<32x128xf32>, vector<16x128xf32> -> vector<16x128xf32>
    %c1016 = arith.constant 1016 : index
    %c0_62 = arith.constant 0 : index
    %157 = vector.load %arg3[%c1016, %c0_62] : memref<1512x128xf32, #tpu.memory_space<vmem>>, vector<1x128xf32>
    %158 = vector.broadcast %157 : vector<1x128xf32> to vector<16x128xf32>
    %159 = arith.addf %156, %158 : vector<16x128xf32>
    %c1024 = arith.constant 1024 : index
    %c0_63 = arith.constant 0 : index
    %160 = vector.load %arg3[%c1024, %c0_63] : memref<1512x128xf32, #tpu.memory_space<vmem>>, vector<32x128xf32>
    %cst_64 = arith.constant dense<0.000000e+00> : vector<16x128xf32>
    %161 = tpu.matmul %149, %160, %cst_64 {dimension_numbers = #tpu.dot_dimension_numbers<[1], [0], [0], [1], [0, 0, 1, 1], [], []>} : vector<16x32xf32>, vector<32x128xf32>, vector<16x128xf32> -> vector<16x128xf32>
    %c1056 = arith.constant 1056 : index
    %c0_65 = arith.constant 0 : index
    %162 = vector.load %arg3[%c1056, %c0_65] : memref<1512x128xf32, #tpu.memory_space<vmem>>, vector<1x128xf32>
    %163 = vector.broadcast %162 : vector<1x128xf32> to vector<16x128xf32>
    %164 = arith.addf %161, %163 : vector<16x128xf32>
    %cst_66 = arith.constant dense<0.000000e+00> : vector<32x128xf32>
    %165 = tpu.matmul %150, %159, %cst_66 {dimension_numbers = #tpu.dot_dimension_numbers<[1], [0], [0], [1], [0, 0, 1, 1], [], []>} : vector<32x16xf32>, vector<16x128xf32>, vector<32x128xf32> -> vector<32x128xf32>
    %cst_67 = arith.constant dense<0.000000e+00> : vector<32x128xf32>
    %166 = tpu.matmul %151, %164, %cst_67 {dimension_numbers = #tpu.dot_dimension_numbers<[1], [0], [0], [1], [0, 0, 1, 1], [], []>} : vector<32x16xf32>, vector<16x128xf32>, vector<32x128xf32> -> vector<32x128xf32>
    %167 = arith.addf %165, %166 : vector<32x128xf32>
    %c1064 = arith.constant 1064 : index
    %c0_68 = arith.constant 0 : index
    %168 = vector.load %arg3[%c1064, %c0_68] : memref<1512x128xf32, #tpu.memory_space<vmem>>, vector<64x128xf32>
    %cst_69 = arith.constant 0.000000e+00 : f32
    %169 = vector.broadcast %cst_69 : f32 to vector<4x64xf32>
    %cst_70 = arith.constant 0.000000e+00 : f32
    %170 = vector.broadcast %cst_70 : f32 to vector<4x32xf32>
    %171 = vector.extract_strided_slice %167 {offsets = [0, 0], sizes = [4, 128], strides = [1, 1]} : vector<32x128xf32> to vector<4x128xf32>
    %cst_71 = arith.constant dense<0.000000e+00> : vector<4x128xf32>
    %172 = tpu.matmul %169, %168, %cst_71 {dimension_numbers = #tpu.dot_dimension_numbers<[1], [0], [0], [1], [0, 0, 1, 1], [], []>} : vector<4x64xf32>, vector<64x128xf32>, vector<4x128xf32> -> vector<4x128xf32>
    %173 = arith.addf %171, %172 : vector<4x128xf32>
    %174 = arith.negf %173 : vector<4x128xf32>
    %175 = math.exp %174 : vector<4x128xf32>
    %cst_72 = arith.constant 1.000000e+00 : f32
    %176 = vector.broadcast %cst_72 : f32 to vector<4x128xf32>
    %177 = arith.addf %176, %175 : vector<4x128xf32>
    %178 = arith.divf %176, %177 : vector<4x128xf32>
    %179 = math.tanh %173 : vector<4x128xf32>
    %180 = vector.extract_strided_slice %178 {offsets = [0, 0], sizes = [4, 32], strides = [1, 1]} : vector<4x128xf32> to vector<4x32xf32>
    %181 = vector.extract_strided_slice %178 {offsets = [0, 32], sizes = [4, 32], strides = [1, 1]} : vector<4x128xf32> to vector<4x32xf32>
    %182 = vector.extract_strided_slice %179 {offsets = [0, 64], sizes = [4, 32], strides = [1, 1]} : vector<4x128xf32> to vector<4x32xf32>
    %183 = vector.extract_strided_slice %178 {offsets = [0, 96], sizes = [4, 32], strides = [1, 1]} : vector<4x128xf32> to vector<4x32xf32>
    %184 = arith.mulf %181, %170 : vector<4x32xf32>
    %185 = arith.mulf %180, %182 : vector<4x32xf32>
    %186 = arith.addf %184, %185 : vector<4x32xf32>
    %187 = math.tanh %186 : vector<4x32xf32>
    %188 = arith.mulf %183, %187 : vector<4x32xf32>
    %189 = tpu.concatenate %188, %188 in 1 : vector<4x32xf32>, vector<4x32xf32> -> vector<4x64xf32>
    %190 = arith.mulf %189, %154 : vector<4x64xf32>
    %191 = vector.extract_strided_slice %167 {offsets = [4, 0], sizes = [4, 128], strides = [1, 1]} : vector<32x128xf32> to vector<4x128xf32>
    %cst_73 = arith.constant dense<0.000000e+00> : vector<4x128xf32>
    %192 = tpu.matmul %190, %168, %cst_73 {dimension_numbers = #tpu.dot_dimension_numbers<[1], [0], [0], [1], [0, 0, 1, 1], [], []>} : vector<4x64xf32>, vector<64x128xf32>, vector<4x128xf32> -> vector<4x128xf32>
    %193 = arith.addf %191, %192 : vector<4x128xf32>
    %194 = arith.negf %193 : vector<4x128xf32>
    %195 = math.exp %194 : vector<4x128xf32>
    %cst_74 = arith.constant 1.000000e+00 : f32
    %196 = vector.broadcast %cst_74 : f32 to vector<4x128xf32>
    %197 = arith.addf %196, %195 : vector<4x128xf32>
    %198 = arith.divf %196, %197 : vector<4x128xf32>
    %199 = math.tanh %193 : vector<4x128xf32>
    %200 = vector.extract_strided_slice %198 {offsets = [0, 0], sizes = [4, 32], strides = [1, 1]} : vector<4x128xf32> to vector<4x32xf32>
    %201 = vector.extract_strided_slice %198 {offsets = [0, 32], sizes = [4, 32], strides = [1, 1]} : vector<4x128xf32> to vector<4x32xf32>
    %202 = vector.extract_strided_slice %199 {offsets = [0, 64], sizes = [4, 32], strides = [1, 1]} : vector<4x128xf32> to vector<4x32xf32>
    %203 = vector.extract_strided_slice %198 {offsets = [0, 96], sizes = [4, 32], strides = [1, 1]} : vector<4x128xf32> to vector<4x32xf32>
    %204 = arith.mulf %201, %186 : vector<4x32xf32>
    %205 = arith.mulf %200, %202 : vector<4x32xf32>
    %206 = arith.addf %204, %205 : vector<4x32xf32>
    %207 = math.tanh %206 : vector<4x32xf32>
    %208 = arith.mulf %203, %207 : vector<4x32xf32>
    %209 = tpu.concatenate %208, %208 in 1 : vector<4x32xf32>, vector<4x32xf32> -> vector<4x64xf32>
    %210 = arith.mulf %209, %154 : vector<4x64xf32>
    %211 = vector.extract_strided_slice %167 {offsets = [8, 0], sizes = [4, 128], strides = [1, 1]} : vector<32x128xf32> to vector<4x128xf32>
    %cst_75 = arith.constant dense<0.000000e+00> : vector<4x128xf32>
    %212 = tpu.matmul %210, %168, %cst_75 {dimension_numbers = #tpu.dot_dimension_numbers<[1], [0], [0], [1], [0, 0, 1, 1], [], []>} : vector<4x64xf32>, vector<64x128xf32>, vector<4x128xf32> -> vector<4x128xf32>
    %213 = arith.addf %211, %212 : vector<4x128xf32>
    %214 = arith.negf %213 : vector<4x128xf32>
    %215 = math.exp %214 : vector<4x128xf32>
    %cst_76 = arith.constant 1.000000e+00 : f32
    %216 = vector.broadcast %cst_76 : f32 to vector<4x128xf32>
    %217 = arith.addf %216, %215 : vector<4x128xf32>
    %218 = arith.divf %216, %217 : vector<4x128xf32>
    %219 = math.tanh %213 : vector<4x128xf32>
    %220 = vector.extract_strided_slice %218 {offsets = [0, 0], sizes = [4, 32], strides = [1, 1]} : vector<4x128xf32> to vector<4x32xf32>
    %221 = vector.extract_strided_slice %218 {offsets = [0, 32], sizes = [4, 32], strides = [1, 1]} : vector<4x128xf32> to vector<4x32xf32>
    %222 = vector.extract_strided_slice %219 {offsets = [0, 64], sizes = [4, 32], strides = [1, 1]} : vector<4x128xf32> to vector<4x32xf32>
    %223 = vector.extract_strided_slice %218 {offsets = [0, 96], sizes = [4, 32], strides = [1, 1]} : vector<4x128xf32> to vector<4x32xf32>
    %224 = arith.mulf %221, %206 : vector<4x32xf32>
    %225 = arith.mulf %220, %222 : vector<4x32xf32>
    %226 = arith.addf %224, %225 : vector<4x32xf32>
    %227 = math.tanh %226 : vector<4x32xf32>
    %228 = arith.mulf %223, %227 : vector<4x32xf32>
    %229 = tpu.concatenate %228, %228 in 1 : vector<4x32xf32>, vector<4x32xf32> -> vector<4x64xf32>
    %230 = arith.mulf %229, %154 : vector<4x64xf32>
    %231 = vector.extract_strided_slice %167 {offsets = [12, 0], sizes = [4, 128], strides = [1, 1]} : vector<32x128xf32> to vector<4x128xf32>
    %cst_77 = arith.constant dense<0.000000e+00> : vector<4x128xf32>
    %232 = tpu.matmul %230, %168, %cst_77 {dimension_numbers = #tpu.dot_dimension_numbers<[1], [0], [0], [1], [0, 0, 1, 1], [], []>} : vector<4x64xf32>, vector<64x128xf32>, vector<4x128xf32> -> vector<4x128xf32>
    %233 = arith.addf %231, %232 : vector<4x128xf32>
    %234 = arith.negf %233 : vector<4x128xf32>
    %235 = math.exp %234 : vector<4x128xf32>
    %cst_78 = arith.constant 1.000000e+00 : f32
    %236 = vector.broadcast %cst_78 : f32 to vector<4x128xf32>
    %237 = arith.addf %236, %235 : vector<4x128xf32>
    %238 = arith.divf %236, %237 : vector<4x128xf32>
    %239 = math.tanh %233 : vector<4x128xf32>
    %240 = vector.extract_strided_slice %238 {offsets = [0, 0], sizes = [4, 32], strides = [1, 1]} : vector<4x128xf32> to vector<4x32xf32>
    %241 = vector.extract_strided_slice %238 {offsets = [0, 32], sizes = [4, 32], strides = [1, 1]} : vector<4x128xf32> to vector<4x32xf32>
    %242 = vector.extract_strided_slice %239 {offsets = [0, 64], sizes = [4, 32], strides = [1, 1]} : vector<4x128xf32> to vector<4x32xf32>
    %243 = vector.extract_strided_slice %238 {offsets = [0, 96], sizes = [4, 32], strides = [1, 1]} : vector<4x128xf32> to vector<4x32xf32>
    %244 = arith.mulf %241, %226 : vector<4x32xf32>
    %245 = arith.mulf %240, %242 : vector<4x32xf32>
    %246 = arith.addf %244, %245 : vector<4x32xf32>
    %247 = math.tanh %246 : vector<4x32xf32>
    %248 = arith.mulf %243, %247 : vector<4x32xf32>
    %249 = tpu.concatenate %248, %248 in 1 : vector<4x32xf32>, vector<4x32xf32> -> vector<4x64xf32>
    %250 = arith.mulf %249, %154 : vector<4x64xf32>
    %251 = vector.extract_strided_slice %167 {offsets = [16, 0], sizes = [4, 128], strides = [1, 1]} : vector<32x128xf32> to vector<4x128xf32>
    %cst_79 = arith.constant dense<0.000000e+00> : vector<4x128xf32>
    %252 = tpu.matmul %250, %168, %cst_79 {dimension_numbers = #tpu.dot_dimension_numbers<[1], [0], [0], [1], [0, 0, 1, 1], [], []>} : vector<4x64xf32>, vector<64x128xf32>, vector<4x128xf32> -> vector<4x128xf32>
    %253 = arith.addf %251, %252 : vector<4x128xf32>
    %254 = arith.negf %253 : vector<4x128xf32>
    %255 = math.exp %254 : vector<4x128xf32>
    %cst_80 = arith.constant 1.000000e+00 : f32
    %256 = vector.broadcast %cst_80 : f32 to vector<4x128xf32>
    %257 = arith.addf %256, %255 : vector<4x128xf32>
    %258 = arith.divf %256, %257 : vector<4x128xf32>
    %259 = math.tanh %253 : vector<4x128xf32>
    %260 = vector.extract_strided_slice %258 {offsets = [0, 0], sizes = [4, 32], strides = [1, 1]} : vector<4x128xf32> to vector<4x32xf32>
    %261 = vector.extract_strided_slice %258 {offsets = [0, 32], sizes = [4, 32], strides = [1, 1]} : vector<4x128xf32> to vector<4x32xf32>
    %262 = vector.extract_strided_slice %259 {offsets = [0, 64], sizes = [4, 32], strides = [1, 1]} : vector<4x128xf32> to vector<4x32xf32>
    %263 = vector.extract_strided_slice %258 {offsets = [0, 96], sizes = [4, 32], strides = [1, 1]} : vector<4x128xf32> to vector<4x32xf32>
    %264 = arith.mulf %261, %246 : vector<4x32xf32>
    %265 = arith.mulf %260, %262 : vector<4x32xf32>
    %266 = arith.addf %264, %265 : vector<4x32xf32>
    %267 = math.tanh %266 : vector<4x32xf32>
    %268 = arith.mulf %263, %267 : vector<4x32xf32>
    %269 = tpu.concatenate %268, %268 in 1 : vector<4x32xf32>, vector<4x32xf32> -> vector<4x64xf32>
    %270 = arith.mulf %269, %154 : vector<4x64xf32>
    %271 = vector.extract_strided_slice %167 {offsets = [20, 0], sizes = [4, 128], strides = [1, 1]} : vector<32x128xf32> to vector<4x128xf32>
    %cst_81 = arith.constant dense<0.000000e+00> : vector<4x128xf32>
    %272 = tpu.matmul %270, %168, %cst_81 {dimension_numbers = #tpu.dot_dimension_numbers<[1], [0], [0], [1], [0, 0, 1, 1], [], []>} : vector<4x64xf32>, vector<64x128xf32>, vector<4x128xf32> -> vector<4x128xf32>
    %273 = arith.addf %271, %272 : vector<4x128xf32>
    %274 = arith.negf %273 : vector<4x128xf32>
    %275 = math.exp %274 : vector<4x128xf32>
    %cst_82 = arith.constant 1.000000e+00 : f32
    %276 = vector.broadcast %cst_82 : f32 to vector<4x128xf32>
    %277 = arith.addf %276, %275 : vector<4x128xf32>
    %278 = arith.divf %276, %277 : vector<4x128xf32>
    %279 = math.tanh %273 : vector<4x128xf32>
    %280 = vector.extract_strided_slice %278 {offsets = [0, 0], sizes = [4, 32], strides = [1, 1]} : vector<4x128xf32> to vector<4x32xf32>
    %281 = vector.extract_strided_slice %278 {offsets = [0, 32], sizes = [4, 32], strides = [1, 1]} : vector<4x128xf32> to vector<4x32xf32>
    %282 = vector.extract_strided_slice %279 {offsets = [0, 64], sizes = [4, 32], strides = [1, 1]} : vector<4x128xf32> to vector<4x32xf32>
    %283 = vector.extract_strided_slice %278 {offsets = [0, 96], sizes = [4, 32], strides = [1, 1]} : vector<4x128xf32> to vector<4x32xf32>
    %284 = arith.mulf %281, %266 : vector<4x32xf32>
    %285 = arith.mulf %280, %282 : vector<4x32xf32>
    %286 = arith.addf %284, %285 : vector<4x32xf32>
    %287 = math.tanh %286 : vector<4x32xf32>
    %288 = arith.mulf %283, %287 : vector<4x32xf32>
    %289 = tpu.concatenate %288, %288 in 1 : vector<4x32xf32>, vector<4x32xf32> -> vector<4x64xf32>
    %290 = arith.mulf %289, %154 : vector<4x64xf32>
    %291 = vector.extract_strided_slice %167 {offsets = [24, 0], sizes = [4, 128], strides = [1, 1]} : vector<32x128xf32> to vector<4x128xf32>
    %cst_83 = arith.constant dense<0.000000e+00> : vector<4x128xf32>
    %292 = tpu.matmul %290, %168, %cst_83 {dimension_numbers = #tpu.dot_dimension_numbers<[1], [0], [0], [1], [0, 0, 1, 1], [], []>} : vector<4x64xf32>, vector<64x128xf32>, vector<4x128xf32> -> vector<4x128xf32>
    %293 = arith.addf %291, %292 : vector<4x128xf32>
    %294 = arith.negf %293 : vector<4x128xf32>
    %295 = math.exp %294 : vector<4x128xf32>
    %cst_84 = arith.constant 1.000000e+00 : f32
    %296 = vector.broadcast %cst_84 : f32 to vector<4x128xf32>
    %297 = arith.addf %296, %295 : vector<4x128xf32>
    %298 = arith.divf %296, %297 : vector<4x128xf32>
    %299 = math.tanh %293 : vector<4x128xf32>
    %300 = vector.extract_strided_slice %298 {offsets = [0, 0], sizes = [4, 32], strides = [1, 1]} : vector<4x128xf32> to vector<4x32xf32>
    %301 = vector.extract_strided_slice %298 {offsets = [0, 32], sizes = [4, 32], strides = [1, 1]} : vector<4x128xf32> to vector<4x32xf32>
    %302 = vector.extract_strided_slice %299 {offsets = [0, 64], sizes = [4, 32], strides = [1, 1]} : vector<4x128xf32> to vector<4x32xf32>
    %303 = vector.extract_strided_slice %298 {offsets = [0, 96], sizes = [4, 32], strides = [1, 1]} : vector<4x128xf32> to vector<4x32xf32>
    %304 = arith.mulf %301, %286 : vector<4x32xf32>
    %305 = arith.mulf %300, %302 : vector<4x32xf32>
    %306 = arith.addf %304, %305 : vector<4x32xf32>
    %307 = math.tanh %306 : vector<4x32xf32>
    %308 = arith.mulf %303, %307 : vector<4x32xf32>
    %309 = tpu.concatenate %308, %308 in 1 : vector<4x32xf32>, vector<4x32xf32> -> vector<4x64xf32>
    %310 = arith.mulf %309, %154 : vector<4x64xf32>
    %311 = vector.extract_strided_slice %167 {offsets = [28, 0], sizes = [4, 128], strides = [1, 1]} : vector<32x128xf32> to vector<4x128xf32>
    %cst_85 = arith.constant dense<0.000000e+00> : vector<4x128xf32>
    %312 = tpu.matmul %310, %168, %cst_85 {dimension_numbers = #tpu.dot_dimension_numbers<[1], [0], [0], [1], [0, 0, 1, 1], [], []>} : vector<4x64xf32>, vector<64x128xf32>, vector<4x128xf32> -> vector<4x128xf32>
    %313 = arith.addf %311, %312 : vector<4x128xf32>
    %314 = arith.negf %313 : vector<4x128xf32>
    %315 = math.exp %314 : vector<4x128xf32>
    %cst_86 = arith.constant 1.000000e+00 : f32
    %316 = vector.broadcast %cst_86 : f32 to vector<4x128xf32>
    %317 = arith.addf %316, %315 : vector<4x128xf32>
    %318 = arith.divf %316, %317 : vector<4x128xf32>
    %319 = math.tanh %313 : vector<4x128xf32>
    %320 = vector.extract_strided_slice %318 {offsets = [0, 0], sizes = [4, 32], strides = [1, 1]} : vector<4x128xf32> to vector<4x32xf32>
    %321 = vector.extract_strided_slice %318 {offsets = [0, 32], sizes = [4, 32], strides = [1, 1]} : vector<4x128xf32> to vector<4x32xf32>
    %322 = vector.extract_strided_slice %319 {offsets = [0, 64], sizes = [4, 32], strides = [1, 1]} : vector<4x128xf32> to vector<4x32xf32>
    %323 = vector.extract_strided_slice %318 {offsets = [0, 96], sizes = [4, 32], strides = [1, 1]} : vector<4x128xf32> to vector<4x32xf32>
    %324 = arith.mulf %321, %306 : vector<4x32xf32>
    %325 = arith.mulf %320, %322 : vector<4x32xf32>
    %326 = arith.addf %324, %325 : vector<4x32xf32>
    %327 = math.tanh %326 : vector<4x32xf32>
    %328 = arith.mulf %323, %327 : vector<4x32xf32>
    %329 = tpu.concatenate %188, %208, %228, %248, %268, %288, %308, %328 in 0 : vector<4x32xf32>, vector<4x32xf32>, vector<4x32xf32>, vector<4x32xf32>, vector<4x32xf32>, vector<4x32xf32>, vector<4x32xf32>, vector<4x32xf32> -> vector<32x32xf32>
    %cst_87 = arith.constant dense<0.000000e+00> : vector<16x32xf32>
    %330 = tpu.matmul %152, %329, %cst_87 {dimension_numbers = #tpu.dot_dimension_numbers<[1], [0], [0], [1], [0, 0, 1, 1], [], []>} : vector<16x32xf32>, vector<32x32xf32>, vector<16x32xf32> -> vector<16x32xf32>
    %cst_88 = arith.constant dense<0.000000e+00> : vector<16x32xf32>
    %331 = tpu.matmul %153, %329, %cst_88 {dimension_numbers = #tpu.dot_dimension_numbers<[1], [0], [0], [1], [0, 0, 1, 1], [], []>} : vector<16x32xf32>, vector<32x32xf32>, vector<16x32xf32> -> vector<16x32xf32>
    %332 = tpu.concatenate %330, %331 in 1 : vector<16x32xf32>, vector<16x32xf32> -> vector<16x64xf32>
    %c1128 = arith.constant 1128 : index
    %c0_89 = arith.constant 0 : index
    %333 = vector.load %arg3[%c1128, %c0_89] : memref<1512x128xf32, #tpu.memory_space<vmem>>, vector<64x128xf32>
    %cst_90 = arith.constant dense<0.000000e+00> : vector<16x128xf32>
    %334 = tpu.matmul %332, %333, %cst_90 {dimension_numbers = #tpu.dot_dimension_numbers<[1], [0], [0], [1], [0, 0, 1, 1], [], []>} : vector<16x64xf32>, vector<64x128xf32>, vector<16x128xf32> -> vector<16x128xf32>
    %c1192 = arith.constant 1192 : index
    %c0_91 = arith.constant 0 : index
    %335 = vector.load %arg3[%c1192, %c0_91] : memref<1512x128xf32, #tpu.memory_space<vmem>>, vector<1x128xf32>
    %336 = vector.broadcast %335 : vector<1x128xf32> to vector<16x128xf32>
    %337 = arith.addf %334, %336 : vector<16x128xf32>
    %c1200 = arith.constant 1200 : index
    %c0_92 = arith.constant 0 : index
    %338 = vector.load %arg3[%c1200, %c0_92] : memref<1512x128xf32, #tpu.memory_space<vmem>>, vector<64x128xf32>
    %cst_93 = arith.constant dense<0.000000e+00> : vector<16x128xf32>
    %339 = tpu.matmul %332, %338, %cst_93 {dimension_numbers = #tpu.dot_dimension_numbers<[1], [0], [0], [1], [0, 0, 1, 1], [], []>} : vector<16x64xf32>, vector<64x128xf32>, vector<16x128xf32> -> vector<16x128xf32>
    %c1264 = arith.constant 1264 : index
    %c0_94 = arith.constant 0 : index
    %340 = vector.load %arg3[%c1264, %c0_94] : memref<1512x128xf32, #tpu.memory_space<vmem>>, vector<1x128xf32>
    %341 = vector.broadcast %340 : vector<1x128xf32> to vector<16x128xf32>
    %342 = arith.addf %339, %341 : vector<16x128xf32>
    %cst_95 = arith.constant dense<0.000000e+00> : vector<32x128xf32>
    %343 = tpu.matmul %150, %337, %cst_95 {dimension_numbers = #tpu.dot_dimension_numbers<[1], [0], [0], [1], [0, 0, 1, 1], [], []>} : vector<32x16xf32>, vector<16x128xf32>, vector<32x128xf32> -> vector<32x128xf32>
    %cst_96 = arith.constant dense<0.000000e+00> : vector<32x128xf32>
    %344 = tpu.matmul %151, %342, %cst_96 {dimension_numbers = #tpu.dot_dimension_numbers<[1], [0], [0], [1], [0, 0, 1, 1], [], []>} : vector<32x16xf32>, vector<16x128xf32>, vector<32x128xf32> -> vector<32x128xf32>
    %345 = arith.addf %343, %344 : vector<32x128xf32>
    %c1272 = arith.constant 1272 : index
    %c0_97 = arith.constant 0 : index
    %346 = vector.load %arg3[%c1272, %c0_97] : memref<1512x128xf32, #tpu.memory_space<vmem>>, vector<64x128xf32>
    %cst_98 = arith.constant 0.000000e+00 : f32
    %347 = vector.broadcast %cst_98 : f32 to vector<4x64xf32>
    %cst_99 = arith.constant 0.000000e+00 : f32
    %348 = vector.broadcast %cst_99 : f32 to vector<4x32xf32>
    %349 = vector.extract_strided_slice %345 {offsets = [0, 0], sizes = [4, 128], strides = [1, 1]} : vector<32x128xf32> to vector<4x128xf32>
    %cst_100 = arith.constant dense<0.000000e+00> : vector<4x128xf32>
    %350 = tpu.matmul %347, %346, %cst_100 {dimension_numbers = #tpu.dot_dimension_numbers<[1], [0], [0], [1], [0, 0, 1, 1], [], []>} : vector<4x64xf32>, vector<64x128xf32>, vector<4x128xf32> -> vector<4x128xf32>
    %351 = arith.addf %349, %350 : vector<4x128xf32>
    %352 = arith.negf %351 : vector<4x128xf32>
    %353 = math.exp %352 : vector<4x128xf32>
    %cst_101 = arith.constant 1.000000e+00 : f32
    %354 = vector.broadcast %cst_101 : f32 to vector<4x128xf32>
    %355 = arith.addf %354, %353 : vector<4x128xf32>
    %356 = arith.divf %354, %355 : vector<4x128xf32>
    %357 = math.tanh %351 : vector<4x128xf32>
    %358 = vector.extract_strided_slice %356 {offsets = [0, 0], sizes = [4, 32], strides = [1, 1]} : vector<4x128xf32> to vector<4x32xf32>
    %359 = vector.extract_strided_slice %356 {offsets = [0, 32], sizes = [4, 32], strides = [1, 1]} : vector<4x128xf32> to vector<4x32xf32>
    %360 = vector.extract_strided_slice %357 {offsets = [0, 64], sizes = [4, 32], strides = [1, 1]} : vector<4x128xf32> to vector<4x32xf32>
    %361 = vector.extract_strided_slice %356 {offsets = [0, 96], sizes = [4, 32], strides = [1, 1]} : vector<4x128xf32> to vector<4x32xf32>
    %362 = arith.mulf %359, %348 : vector<4x32xf32>
    %363 = arith.mulf %358, %360 : vector<4x32xf32>
    %364 = arith.addf %362, %363 : vector<4x32xf32>
    %365 = math.tanh %364 : vector<4x32xf32>
    %366 = arith.mulf %361, %365 : vector<4x32xf32>
    %367 = tpu.concatenate %366, %366 in 1 : vector<4x32xf32>, vector<4x32xf32> -> vector<4x64xf32>
    %368 = arith.mulf %367, %154 : vector<4x64xf32>
    %369 = vector.extract_strided_slice %345 {offsets = [4, 0], sizes = [4, 128], strides = [1, 1]} : vector<32x128xf32> to vector<4x128xf32>
    %cst_102 = arith.constant dense<0.000000e+00> : vector<4x128xf32>
    %370 = tpu.matmul %368, %346, %cst_102 {dimension_numbers = #tpu.dot_dimension_numbers<[1], [0], [0], [1], [0, 0, 1, 1], [], []>} : vector<4x64xf32>, vector<64x128xf32>, vector<4x128xf32> -> vector<4x128xf32>
    %371 = arith.addf %369, %370 : vector<4x128xf32>
    %372 = arith.negf %371 : vector<4x128xf32>
    %373 = math.exp %372 : vector<4x128xf32>
    %cst_103 = arith.constant 1.000000e+00 : f32
    %374 = vector.broadcast %cst_103 : f32 to vector<4x128xf32>
    %375 = arith.addf %374, %373 : vector<4x128xf32>
    %376 = arith.divf %374, %375 : vector<4x128xf32>
    %377 = math.tanh %371 : vector<4x128xf32>
    %378 = vector.extract_strided_slice %376 {offsets = [0, 0], sizes = [4, 32], strides = [1, 1]} : vector<4x128xf32> to vector<4x32xf32>
    %379 = vector.extract_strided_slice %376 {offsets = [0, 32], sizes = [4, 32], strides = [1, 1]} : vector<4x128xf32> to vector<4x32xf32>
    %380 = vector.extract_strided_slice %377 {offsets = [0, 64], sizes = [4, 32], strides = [1, 1]} : vector<4x128xf32> to vector<4x32xf32>
    %381 = vector.extract_strided_slice %376 {offsets = [0, 96], sizes = [4, 32], strides = [1, 1]} : vector<4x128xf32> to vector<4x32xf32>
    %382 = arith.mulf %379, %364 : vector<4x32xf32>
    %383 = arith.mulf %378, %380 : vector<4x32xf32>
    %384 = arith.addf %382, %383 : vector<4x32xf32>
    %385 = math.tanh %384 : vector<4x32xf32>
    %386 = arith.mulf %381, %385 : vector<4x32xf32>
    %387 = tpu.concatenate %386, %386 in 1 : vector<4x32xf32>, vector<4x32xf32> -> vector<4x64xf32>
    %388 = arith.mulf %387, %154 : vector<4x64xf32>
    %389 = vector.extract_strided_slice %345 {offsets = [8, 0], sizes = [4, 128], strides = [1, 1]} : vector<32x128xf32> to vector<4x128xf32>
    %cst_104 = arith.constant dense<0.000000e+00> : vector<4x128xf32>
    %390 = tpu.matmul %388, %346, %cst_104 {dimension_numbers = #tpu.dot_dimension_numbers<[1], [0], [0], [1], [0, 0, 1, 1], [], []>} : vector<4x64xf32>, vector<64x128xf32>, vector<4x128xf32> -> vector<4x128xf32>
    %391 = arith.addf %389, %390 : vector<4x128xf32>
    %392 = arith.negf %391 : vector<4x128xf32>
    %393 = math.exp %392 : vector<4x128xf32>
    %cst_105 = arith.constant 1.000000e+00 : f32
    %394 = vector.broadcast %cst_105 : f32 to vector<4x128xf32>
    %395 = arith.addf %394, %393 : vector<4x128xf32>
    %396 = arith.divf %394, %395 : vector<4x128xf32>
    %397 = math.tanh %391 : vector<4x128xf32>
    %398 = vector.extract_strided_slice %396 {offsets = [0, 0], sizes = [4, 32], strides = [1, 1]} : vector<4x128xf32> to vector<4x32xf32>
    %399 = vector.extract_strided_slice %396 {offsets = [0, 32], sizes = [4, 32], strides = [1, 1]} : vector<4x128xf32> to vector<4x32xf32>
    %400 = vector.extract_strided_slice %397 {offsets = [0, 64], sizes = [4, 32], strides = [1, 1]} : vector<4x128xf32> to vector<4x32xf32>
    %401 = vector.extract_strided_slice %396 {offsets = [0, 96], sizes = [4, 32], strides = [1, 1]} : vector<4x128xf32> to vector<4x32xf32>
    %402 = arith.mulf %399, %384 : vector<4x32xf32>
    %403 = arith.mulf %398, %400 : vector<4x32xf32>
    %404 = arith.addf %402, %403 : vector<4x32xf32>
    %405 = math.tanh %404 : vector<4x32xf32>
    %406 = arith.mulf %401, %405 : vector<4x32xf32>
    %407 = tpu.concatenate %406, %406 in 1 : vector<4x32xf32>, vector<4x32xf32> -> vector<4x64xf32>
    %408 = arith.mulf %407, %154 : vector<4x64xf32>
    %409 = vector.extract_strided_slice %345 {offsets = [12, 0], sizes = [4, 128], strides = [1, 1]} : vector<32x128xf32> to vector<4x128xf32>
    %cst_106 = arith.constant dense<0.000000e+00> : vector<4x128xf32>
    %410 = tpu.matmul %408, %346, %cst_106 {dimension_numbers = #tpu.dot_dimension_numbers<[1], [0], [0], [1], [0, 0, 1, 1], [], []>} : vector<4x64xf32>, vector<64x128xf32>, vector<4x128xf32> -> vector<4x128xf32>
    %411 = arith.addf %409, %410 : vector<4x128xf32>
    %412 = arith.negf %411 : vector<4x128xf32>
    %413 = math.exp %412 : vector<4x128xf32>
    %cst_107 = arith.constant 1.000000e+00 : f32
    %414 = vector.broadcast %cst_107 : f32 to vector<4x128xf32>
    %415 = arith.addf %414, %413 : vector<4x128xf32>
    %416 = arith.divf %414, %415 : vector<4x128xf32>
    %417 = math.tanh %411 : vector<4x128xf32>
    %418 = vector.extract_strided_slice %416 {offsets = [0, 0], sizes = [4, 32], strides = [1, 1]} : vector<4x128xf32> to vector<4x32xf32>
    %419 = vector.extract_strided_slice %416 {offsets = [0, 32], sizes = [4, 32], strides = [1, 1]} : vector<4x128xf32> to vector<4x32xf32>
    %420 = vector.extract_strided_slice %417 {offsets = [0, 64], sizes = [4, 32], strides = [1, 1]} : vector<4x128xf32> to vector<4x32xf32>
    %421 = vector.extract_strided_slice %416 {offsets = [0, 96], sizes = [4, 32], strides = [1, 1]} : vector<4x128xf32> to vector<4x32xf32>
    %422 = arith.mulf %419, %404 : vector<4x32xf32>
    %423 = arith.mulf %418, %420 : vector<4x32xf32>
    %424 = arith.addf %422, %423 : vector<4x32xf32>
    %425 = math.tanh %424 : vector<4x32xf32>
    %426 = arith.mulf %421, %425 : vector<4x32xf32>
    %427 = tpu.concatenate %426, %426 in 1 : vector<4x32xf32>, vector<4x32xf32> -> vector<4x64xf32>
    %428 = arith.mulf %427, %154 : vector<4x64xf32>
    %429 = vector.extract_strided_slice %345 {offsets = [16, 0], sizes = [4, 128], strides = [1, 1]} : vector<32x128xf32> to vector<4x128xf32>
    %cst_108 = arith.constant dense<0.000000e+00> : vector<4x128xf32>
    %430 = tpu.matmul %428, %346, %cst_108 {dimension_numbers = #tpu.dot_dimension_numbers<[1], [0], [0], [1], [0, 0, 1, 1], [], []>} : vector<4x64xf32>, vector<64x128xf32>, vector<4x128xf32> -> vector<4x128xf32>
    %431 = arith.addf %429, %430 : vector<4x128xf32>
    %432 = arith.negf %431 : vector<4x128xf32>
    %433 = math.exp %432 : vector<4x128xf32>
    %cst_109 = arith.constant 1.000000e+00 : f32
    %434 = vector.broadcast %cst_109 : f32 to vector<4x128xf32>
    %435 = arith.addf %434, %433 : vector<4x128xf32>
    %436 = arith.divf %434, %435 : vector<4x128xf32>
    %437 = math.tanh %431 : vector<4x128xf32>
    %438 = vector.extract_strided_slice %436 {offsets = [0, 0], sizes = [4, 32], strides = [1, 1]} : vector<4x128xf32> to vector<4x32xf32>
    %439 = vector.extract_strided_slice %436 {offsets = [0, 32], sizes = [4, 32], strides = [1, 1]} : vector<4x128xf32> to vector<4x32xf32>
    %440 = vector.extract_strided_slice %437 {offsets = [0, 64], sizes = [4, 32], strides = [1, 1]} : vector<4x128xf32> to vector<4x32xf32>
    %441 = vector.extract_strided_slice %436 {offsets = [0, 96], sizes = [4, 32], strides = [1, 1]} : vector<4x128xf32> to vector<4x32xf32>
    %442 = arith.mulf %439, %424 : vector<4x32xf32>
    %443 = arith.mulf %438, %440 : vector<4x32xf32>
    %444 = arith.addf %442, %443 : vector<4x32xf32>
    %445 = math.tanh %444 : vector<4x32xf32>
    %446 = arith.mulf %441, %445 : vector<4x32xf32>
    %447 = tpu.concatenate %446, %446 in 1 : vector<4x32xf32>, vector<4x32xf32> -> vector<4x64xf32>
    %448 = arith.mulf %447, %154 : vector<4x64xf32>
    %449 = vector.extract_strided_slice %345 {offsets = [20, 0], sizes = [4, 128], strides = [1, 1]} : vector<32x128xf32> to vector<4x128xf32>
    %cst_110 = arith.constant dense<0.000000e+00> : vector<4x128xf32>
    %450 = tpu.matmul %448, %346, %cst_110 {dimension_numbers = #tpu.dot_dimension_numbers<[1], [0], [0], [1], [0, 0, 1, 1], [], []>} : vector<4x64xf32>, vector<64x128xf32>, vector<4x128xf32> -> vector<4x128xf32>
    %451 = arith.addf %449, %450 : vector<4x128xf32>
    %452 = arith.negf %451 : vector<4x128xf32>
    %453 = math.exp %452 : vector<4x128xf32>
    %cst_111 = arith.constant 1.000000e+00 : f32
    %454 = vector.broadcast %cst_111 : f32 to vector<4x128xf32>
    %455 = arith.addf %454, %453 : vector<4x128xf32>
    %456 = arith.divf %454, %455 : vector<4x128xf32>
    %457 = math.tanh %451 : vector<4x128xf32>
    %458 = vector.extract_strided_slice %456 {offsets = [0, 0], sizes = [4, 32], strides = [1, 1]} : vector<4x128xf32> to vector<4x32xf32>
    %459 = vector.extract_strided_slice %456 {offsets = [0, 32], sizes = [4, 32], strides = [1, 1]} : vector<4x128xf32> to vector<4x32xf32>
    %460 = vector.extract_strided_slice %457 {offsets = [0, 64], sizes = [4, 32], strides = [1, 1]} : vector<4x128xf32> to vector<4x32xf32>
    %461 = vector.extract_strided_slice %456 {offsets = [0, 96], sizes = [4, 32], strides = [1, 1]} : vector<4x128xf32> to vector<4x32xf32>
    %462 = arith.mulf %459, %444 : vector<4x32xf32>
    %463 = arith.mulf %458, %460 : vector<4x32xf32>
    %464 = arith.addf %462, %463 : vector<4x32xf32>
    %465 = math.tanh %464 : vector<4x32xf32>
    %466 = arith.mulf %461, %465 : vector<4x32xf32>
    %467 = tpu.concatenate %466, %466 in 1 : vector<4x32xf32>, vector<4x32xf32> -> vector<4x64xf32>
    %468 = arith.mulf %467, %154 : vector<4x64xf32>
    %469 = vector.extract_strided_slice %345 {offsets = [24, 0], sizes = [4, 128], strides = [1, 1]} : vector<32x128xf32> to vector<4x128xf32>
    %cst_112 = arith.constant dense<0.000000e+00> : vector<4x128xf32>
    %470 = tpu.matmul %468, %346, %cst_112 {dimension_numbers = #tpu.dot_dimension_numbers<[1], [0], [0], [1], [0, 0, 1, 1], [], []>} : vector<4x64xf32>, vector<64x128xf32>, vector<4x128xf32> -> vector<4x128xf32>
    %471 = arith.addf %469, %470 : vector<4x128xf32>
    %472 = arith.negf %471 : vector<4x128xf32>
    %473 = math.exp %472 : vector<4x128xf32>
    %cst_113 = arith.constant 1.000000e+00 : f32
    %474 = vector.broadcast %cst_113 : f32 to vector<4x128xf32>
    %475 = arith.addf %474, %473 : vector<4x128xf32>
    %476 = arith.divf %474, %475 : vector<4x128xf32>
    %477 = math.tanh %471 : vector<4x128xf32>
    %478 = vector.extract_strided_slice %476 {offsets = [0, 0], sizes = [4, 32], strides = [1, 1]} : vector<4x128xf32> to vector<4x32xf32>
    %479 = vector.extract_strided_slice %476 {offsets = [0, 32], sizes = [4, 32], strides = [1, 1]} : vector<4x128xf32> to vector<4x32xf32>
    %480 = vector.extract_strided_slice %477 {offsets = [0, 64], sizes = [4, 32], strides = [1, 1]} : vector<4x128xf32> to vector<4x32xf32>
    %481 = vector.extract_strided_slice %476 {offsets = [0, 96], sizes = [4, 32], strides = [1, 1]} : vector<4x128xf32> to vector<4x32xf32>
    %482 = arith.mulf %479, %464 : vector<4x32xf32>
    %483 = arith.mulf %478, %480 : vector<4x32xf32>
    %484 = arith.addf %482, %483 : vector<4x32xf32>
    %485 = math.tanh %484 : vector<4x32xf32>
    %486 = arith.mulf %481, %485 : vector<4x32xf32>
    %487 = tpu.concatenate %486, %486 in 1 : vector<4x32xf32>, vector<4x32xf32> -> vector<4x64xf32>
    %488 = arith.mulf %487, %154 : vector<4x64xf32>
    %489 = vector.extract_strided_slice %345 {offsets = [28, 0], sizes = [4, 128], strides = [1, 1]} : vector<32x128xf32> to vector<4x128xf32>
    %cst_114 = arith.constant dense<0.000000e+00> : vector<4x128xf32>
    %490 = tpu.matmul %488, %346, %cst_114 {dimension_numbers = #tpu.dot_dimension_numbers<[1], [0], [0], [1], [0, 0, 1, 1], [], []>} : vector<4x64xf32>, vector<64x128xf32>, vector<4x128xf32> -> vector<4x128xf32>
    %491 = arith.addf %489, %490 : vector<4x128xf32>
    %492 = arith.negf %491 : vector<4x128xf32>
    %493 = math.exp %492 : vector<4x128xf32>
    %cst_115 = arith.constant 1.000000e+00 : f32
    %494 = vector.broadcast %cst_115 : f32 to vector<4x128xf32>
    %495 = arith.addf %494, %493 : vector<4x128xf32>
    %496 = arith.divf %494, %495 : vector<4x128xf32>
    %497 = math.tanh %491 : vector<4x128xf32>
    %498 = vector.extract_strided_slice %496 {offsets = [0, 0], sizes = [4, 32], strides = [1, 1]} : vector<4x128xf32> to vector<4x32xf32>
    %499 = vector.extract_strided_slice %496 {offsets = [0, 32], sizes = [4, 32], strides = [1, 1]} : vector<4x128xf32> to vector<4x32xf32>
    %500 = vector.extract_strided_slice %497 {offsets = [0, 64], sizes = [4, 32], strides = [1, 1]} : vector<4x128xf32> to vector<4x32xf32>
    %501 = vector.extract_strided_slice %496 {offsets = [0, 96], sizes = [4, 32], strides = [1, 1]} : vector<4x128xf32> to vector<4x32xf32>
    %502 = arith.mulf %499, %484 : vector<4x32xf32>
    %503 = arith.mulf %498, %500 : vector<4x32xf32>
    %504 = arith.addf %502, %503 : vector<4x32xf32>
    %505 = math.tanh %504 : vector<4x32xf32>
    %506 = arith.mulf %501, %505 : vector<4x32xf32>
    %507 = tpu.concatenate %366, %386, %406, %426, %446, %466, %486, %506 in 0 : vector<4x32xf32>, vector<4x32xf32>, vector<4x32xf32>, vector<4x32xf32>, vector<4x32xf32>, vector<4x32xf32>, vector<4x32xf32>, vector<4x32xf32> -> vector<32x32xf32>
    %cst_116 = arith.constant dense<0.000000e+00> : vector<16x32xf32>
    %508 = tpu.matmul %152, %507, %cst_116 {dimension_numbers = #tpu.dot_dimension_numbers<[1], [0], [0], [1], [0, 0, 1, 1], [], []>} : vector<16x32xf32>, vector<32x32xf32>, vector<16x32xf32> -> vector<16x32xf32>
    %cst_117 = arith.constant dense<0.000000e+00> : vector<16x32xf32>
    %509 = tpu.matmul %153, %507, %cst_117 {dimension_numbers = #tpu.dot_dimension_numbers<[1], [0], [0], [1], [0, 0, 1, 1], [], []>} : vector<16x32xf32>, vector<32x32xf32>, vector<16x32xf32> -> vector<16x32xf32>
    %510 = tpu.concatenate %508, %509 in 1 : vector<16x32xf32>, vector<16x32xf32> -> vector<16x64xf32>
    %c1440 = arith.constant 1440 : index
    %c0_118 = arith.constant 0 : index
    %511 = vector.load %arg3[%c1440, %c0_118] : memref<1512x128xf32, #tpu.memory_space<vmem>>, vector<64x5xf32>
    %cst_119 = arith.constant dense<0.000000e+00> : vector<16x5xf32>
    %512 = tpu.matmul %510, %511, %cst_119 {dimension_numbers = #tpu.dot_dimension_numbers<[1], [0], [0], [1], [0, 0, 1, 1], [], []>} : vector<16x64xf32>, vector<64x5xf32>, vector<16x5xf32> -> vector<16x5xf32>
    %c1504 = arith.constant 1504 : index
    %c0_120 = arith.constant 0 : index
    %513 = vector.load %arg3[%c1504, %c0_120] : memref<1512x128xf32, #tpu.memory_space<vmem>>, vector<1x5xf32>
    %514 = vector.broadcast %513 : vector<1x5xf32> to vector<16x5xf32>
    %515 = arith.addf %512, %514 : vector<16x5xf32>
    %516 = vector.shape_cast %515 : vector<16x5xf32> to vector<2x8x5xf32>
    %c0_121 = arith.constant 0 : index
    %c0_122 = arith.constant 0 : index
    %c0_123 = arith.constant 0 : index
    %517 = vector.load %arg4[%c0_121, %c0_122, %c0_123] : memref<2x8x5xf32, #tpu.memory_space<vmem>>, vector<2x8x5xf32>
    tpu.vector_store %arg4[%c0_121, %c0_122, %c0_123], %516 {strides = array<i32>} : memref<2x8x5xf32, #tpu.memory_space<vmem>>, vector<2x8x5xf32>,
    return
  }
  func.func @transform_0(%arg0: i32) -> (i32, i32, i32) {
    %c0_i32 = arith.constant 0 : i32
    %c0_i32_0 = arith.constant 0 : i32
    %c0_i32_1 = arith.constant 0 : i32
    %c0_i32_2 = arith.constant 0 : i32
    return %c0_i32, %c0_i32_0, %c0_i32_1 : i32, i32, i32
  }
  func.func @transform_1(%arg0: i32) -> (i32, i32) {
    %c0_i32 = arith.constant 0 : i32
    %c0_i32_0 = arith.constant 0 : i32
    %c0_i32_1 = arith.constant 0 : i32
    return %c0_i32, %c0_i32_0 : i32, i32
  }
  func.func @transform_2(%arg0: i32) -> (i32, i32) {
    %c0_i32 = arith.constant 0 : i32
    %c0_i32_0 = arith.constant 0 : i32
    %c0_i32_1 = arith.constant 0 : i32
    return %c0_i32, %c0_i32_0 : i32, i32
  }
  func.func @transform_3(%arg0: i32) -> (i32, i32, i32) {
    %c0_i32 = arith.constant 0 : i32
    %c0_i32_0 = arith.constant 0 : i32
    %c0_i32_1 = arith.constant 0 : i32
    %c0_i32_2 = arith.constant 0 : i32
    return %c0_i32, %c0_i32_0, %c0_i32_1 : i32, i32, i32
  }
}

</mosaic_0001>

<bundles_post_ra>
// kernel: _lambda_.1
= control target key start
LH: loop header
LB: loop body
LE: loop exit
PB: predicated region body
PF: predicated region fallthrough
CT: control target
= control target key end

     0   :  { %8 = vsyncpa [#allocation3], 0  ;;  %s6202_s12 = smov [#allocation2]   ;;  %s7028_s0 = inlined_call_operand.vmem [shape: f32[2,8,16], index: 0, kind: input, shape index: {}]   ;;  %s7029_s1 = inlined_call_operand.vmem [shape: f32[256,8], index: 1, kind: input, shape index: {}]   ;;  %s7030_s2 = inlined_call_operand.hbm [shape: f32[1512,128], index: 2, kind: input, shape index: {}]   ;;  %s7031_s3 = inlined_call_operand.vmem [shape: f32[2,8,5], index: 3, kind: output, shape index: {}]  }
   0x1   :  { %s18_s13 = sshll.u32 %s6202_s12, 4  ;;  %s19_s13 = int_to_ptr.vmem [resolvable:$true] %s18_s13 }
   0x2   :  { %s6188_s14 = scalar_lea.vmem %s19_s13, 24192  ;;  %p6193_p1 = scmp.lt.s32.totalorder %s19_s13, %s19_s13 }
   0x3   :  { %p6189_p0 = scmp.ne.s32.totalorder %s19_s13, %s6188_s14  ;;  %p6194_p2 = scmp.lt.s32.totalorder %s6188_s14, %s6188_s14 }
   0x5   :  { %p6195_p3 = por %p6194_p2, %p6193_p1 }
   0x7   :  { %p6196_p4 = pnand %p6195_p3, %p6189_p0 }
   0x9   :  { %6199 = shalt.err (!%p6196_p4)
}
   0xa   :  { %s6203_s15 = smov 128   ;;  %s6204_s16 = smov 8  }
   0xb   :  { %24 = dma.hbm_to_vmem [thread:$0]  %s7030_s2, 24192, %s19_s13, [#allocation3], %s6203_s15, %s6203_s15, %s6204_s16  }
   0xc   :  { %6200 = dma.done.wait [#allocation3], 24192  }
   0xd   :  { %6201 = vsyncadd [#allocation3], 4294943104  ;;  %vm60_vm0 = vcmask 64512   ;;  %v28_v0 = vld [vmem:[%s7029_s1] sm:$0xff]  ;;  %v29_v2 = vld [vmem:[%s7029_s1 + $0x8] sm:$0xff]  ;;  %vm471_vm1 = vcmask 1040384  }
   0xe   :  { %v44_v1 = vld [vmem:[%s7029_s1 + $0x80] sm:$0xff]  ;;  %v61_v3 = vsel %vm60_vm0, %v28_v0, 0.0  ;;  %v45_v5 = vld [vmem:[%s7029_s1 + $0x88] sm:$0xff]  ;;  %v62_v6 = vsel %vm60_vm0, %v29_v2, 0.0  ;;  %v30_v9 = vld [vmem:[%s7029_s1 + $0x10] sm:$0xff]  ;;  %vm482_vm2 = vcmask 1046528  }
   0xf   :  { %v77_v4 = vsel %vm60_vm0, %v44_v1, 0.0  ;;  %v78_v8 = vsel %vm60_vm0, %v45_v5, 0.0  ;;  %v46_v10 = vld [vmem:[%s7029_s1 + $0x90] sm:$0xff]  ;;  %v63_v12 = vsel %vm60_vm0, %v30_v9, 0.0  ;;  %v31_v14 = vld [vmem:[%s7029_s1 + $0x18] sm:$0xff]  ;;  %v32_v19 = vld [vmem:[%s7029_s1 + $0x20] sm:$0xff] }
  0x10   :  { %v6004_v7 = vpack.i.bf16 %v77_v4, %v61_v3  ;;  %v6006_v11 = vpack.i.bf16 %v78_v8, %v62_v6  ;;  %v79_v13 = vsel %vm60_vm0, %v46_v10, 0.0  ;;  %v47_v15 = vld [vmem:[%s7029_s1 + $0x98] sm:$0xff]  ;;  %v64_v17 = vsel %vm60_vm0, %v31_v14, 0.0  ;;  %v48_v20 = vld [vmem:[%s7029_s1 + $0xa0] sm:$0xff]  ;;  %v171_v24 = vld [vmem:[#allocation2 + $0x70] sm:$0xff] }
  0x11   :  { %v6008_v16 = vpack.i.bf16 %v79_v13, %v63_v12  ;;  %v80_v18 = vsel %vm60_vm0, %v47_v15, 0.0  ;;  %v172_v21 = vld [vmem:[#allocation2 + $0x78] sm:$0xff]  ;;  %v187_v25 = vld [vmem:[#allocation2 + $0xf0] sm:$0xff]  ;;  %v65_v26 = vsel %vm60_vm0, %v32_v19, 0.0  ;;  %v81_v27 = vsel %vm60_vm0, %v48_v20, 0.0  ;;  %v33_v28 = vld [vmem:[%s7029_s1 + $0x28] sm:$0xff] }
  0x12   :  { %6005 = vxpose.xlu0.b32.start [1/16] (narrow) %v6004_v7, 8  ;;  %v188_v22 = vld [vmem:[#allocation2 + $0xf8] sm:$0xff]  ;;  %v6010_v23 = vpack.i.bf16 %v80_v18, %v64_v17  ;;  %5250 = vmatprep.subr.mxu0 %v172_v21  ;;  %v49_v29 = vld [vmem:[%s7029_s1 + $0xa8] sm:$0xff]  ;;  %v6012_v32 = vpack.i.bf16 %v81_v27, %v65_v26  ;;  %v169_v33 = vld [vmem:[#allocation2 + $0x60] sm:$0xff]  ;;  %v66_v35 = vsel %vm60_vm0, %v33_v28, 0.0  ;;  %vm568_vm3 = vcmask 261120  }
  0x13   :  { %5285 = vmatprep.subr.mxu1 %v188_v22  ;;  %5251 = vmatpush3.msra.mxu0 %v172_v21  ;;  %v170_v30 = vld [vmem:[#allocation2 + $0x68] sm:$0xff]  ;;  %v185_v34 = vld [vmem:[#allocation2 + $0xe0] sm:$0xff]  ;;  %v82_v36 = vsel %vm60_vm0, %v49_v29, 0.0  ;;  %v34_v37 = vld [vmem:[%s7029_s1 + $0x30] sm:$0xff]  ;;  %vm1542_vm4 = vcmask 130048   ;;  %vm6207_vm5 = vmmov 0  }
  0x14   :  { %5286 = vmatpush3.msra.mxu1 %v188_v22  ;;  %5252 = vmatprep.subr.mxu0 %v171_v24  ;;  %v186_v31 = vld [vmem:[#allocation2 + $0xe8] sm:$0xff]  ;;  %v50_v38 = vld [vmem:[%s7029_s1 + $0xb0] sm:$0xff]  ;;  %v168_v39 = vld [vmem:[#allocation2 + $0x58] sm:$0xff]  ;;  %v6014_v41 = vpack.i.bf16 %v82_v36, %v66_v35  ;;  %v67_v43 = vsel %vm60_vm0, %v34_v37, 0.0  ;;  %vm2162_vm6 = vcmask 523264   ;;  %vm3049_vm7 = vcmask 1043456  }
  0x15   :  { %5287 = vmatprep.subr.mxu1 %v187_v25  ;;  %5253 = vmatpush3.msra.mxu0 %v171_v24  ;;  %v184_v40 = vld [vmem:[#allocation2 + $0xd8] sm:$0xff]  ;;  %v167_v42 = vld [vmem:[#allocation2 + $0x50] sm:$0xff]  ;;  %v83_v44 = vsel %vm60_vm0, %v50_v38, 0.0  ;;  %v166_v48 = vld [vmem:[#allocation2 + $0x48] sm:$0xff]  ;;  %vm4756_vm8 = vcmask 39936  }
  0x16   :  { %6007 = vxpose.xlu0.b32.cont [2/16] (narrow) %v6006_v11, 8  ;;  %5288 = vmatpush3.msra.mxu1 %v187_v25  ;;  %v183_v45 = vld [vmem:[#allocation2 + $0xd0] sm:$0xff]  ;;  %v35_v46 = vld [vmem:[%s7029_s1 + $0x38] sm:$0xff]  ;;  %v182_v49 = vld [vmem:[#allocation2 + $0xc8] sm:$0xff]  ;;  %v6016_v50 = vpack.i.bf16 %v83_v44, %v67_v43 }
  0x17   :  { %5254 = vmatprep.subr.mxu0 %v170_v30  ;;  %5289 = vmatprep.subr.mxu1 %v186_v31  ;;  %v51_v47 = vld [vmem:[%s7029_s1 + $0xb8] sm:$0xff]  ;;  %v68_v51 = vsel %vm60_vm0, %v35_v46, 0.0  ;;  %v165_v53 = vld [vmem:[#allocation2 + $0x40] sm:$0xff]  ;;  %v37_v62 = vld [vmem:[%s7029_s1 + $0x48] sm:$0xff] }
  0x18   :  { %5255 = vmatpush3.msra.mxu0 %v170_v30  ;;  %5290 = vmatpush3.msra.mxu1 %v186_v31  ;;  %v84_v52 = vsel %vm60_vm0, %v51_v47, 0.0  ;;  %v36_v54 = vld [vmem:[%s7029_s1 + $0x40] sm:$0xff]  ;;  %v164_v57 = vld [vmem:[#allocation2 + $0x38] sm:$0xff]  ;;  %v53_v63 = vld [vmem:[%s7029_s1 + $0xc8] sm:$0xff]  ;;  %v70_v5 = vsel %vm60_vm0, %v37_v62, 0.0 }
  0x19   :  { %5256 = vmatprep.subr.mxu0 %v169_v33  ;;  %5291 = vmatprep.subr.mxu1 %v185_v34  ;;  %v52_v55 = vld [vmem:[%s7029_s1 + $0xc0] sm:$0xff]  ;;  %v6018_v58 = vpack.i.bf16 %v84_v52, %v68_v51  ;;  %v180_v59 = vld [vmem:[#allocation2 + $0xb8] sm:$0xff]  ;;  %v69_v60 = vsel %vm60_vm0, %v36_v54, 0.0  ;;  %v163_v0 = vld [vmem:[#allocation2 + $0x30] sm:$0xff]  ;;  %v86_v6 = vsel %vm60_vm0, %v53_v63, 0.0 }
  0x1a   :  { %6009 = vxpose.xlu0.b32.cont [3/16] (narrow) %v6008_v16, 8  ;;  %5257 = vmatpush3.msra.mxu0 %v169_v33  ;;  %v181_v56 = vld [vmem:[#allocation2 + $0xc0] sm:$0xff]  ;;  %v85_v61 = vsel %vm60_vm0, %v52_v55, 0.0  ;;  %v179_v1 = vld [vmem:[#allocation2 + $0xb0] sm:$0xff]  ;;  %v162_v3 = vld [vmem:[#allocation2 + $0x28] sm:$0xff]  ;;  %v6022_v11 = vpack.i.bf16 %v86_v6, %v70_v5 }
  0x1b   :  { %5292 = vmatpush3.msra.mxu1 %v185_v34  ;;  %5258 = vmatprep.subr.mxu0 %v168_v39  ;;  %v6020_v2 = vpack.i.bf16 %v85_v61, %v69_v60  ;;  %v178_v4 = vld [vmem:[#allocation2 + $0xa8] sm:$0xff]  ;;  %v38_v7 = vld [vmem:[%s7029_s1 + $0x50] sm:$0xff]  ;;  %v161_v9 = vld [vmem:[#allocation2 + $0x20] sm:$0xff] }
  0x1c   :  { %5293 = vmatprep.subr.mxu1 %v184_v40  ;;  %5259 = vmatpush3.msra.mxu0 %v168_v39  ;;  %v54_v8 = vld [vmem:[%s7029_s1 + $0xd0] sm:$0xff]  ;;  %v177_v10 = vld [vmem:[#allocation2 + $0xa0] sm:$0xff]  ;;  %v160_v12 = vld [vmem:[#allocation2 + $0x18] sm:$0xff]  ;;  %v71_v13 = vsel %vm60_vm0, %v38_v7, 0.0 }
  0x1d   :  { %5294 = vmatpush3.msra.mxu1 %v184_v40  ;;  %5260 = vmatprep.subr.mxu0 %v167_v42  ;;  %v87_v14 = vsel %vm60_vm0, %v54_v8, 0.0  ;;  %v176_v15 = vld [vmem:[#allocation2 + $0x98] sm:$0xff]  ;;  %v159_v18 = vld [vmem:[#allocation2 + $0x10] sm:$0xff]  ;;  %v40_v24 = vld [vmem:[%s7029_s1 + $0x60] sm:$0xff] }
  0x1e   :  { %6011 = vxpose.xlu0.b32.cont [4/16] (narrow) %v6010_v23, 8  ;;  %5295 = vmatprep.subr.mxu1 %v183_v45  ;;  %v39_v16 = vld [vmem:[%s7029_s1 + $0x58] sm:$0xff]  ;;  %v175_v19 = vld [vmem:[#allocation2 + $0x90] sm:$0xff]  ;;  %v6024_v20 = vpack.i.bf16 %v87_v14, %v71_v13  ;;  %v158_v23 = vld [vmem:[#allocation2 + $0x8] sm:$0xff]  ;;  %v73_v30 = vsel %vm60_vm0, %v40_v24, 0.0 }
  0x1f   :  { %5261 = vmatpush3.msra.mxu0 %v167_v42  ;;  %5296 = vmatpush3.msra.mxu1 %v183_v45  ;;  %v55_v17 = vld [vmem:[%s7029_s1 + $0xd8] sm:$0xff]  ;;  %v72_v21 = vsel %vm60_vm0, %v39_v16, 0.0  ;;  %v56_v25 = vld [vmem:[%s7029_s1 + $0xe0] sm:$0xff]  ;;  %v174_v26 = vld [vmem:[#allocation2 + $0x88] sm:$0xff] }
  0x20   :  { %5262 = vmatprep.subr.mxu0 %v166_v48  ;;  %5297 = vmatprep.subr.mxu1 %v182_v49  ;;  %v88_v22 = vsel %vm60_vm0, %v55_v17, 0.0  ;;  %v157_v27 = vld [vmem:[#allocation2] sm:$0xff]  ;;  %v89_v31 = vsel %vm60_vm0, %v56_v25, 0.0  ;;  %v57_v33 = vld [vmem:[%s7029_s1 + $0xe8] sm:$0xff]  ;;  %v204_v34 = vld [vmem:[#allocation2 + $0x178] sm:$0xff] }
  0x21   :  { %5263 = vmatpush3.msra.mxu0 %v166_v48  ;;  %5298 = vmatpush3.msra.mxu1 %v182_v49  ;;  %v6026_v28 = vpack.i.bf16 %v88_v22, %v72_v21  ;;  %v173_v29 = vld [vmem:[#allocation2 + $0x80] sm:$0xff]  ;;  %v6028_v36 = vpack.i.bf16 %v89_v31, %v73_v30  ;;  %v90_v38 = vsel %vm60_vm0, %v57_v33, 0.0  ;;  %v42_v39 = vld [vmem:[%s7029_s1 + $0x70] sm:$0xff]  ;;  %v43_v44 = vld [vmem:[%s7029_s1 + $0x78] sm:$0xff] }
  0x22   :  { %6013 = vxpose.xlu0.b32.cont [5/16] (narrow) %v6012_v32, 8  ;;  %5264 = vmatprep.subr.mxu0 %v165_v53  ;;  %v41_v32 = vld [vmem:[%s7029_s1 + $0x68] sm:$0xff]  ;;  %v221_v35 = vld [vmem:[#allocation2 + $0x200] sm:$0xff]  ;;  %v58_v40 = vld [vmem:[%s7029_s1 + $0xf0] sm:$0xff]  ;;  %v75_v42 = vsel %vm60_vm0, %v42_v39, 0.0  ;;  %v76_v47 = vsel %vm60_vm0, %v43_v44, 0.0 }
  0x23   :  { %5299 = vmatprep.subr.mxu1 %v181_v56  ;;  %5265 = vmatpush3.msra.mxu0 %v165_v53  ;;  %v74_v37 = vsel %vm60_vm0, %v41_v32, 0.0  ;;  %v91_v43 = vsel %vm60_vm0, %v58_v40, 0.0  ;;  %v59_v45 = vld [vmem:[%s7029_s1 + $0xf8] sm:$0xff]  ;;  %v203_v53 = vld [vmem:[#allocation2 + $0x170] sm:$0xff]  ;;  %v202_v55 = vld [vmem:[#allocation2 + $0x168] sm:$0xff]  ;;  %s6205_s1 = smov 120  }
  0x24   :  { %5300 = vmatpush3.msra.mxu1 %v181_v56  ;;  %5266 = vmatprep.subr.mxu0 %v164_v57  ;;  %v6032_v46 = vpack.i.bf16 %v91_v43, %v75_v42  ;;  %v92_v48 = vsel %vm60_vm0, %v59_v45, 0.0  ;;  %v220_v54 = vld [vmem:[#allocation2 + $0x1f8] sm:$0xff]  ;;  %v219_v56 = vld [vmem:[#allocation2 + $0x1f0] sm:$0xff]  ;;  %v217_v60 = vld [vmem:[#allocation2 + $0x1e0] sm:$0xff] }
  0x25   :  { %5301 = vmatprep.subr.mxu1 %v180_v59  ;;  %5267 = vmatpush3.msra.mxu0 %v164_v57  ;;  %v6034_v49 = vpack.i.bf16 %v92_v48, %v76_v47  ;;  %v201_v57 = vld [vmem:[#allocation2 + $0x160] sm:$0xff]  ;;  %v199_v61 = vld [vmem:[#allocation2 + $0x150] sm:$0xff]  ;;  %v216_v62 = vld [vmem:[#allocation2 + $0x1d8] sm:$0xff] }
  0x26   :  { %6015 = vxpose.xlu0.b32.cont [6/16] (narrow) %v6014_v41, 8  ;;  %5302 = vmatpush3.msra.mxu1 %v180_v59  ;;  %v6030_v41 = vpack.i.bf16 %v90_v38, %v74_v37  ;;  %v200_v59 = vld [vmem:[#allocation2 + $0x158] sm:$0xff]  ;;  %v198_v63 = vld [vmem:[#allocation2 + $0x148] sm:$0xff]  ;;  %v195_v5 = vld [vmem:[#allocation2 + $0x130] sm:$0xff] }
  0x27   :  { %5268 = vmatprep.subr.mxu0 %v163_v0  ;;  %5303 = vmatprep.subr.mxu1 %v179_v1  ;;  %v212_v6 = vld [vmem:[#allocation2 + $0x1b8] sm:$0xff]  ;;  %v194_v7 = vld [vmem:[#allocation2 + $0x128] sm:$0xff]  ;;  %v211_v8 = vld [vmem:[#allocation2 + $0x1b0] sm:$0xff] }
  0x28   :  { %5269 = vmatpush3.msra.mxu0 %v163_v0  ;;  %5304 = vmatpush3.msra.mxu1 %v179_v1  ;;  %v215_v0 = vld [vmem:[#allocation2 + $0x1d0] sm:$0xff]  ;;  %v197_v1 = vld [vmem:[#allocation2 + $0x140] sm:$0xff]  ;;  %v208_v14 = vld [vmem:[#allocation2 + $0x198] sm:$0xff] }
  0x29   :  { %5270 = vmatprep.subr.mxu0 %v162_v3  ;;  %5305 = vmatprep.subr.mxu1 %v178_v4  ;;  %v191_v13 = vld [vmem:[#allocation2 + $0x110] sm:$0xff]  ;;  %v189_v17 = vld [vmem:[#allocation2 + $0x100] sm:$0xff]  ;;  %v232_v24 = vld [vmem:[#allocation2 + $0x258] sm:$0xff] }
  0x2a   :  { %6017 = vxpose.xlu0.b32.cont [7/16] (narrow) %v6016_v50, 8  ;;  %5271 = vmatpush3.msra.mxu0 %v162_v3  ;;  %v196_v3 = vld [vmem:[#allocation2 + $0x138] sm:$0xff]  ;;  %v207_v16 = vld [vmem:[#allocation2 + $0x190] sm:$0xff]  ;;  %v225_v21 = vld [vmem:[#allocation2 + $0x220] sm:$0xff] }
  0x2b   :  { %5306 = vmatpush3.msra.mxu1 %v178_v4  ;;  %5272 = vmatprep.subr.mxu0 %v161_v9  ;;  %v213_v4 = vld [vmem:[#allocation2 + $0x1c0] sm:$0xff]  ;;  %v223_v25 = vld [vmem:[#allocation2 + $0x210] sm:$0xff] }
  0x2c   :  { %5307 = vmatprep.subr.mxu1 %v177_v10  ;;  %5273 = vmatpush3.msra.mxu0 %v161_v9  ;;  %v193_v9 = vld [vmem:[#allocation2 + $0x120] sm:$0xff] }
  0x2d   :  { %5308 = vmatpush3.msra.mxu1 %v177_v10  ;;  %5274 = vmatprep.subr.mxu0 %v160_v12  ;;  %v210_v10 = vld [vmem:[#allocation2 + $0x1a8] sm:$0xff]  ;;  %v233_v22 = vld [vmem:[#allocation2 + $0x260] sm:$0xff] }
  0x2e   :  { %6019 = vxpose.xlu0.b32.cont [8/16] (narrow) %v6018_v58, 8  ;;  %5309 = vmatprep.subr.mxu1 %v176_v15  ;;  %v218_v58 = vld [vmem:[#allocation2 + $0x1e8] sm:$0xff]  ;;  %v4764_v32 = vld [vmem:[#allocation2 + $0x180] ss:$0 sm:$0xff] }
  0x2f   :  { %5275 = vmatpush3.msra.mxu0 %v160_v12  ;;  %5310 = vmatpush3.msra.mxu1 %v176_v15  ;;  %v209_v12 = vld [vmem:[#allocation2 + $0x1a0] sm:$0xff]  ;;  %v190_v15 = vld [vmem:[#allocation2 + $0x108] sm:$0xff] }
  0x30   :  { %5276 = vmatprep.subr.mxu0 %v159_v18  ;;  %5311 = vmatprep.subr.mxu1 %v175_v19 }
  0x31   :  { %5277 = vmatpush3.msra.mxu0 %v159_v18  ;;  %5312 = vmatpush3.msra.mxu1 %v175_v19  ;;  %v206_v18 = vld [vmem:[#allocation2 + $0x188] sm:$0xff] }
  0x32   :  { %6021 = vxpose.xlu0.b32.cont [9/16] (narrow) %v6020_v2, 8  ;;  %5278 = vmatprep.subr.mxu0 %v158_v23  ;;  %v214_v2 = vld [vmem:[#allocation2 + $0x1c8] sm:$0xff] }
  0x33   :  { %5313 = vmatprep.subr.mxu1 %v174_v26  ;;  %5279 = vmatpush3.msra.mxu0 %v158_v23  ;;  %v226_v19 = vld [vmem:[#allocation2 + $0x228] sm:$0xff]  ;;  %v224_v23 = vld [vmem:[#allocation2 + $0x218] sm:$0xff] }
  0x34   :  { %5314 = vmatpush3.msra.mxu1 %v174_v26  ;;  %5280 = vmatprep.subr.mxu0 %v157_v27  ;;  %v231_v26 = vld [vmem:[#allocation2 + $0x250] sm:$0xff] }
  0x35   :  { %5315 = vmatprep.subr.mxu1 %v173_v29  ;;  %5281 = vmatpush3.msra.mxu0 %v157_v27  ;;  %v230_v27 = vld [vmem:[#allocation2 + $0x248] sm:$0xff] }
  0x36   :  { %6023 = vxpose.xlu0.b32.cont [10/16] (narrow) %v6022_v11, 8  ;;  %5316 = vmatpush3.msra.mxu1 %v173_v29  ;;  %v192_v11 = vld [vmem:[#allocation2 + $0x118] sm:$0xff] }
  0x37   :  { %5320 = vmatprep.subr.mxu0 %v204_v34  ;;  %5355 = vmatprep.subr.mxu1 %v221_v35 }
  0x3a   :  { %6025 = vxpose.xlu0.b32.cont [11/16] (narrow) %v6024_v20, 8  ;;  %v234_v20 = vld [vmem:[#allocation2 + $0x268] sm:$0xff] }
  0x3e   :  { %6027 = vxpose.xlu0.b32.cont [12/16] (narrow) %v6026_v28, 8 }
  0x42   :  { %6029 = vxpose.xlu0.b32.cont [13/16] (narrow) %v6028_v36, 8 }
  0x46   :  { %6031 = vxpose.xlu0.b32.cont [14/16] (narrow) %v6030_v41, 8 }
  0x4a   :  { %6033 = vxpose.xlu0.b32.cont [15/16] (narrow) %v6032_v46, 8 }
  0x4e   :  { %6035 = vxpose.xlu0.b32.end [16/16] (narrow) %v6034_v49, 8 }
  0x8e   :  { %v6036_v50 = vpop.trf.xlu0 }
  0x8f   :  { %v6362_v51 = vunpack.i.h.bf16 %v6036_v50  ;;  %v6037_v52 = vunpack.i.l.bf16 %v6036_v50 }
  0x91   :  { %5282 = vmatprep.mubr.f32.mxu0 %v6037_v52  ;;  %5317 = vmatprep.mubr.f32.mxu1 %v6037_v52 }
  0x92   :  { %5283 = vmatmul.mubr.f32.vlgmr.msra.gmra.mxu0 %v6362_v51  ;;  %5318 = vmatmul.mubr.f32.vlgmr.msra.gmra.mxu1 %v6362_v51 }
  0x93   :  { %5321 = vmatpush3.msra.mxu0 %v204_v34  ;;  %5356 = vmatpush3.msra.mxu1 %v221_v35 }
  0x94   :  { %5322 = vmatprep.subr.mxu0 %v203_v53  ;;  %5352 = vmatprep.mubr.f32.mxu0 %v6037_v52 }
  0x95   :  { %5357 = vmatprep.subr.mxu1 %v220_v54  ;;  %5387 = vmatprep.mubr.f32.mxu1 %v6037_v52  ;;  %v228_v52 = vld [vmem:[#allocation2 + $0x238] sm:$0xff] }
  0x96   :  { %5323 = vmatpush3.msra.mxu0 %v203_v53  ;;  %5358 = vmatpush3.msra.mxu1 %v220_v54  ;;  %v227_v53 = vld [vmem:[#allocation2 + $0x230] sm:$0xff] }
  0x97   :  { %5324 = vmatprep.subr.mxu0 %v202_v55  ;;  %5359 = vmatprep.subr.mxu1 %v219_v56  ;;  %v829_v54 = vld [vmem:[#allocation2 + $0x290] sm:$0xff] }
  0x98   :  { %5325 = vmatpush3.msra.mxu0 %v202_v55  ;;  %5360 = vmatpush3.msra.mxu1 %v219_v56  ;;  %v833_v55 = vld [vmem:[#allocation2 + $0x2b0] sm:$0xff]  ;;  %v828_v56 = vld [vmem:[#allocation2 + $0x288] sm:$0xff] }
  0x99   :  { %5326 = vmatprep.subr.mxu0 %v201_v57  ;;  %5361 = vmatprep.subr.mxu1 %v218_v58 }
  0x9a   :  { %5327 = vmatpush3.msra.mxu0 %v201_v57  ;;  %5362 = vmatpush3.msra.mxu1 %v218_v58  ;;  %v832_v57 = vld [vmem:[#allocation2 + $0x2a8] sm:$0xff]  ;;  %v827_v58 = vld [vmem:[#allocation2 + $0x280] sm:$0xff] }
  0x9b   :  { %5328 = vmatprep.subr.mxu0 %v200_v59  ;;  %5363 = vmatprep.subr.mxu1 %v217_v60 }
  0x9c   :  { %5329 = vmatpush3.msra.mxu0 %v200_v59  ;;  %5364 = vmatpush3.msra.mxu1 %v217_v60  ;;  %v831_v59 = vld [vmem:[#allocation2 + $0x2a0] sm:$0xff]  ;;  %v826_v60 = vld [vmem:[#allocation2 + $0x278] sm:$0xff] }
  0x9d   :  { %5330 = vmatprep.subr.mxu0 %v199_v61  ;;  %5365 = vmatprep.subr.mxu1 %v216_v62 }
  0x9e   :  { %5331 = vmatpush3.msra.mxu0 %v199_v61  ;;  %5366 = vmatpush3.msra.mxu1 %v216_v62  ;;  %v830_v61 = vld [vmem:[#allocation2 + $0x298] sm:$0xff]  ;;  %v837_v62 = vld [vmem:[#allocation2 + $0x2d0] sm:$0xff] }
  0x9f   :  { %5332 = vmatprep.subr.mxu0 %v198_v63  ;;  %5367 = vmatprep.subr.mxu1 %v215_v0 }
  0xa0   :  { %5333 = vmatpush3.msra.mxu0 %v198_v63  ;;  %5368 = vmatpush3.msra.mxu1 %v215_v0  ;;  %v842_v63 = vld [vmem:[#allocation2 + $0x2f8] sm:$0xff] }
  0xa1   :  { %5334 = vmatprep.subr.mxu0 %v197_v1  ;;  %5369 = vmatprep.subr.mxu1 %v214_v2 }
  0xa2   :  { %5335 = vmatpush3.msra.mxu0 %v197_v1  ;;  %5370 = vmatpush3.msra.mxu1 %v214_v2 }
  0xa3   :  { %5336 = vmatprep.subr.mxu0 %v196_v3  ;;  %5371 = vmatprep.subr.mxu1 %v213_v4 }
  0xa4   :  { %5337 = vmatpush3.msra.mxu0 %v196_v3  ;;  %5372 = vmatpush3.msra.mxu1 %v213_v4 }
  0xa5   :  { %5338 = vmatprep.subr.mxu0 %v195_v5  ;;  %5373 = vmatprep.subr.mxu1 %v212_v6 }
  0xa6   :  { %5339 = vmatpush3.msra.mxu0 %v195_v5  ;;  %5374 = vmatpush3.msra.mxu1 %v212_v6  ;;  %v4768_v6 = vld [vmem:[#allocation2 + $0x270] ss:$0 sm:$0xff] }
  0xa7   :  { %5340 = vmatprep.subr.mxu0 %v194_v7  ;;  %5375 = vmatprep.subr.mxu1 %v211_v8 }
  0xa8   :  { %5341 = vmatpush3.msra.mxu0 %v194_v7  ;;  %5376 = vmatpush3.msra.mxu1 %v211_v8 }
  0xa9   :  { %5342 = vmatprep.subr.mxu0 %v193_v9  ;;  %5377 = vmatprep.subr.mxu1 %v210_v10 }
  0xaa   :  { %5343 = vmatpush3.msra.mxu0 %v193_v9  ;;  %5378 = vmatpush3.msra.mxu1 %v210_v10 }
  0xab   :  { %5344 = vmatprep.subr.mxu0 %v192_v11  ;;  %5379 = vmatprep.subr.mxu1 %v209_v12 }
  0xac   :  { %5345 = vmatpush3.msra.mxu0 %v192_v11  ;;  %5380 = vmatpush3.msra.mxu1 %v209_v12 }
  0xad   :  { %5346 = vmatprep.subr.mxu0 %v191_v13  ;;  %5381 = vmatprep.subr.mxu1 %v208_v14 }
  0xae   :  { %5347 = vmatpush3.msra.mxu0 %v191_v13  ;;  %5382 = vmatpush3.msra.mxu1 %v208_v14 }
  0xaf   :  { %5348 = vmatprep.subr.mxu0 %v190_v15  ;;  %5383 = vmatprep.subr.mxu1 %v207_v16 }
  0xb0   :  { %5349 = vmatpush3.msra.mxu0 %v190_v15  ;;  %5384 = vmatpush3.msra.mxu1 %v207_v16 }
  0xb1   :  { %5350 = vmatprep.subr.mxu0 %v189_v17  ;;  %5385 = vmatprep.subr.mxu1 %v206_v18 }
  0xb2   :  { %5351 = vmatpush3.msra.mxu0 %v189_v17  ;;  %5386 = vmatpush3.msra.mxu1 %v206_v18  ;;  %v4765_v18 = vld [vmem:[#allocation2 + $0x208] ss:$0 sm:$0xff] }
  0xb3   :  { %5353 = vmatmul.mubr.f32.vlgmr.msra.gmra.mxu0 %v6362_v51  ;;  %5388 = vmatmul.mubr.f32.vlgmr.msra.gmra.mxu1 %v6362_v51  ;;  %v229_v51 = vld [vmem:[#allocation2 + $0x240] sm:$0xff] }
  0xb4   :  { %5390 = vmatprep.subr.mxu1 %v226_v19  ;;  %5412 = vmatprep.subr.mxu0 %v234_v20 }
  0xb5   :  { %5391 = vmatpush3.msra.mxu1 %v226_v19  ;;  %5413 = vmatpush3.msra.mxu0 %v234_v20 }
  0xb6   :  { %5392 = vmatprep.subr.mxu1 %v225_v21  ;;  %5414 = vmatprep.subr.mxu0 %v233_v22 }
  0xb7   :  { %5393 = vmatpush3.msra.mxu1 %v225_v21  ;;  %5415 = vmatpush3.msra.mxu0 %v233_v22 }
  0xb8   :  { %5394 = vmatprep.subr.mxu1 %v224_v23  ;;  %5416 = vmatprep.subr.mxu0 %v232_v24 }
  0xb9   :  { %5395 = vmatpush3.msra.mxu1 %v224_v23  ;;  %5417 = vmatpush3.msra.mxu0 %v232_v24 }
  0xba   :  { %5396 = vmatprep.subr.mxu1 %v223_v25  ;;  %5418 = vmatprep.subr.mxu0 %v231_v26 }
  0xbb   :  { %5397 = vmatpush3.msra.mxu1 %v223_v25  ;;  %5419 = vmatpush3.msra.mxu0 %v231_v26 }
  0xbc   :  { %5401 = vmatprep.subr.mxu1 %v230_v27  ;;  %5434 = vmatprep.subr.mxu0 %v833_v55 }
 0x152   :  { %v5284_v28 = vpop.f32.mrf.mxu0  ;;  %v5319_v29 = vpop.f32.mrf.mxu1 }
 0x153   :  { %v468_v31 = vrot.slane %v5284_v28, 7  ;;  %v387_v35 = vadd.f32 %v5319_v29, %v4764_v32  ;;  %v836_v28 = vld [vmem:[#allocation2 + $0x2c8] sm:$0xff]  ;;  %v841_v29 = vld [vmem:[#allocation2 + $0x2f0] sm:$0xff] }
 0x154   :  { %v302_v30 = vpop.f32.mrf.mxu0  ;;  %v381_v34 = vpop.f32.mrf.mxu1 }
 0x155   :  { %v467_v33 = vrot.slane %v302_v30, 7  ;;  %v473_v36 = vsel %vm471_vm1, 0.0, %v468_v31  ;;  %v382_v37 = vadd.f32 %v4764_v32, %v381_v34  ;;  %v835_v30 = vld [vmem:[#allocation2 + $0x2c0] sm:$0xff]  ;;  %v840_v31 = vld [vmem:[#allocation2 + $0x2e8] sm:$0xff]  ;;  %v834_v32 = vld [vmem:[#allocation2 + $0x2b8] sm:$0xff] }
 0x156   :  { %v475_v42 = vadd.f32 %v473_v36, %v387_v35  ;;  %v847_v34 = vld [vmem:[#allocation2 + $0x320] sm:$0xff]  ;;  %v846_v36 = vld [vmem:[#allocation2 + $0x318] sm:$0xff] }
 0x157   :  { %v472_v39 = vsel %vm471_vm1, 0.0, %v467_v33  ;;  %v839_v33 = vld [vmem:[#allocation2 + $0x2e0] sm:$0xff] }
 0x158   :  { %v474_v45 = vadd.f32 %v472_v39, %v382_v37  ;;  %v851_v35 = vld [vmem:[#allocation2 + $0x340] sm:$0xff]  ;;  %v850_v37 = vld [vmem:[#allocation2 + $0x338] sm:$0xff]  ;;  %v849_v39 = vld [vmem:[#allocation2 + $0x330] sm:$0xff] }
 0x173   :  { %v5354_v38 = vpop.f32.mrf.mxu0  ;;  %v5389_v0 = vpop.f32.mrf.mxu1 }
 0x174   :  { %v479_v40 = vrot.slane %v5354_v38, 1  ;;  %v565_v25 = vadd.f32 %v5389_v0, %v4765_v18  ;;  %v845_v38 = vld [vmem:[#allocation2 + $0x310] sm:$0xff] }
 0x175   :  { %v456_v41 = vpop.f32.mrf.mxu0  ;;  %v559_v1 = vpop.f32.mrf.mxu1 }
 0x176   :  { %v484_v43 = vsel %vm482_vm2, %v479_v40, 0.0  ;;  %v478_v44 = vrot.slane %v456_v41, 1  ;;  %v560_v23 = vadd.f32 %v4765_v18, %v559_v1  ;;  %v844_v40 = vld [vmem:[#allocation2 + $0x308] sm:$0xff] }
 0x177   :  { %v486_v46 = vadd.f32 %v484_v43, %v475_v42  ;;  %v848_v41 = vld [vmem:[#allocation2 + $0x328] sm:$0xff]  ;;  %v855_v42 = vld [vmem:[#allocation2 + $0x360] sm:$0xff] }
 0x178   :  { %v483_v47 = vsel %vm482_vm2, %v478_v44, 0.0 }
 0x179   :  { %v485_v48 = vadd.f32 %v483_v47, %v474_v45  ;;  %v488_v50 = vmax.f32 %v486_v46, 0.0  ;;  %v4775_v47 = vld [vmem:[#allocation2 + $0x2d8] ss:$0 sm:$0xff] }
 0x17b   :  { %v487_v49 = vmax.f32 %v485_v48, 0.0 }
 0x17d   :  { %5398 = vmatprep.mubr.msk.f32.mxu1 %vm568_vm3, %v487_v49  ;;  %5420 = vmatprep.mubr.msk.f32.mxu0 %vm568_vm3, %v487_v49 }
 0x17e   :  { %5399 = vmatmul.mubr.msk.f32.vlgmr.msra.gmra.mxu1 %vm568_vm3, %v488_v50  ;;  %5421 = vmatmul.mubr.msk.f32.vlgmr.msra.gmra.mxu0 %vm568_vm3, %v488_v50 }
 0x17f   :  { %5402 = vmatpush3.msra.mxu1 %v230_v27  ;;  %5409 = vmatprep.mubr.msk.f32.mxu1 %vm568_vm3, %v487_v49 }
 0x180   :  { %5403 = vmatprep.subr.mxu1 %v229_v51  ;;  %5435 = vmatpush3.msra.mxu0 %v833_v55 }
 0x181   :  { %5404 = vmatpush3.msra.mxu1 %v229_v51  ;;  %5436 = vmatprep.subr.mxu0 %v832_v57 }
 0x182   :  { %5405 = vmatprep.subr.mxu1 %v228_v52  ;;  %5437 = vmatpush3.msra.mxu0 %v832_v57 }
 0x183   :  { %5406 = vmatpush3.msra.mxu1 %v228_v52  ;;  %5438 = vmatprep.subr.mxu0 %v831_v59 }
 0x184   :  { %5407 = vmatprep.subr.mxu1 %v227_v53  ;;  %5439 = vmatpush3.msra.mxu0 %v831_v59 }
 0x185   :  { %5408 = vmatpush3.msra.mxu1 %v227_v53  ;;  %5440 = vmatprep.subr.mxu0 %v830_v61 }
 0x186   :  { %5410 = vmatmul.mubr.msk.f32.vlgmr.msra.gmra.mxu1 %vm568_vm3, %v488_v50  ;;  %5423 = vmatprep.subr.mxu1 %v829_v54 }
 0x187   :  { %5424 = vmatpush3.msra.mxu1 %v829_v54  ;;  %5441 = vmatpush3.msra.mxu0 %v830_v61 }
 0x188   :  { %5425 = vmatprep.subr.mxu1 %v828_v56  ;;  %5456 = vmatprep.subr.mxu0 %v842_v63 }
 0x189   :  { %5426 = vmatpush3.msra.mxu1 %v828_v56 }
 0x18a   :  { %5427 = vmatprep.subr.mxu1 %v827_v58 }
 0x18b   :  { %5428 = vmatpush3.msra.mxu1 %v827_v58 }
 0x18c   :  { %5429 = vmatprep.subr.mxu1 %v826_v60 }
 0x18d   :  { %5430 = vmatpush3.msra.mxu1 %v826_v60 }
 0x18e   :  { %5445 = vmatprep.subr.mxu1 %v837_v62 }
 0x23e   :  { %v5400_v2 = vpop.f32.mrf.mxu1  ;;  %v5422_v3 = vpop.f32.mrf.mxu0 }
 0x23f   :  { %v807_v5 = vrot.slane %v5400_v2, 7  ;;  %v817_v10 = vrot.slane %v5422_v3, 1  ;;  %v854_v2 = vld [vmem:[#allocation2 + $0x358] sm:$0xff]  ;;  %v853_v3 = vld [vmem:[#allocation2 + $0x350] sm:$0xff] }
 0x240   :  { %v641_v4 = vpop.f32.mrf.mxu1  ;;  %v795_v7 = vpop.f32.mrf.mxu0 }
 0x241   :  { %v806_v8 = vrot.slane %v641_v4, 7  ;;  %v811_v12 = vsel %vm471_vm1, 0.0, %v807_v5  ;;  %v816_v13 = vrot.slane %v795_v7, 1  ;;  %v821_v19 = vsel %vm482_vm2, %v817_v10, 0.0  ;;  %v852_v4 = vld [vmem:[#allocation2 + $0x348] sm:$0xff]  ;;  %v1451_v7 = vld [vmem:[#allocation2 + $0x378] sm:$0xff] }
 0x242   :  { %v1453_v5 = vld [vmem:[#allocation2 + $0x388] sm:$0xff] }
 0x243   :  { %v810_v17 = vsel %vm471_vm1, 0.0, %v806_v8  ;;  %v820_v21 = vsel %vm482_vm2, %v816_v13, 0.0  ;;  %v1450_v8 = vld [vmem:[#allocation2 + $0x370] sm:$0xff] }
 0x246   :  { %v5411_v9 = vpop.f32.mrf.mxu1 }
 0x247   :  { %v726_v11 = vadd.f32 %v5411_v9, %v4768_v6 }
 0x248   :  { %v720_v14 = vpop.f32.mrf.mxu1 }
 0x249   :  { %v813_v15 = vadd.f32 %v811_v12, %v726_v11  ;;  %v721_v16 = vadd.f32 %v4768_v6, %v720_v14  ;;  %v1452_v6 = vld [vmem:[#allocation2 + $0x380] sm:$0xff] }
 0x24b   :  { %v812_v20 = vadd.f32 %v810_v17, %v721_v16  ;;  %v823_v22 = vadd.f32 %v821_v19, %v813_v15  ;;  %v4785_v15 = vld [vmem:[#allocation2 + $0x368] ss:$0 sm:$0xff] }
 0x24d   :  { %v822_v24 = vadd.f32 %v820_v21, %v812_v20  ;;  %v825_v27 = vadd.f32 %v823_v22, %v565_v25 }
 0x24f   :  { %v824_v26 = vadd.f32 %v822_v24, %v560_v23 }
 0x251   :  { %5431 = vmatprep.mubr.msk.f32.mxu1 %vm568_vm3, %v824_v26  ;;  %5442 = vmatprep.mubr.msk.f32.mxu0 %vm568_vm3, %v824_v26 }
 0x252   :  { %5432 = vmatmul.mubr.msk.f32.vlgmr.msra.gmra.mxu1 %vm568_vm3, %v825_v27  ;;  %5443 = vmatmul.mubr.msk.f32.vlgmr.msra.gmra.mxu0 %vm568_vm3, %v825_v27 }
 0x253   :  { %5446 = vmatpush3.msra.mxu1 %v837_v62  ;;  %5457 = vmatpush3.msra.mxu0 %v842_v63 }
 0x254   :  { %5447 = vmatprep.subr.mxu1 %v836_v28  ;;  %5453 = vmatprep.mubr.msk.f32.mxu1 %vm568_vm3, %v824_v26 }
 0x255   :  { %5458 = vmatprep.subr.mxu0 %v841_v29  ;;  %5464 = vmatprep.mubr.msk.f32.mxu0 %vm568_vm3, %v824_v26 }
 0x256   :  { %5448 = vmatpush3.msra.mxu1 %v836_v28  ;;  %5459 = vmatpush3.msra.mxu0 %v841_v29  ;;  %v4780_v28 = vld [vmem:[#allocation2 + $0x300] ss:$0 sm:$0xff] }
 0x257   :  { %5449 = vmatprep.subr.mxu1 %v835_v30  ;;  %5460 = vmatprep.subr.mxu0 %v840_v31 }
 0x258   :  { %5450 = vmatpush3.msra.mxu1 %v835_v30  ;;  %5461 = vmatpush3.msra.mxu0 %v840_v31 }
 0x259   :  { %5451 = vmatprep.subr.mxu1 %v834_v32  ;;  %5462 = vmatprep.subr.mxu0 %v839_v33 }
 0x25a   :  { %5452 = vmatpush3.msra.mxu1 %v834_v32  ;;  %5463 = vmatpush3.msra.mxu0 %v839_v33 }
 0x25b   :  { %5454 = vmatmul.mubr.msk.f32.vlgmr.msra.gmra.mxu1 %vm568_vm3, %v825_v27  ;;  %5465 = vmatmul.mubr.msk.f32.vlgmr.msra.gmra.mxu0 %vm568_vm3, %v825_v27 }
 0x25c   :  { %5467 = vmatprep.subr.mxu1 %v847_v34  ;;  %5478 = vmatprep.subr.mxu0 %v851_v35 }
 0x25d   :  { %5468 = vmatpush3.msra.mxu1 %v847_v34  ;;  %5479 = vmatpush3.msra.mxu0 %v851_v35 }
 0x25e   :  { %5469 = vmatprep.subr.mxu1 %v846_v36  ;;  %5480 = vmatprep.subr.mxu0 %v850_v37 }
 0x25f   :  { %5470 = vmatpush3.msra.mxu1 %v846_v36  ;;  %5481 = vmatpush3.msra.mxu0 %v850_v37 }
 0x260   :  { %5471 = vmatprep.subr.mxu1 %v845_v38  ;;  %5482 = vmatprep.subr.mxu0 %v849_v39 }
 0x261   :  { %5472 = vmatpush3.msra.mxu1 %v845_v38  ;;  %5483 = vmatpush3.msra.mxu0 %v849_v39  ;;  %v4790_v38 = vld [vmem:[#allocation2 + $0x390] ss:$0 sm:$0xff] }
 0x262   :  { %5473 = vmatprep.subr.mxu1 %v844_v40  ;;  %5484 = vmatprep.subr.mxu0 %v848_v41 }
 0x263   :  { %5474 = vmatpush3.msra.mxu1 %v844_v40  ;;  %5485 = vmatpush3.msra.mxu0 %v848_v41 }
 0x264   :  { %5489 = vmatprep.subr.mxu1 %v855_v42  ;;  %5500 = vmatprep.subr.mxu0 %v1453_v5 }
 0x312   :  { %v5433_v43 = vpop.f32.mrf.mxu1  ;;  %v5444_v44 = vpop.f32.mrf.mxu0 }
 0x313   :  { %v1095_v46 = vrot.slane %v5433_v43, 7  ;;  %v1014_v50 = vadd.f32 %v5444_v44, %v4775_v47 }
 0x314   :  { %v929_v45 = vpop.f32.mrf.mxu1  ;;  %v1008_v49 = vpop.f32.mrf.mxu0 }
 0x315   :  { %v1094_v48 = vrot.slane %v929_v45, 7  ;;  %v1099_v51 = vsel %vm471_vm1, 0.0, %v1095_v46  ;;  %v1009_v52 = vadd.f32 %v4775_v47, %v1008_v49  ;;  %v1592_v46 = vld [vmem:[#allocation2 + $0x3a0] sm:$0xff]  ;;  %v1591_v47 = vld [vmem:[#allocation2 + $0x398] sm:$0xff] }
 0x316   :  { %v1101_v57 = vadd.f32 %v1099_v51, %v1014_v50  ;;  %v1587_v50 = vld [vmem:[%s7028_s0] sm:$0xff] }
 0x317   :  { %v1098_v54 = vsel %vm471_vm1, 0.0, %v1094_v48 }
 0x318   :  { %v1100_v60 = vadd.f32 %v1098_v54, %v1009_v52  ;;  %v1588_v54 = vld [vmem:[%s7028_s0 + $0x8] sm:$0xff]  ;;  %s6208_s0 = smov 64  }
 0x31b   :  { %v5455_v53 = vpop.f32.mrf.mxu1  ;;  %v5466_v9 = vpop.f32.mrf.mxu0 }
 0x31c   :  { %v1105_v55 = vrot.slane %v5455_v53, 1  ;;  %v1190_v34 = vadd.f32 %v5466_v9, %v4780_v28  ;;  %v1787_v9 = vld [vmem:[#allocation2 + $0x3e0] sm:$0xff] }
 0x31d   :  { %v1083_v56 = vpop.f32.mrf.mxu1  ;;  %v1184_v10 = vpop.f32.mrf.mxu0 }
 0x31e   :  { %v1109_v58 = vsel %vm482_vm2, %v1105_v55, 0.0  ;;  %v1104_v59 = vrot.slane %v1083_v56, 1  ;;  %v1185_v32 = vadd.f32 %v4780_v28, %v1184_v10  ;;  %v1877_v10 = vld [vmem:[#allocation2 + $0x408] sm:$0xff] }
 0x31f   :  { %v1111_v61 = vadd.f32 %v1109_v58, %v1101_v57  ;;  %v1684_v58 = vld [vmem:[#allocation2 + $0x3c8] sm:$0xff] }
 0x320   :  { %v1108_v62 = vsel %vm482_vm2, %v1104_v59, 0.0  ;;  %v1683_v59 = vld [vmem:[#allocation2 + $0x3c0] sm:$0xff] }
 0x321   :  { %v1110_v63 = vadd.f32 %v1108_v62, %v1100_v60  ;;  %v1113_v1 = vmax.f32 %v1111_v61, 0.0  ;;  %v1682_v60 = vld [vmem:[#allocation2 + $0x3b8] sm:$0xff]  ;;  %v1681_v61 = vld [vmem:[#allocation2 + $0x3b0] sm:$0xff]  ;;  %v4793_v62 = vld [vmem:[#allocation2 + $0x3a8] ss:$0 sm:$0xff] }
 0x323   :  { %v1112_v0 = vmax.f32 %v1110_v63, 0.0 }
 0x325   :  { %5475 = vmatprep.mubr.msk.f32.mxu1 %vm568_vm3, %v1112_v0  ;;  %5486 = vmatprep.mubr.msk.f32.mxu0 %vm568_vm3, %v1112_v0 }
 0x326   :  { %5476 = vmatmul.mubr.msk.f32.vlgmr.msra.gmra.mxu1 %vm568_vm3, %v1113_v1  ;;  %5487 = vmatmul.mubr.msk.f32.vlgmr.msra.gmra.mxu0 %vm568_vm3, %v1113_v1 }
 0x327   :  { %5490 = vmatpush3.msra.mxu1 %v855_v42  ;;  %5497 = vmatprep.mubr.msk.f32.mxu1 %vm568_vm3, %v1112_v0 }
 0x328   :  { %5491 = vmatprep.subr.mxu1 %v854_v2  ;;  %5501 = vmatpush3.msra.mxu0 %v1453_v5  ;;  %v1789_v5 = vld [vmem:[#allocation2 + $0x3f0] sm:$0xff] }
 0x329   :  { %5492 = vmatpush3.msra.mxu1 %v854_v2  ;;  %5502 = vmatprep.subr.mxu0 %v1452_v6 }
 0x32a   :  { %5493 = vmatprep.subr.mxu1 %v853_v3  ;;  %5503 = vmatpush3.msra.mxu0 %v1452_v6  ;;  %v1879_v6 = vld [vmem:[#allocation2 + $0x418] sm:$0xff] }
 0x32b   :  { %5494 = vmatpush3.msra.mxu1 %v853_v3  ;;  %5504 = vmatprep.subr.mxu0 %v1451_v7 }
 0x32c   :  { %5495 = vmatprep.subr.mxu1 %v852_v4  ;;  %5505 = vmatpush3.msra.mxu0 %v1451_v7  ;;  %v1788_v7 = vld [vmem:[#allocation2 + $0x3e8] sm:$0xff] }
 0x32d   :  { %5496 = vmatpush3.msra.mxu1 %v852_v4  ;;  %5506 = vmatprep.subr.mxu0 %v1450_v8 }
 0x32e   :  { %5498 = vmatmul.mubr.msk.f32.vlgmr.msra.gmra.mxu1 %vm568_vm3, %v1113_v1  ;;  %5507 = vmatpush3.msra.mxu0 %v1450_v8  ;;  %v1878_v8 = vld [vmem:[#allocation2 + $0x410] sm:$0xff] }
 0x32f   :  { %5511 = vmatprep.subr.mxu1 %v1592_v46  ;;  %5529 = vmatprep.subr.mxu0 %v1789_v5 }
 0x330   :  { %5512 = vmatpush3.msra.mxu1 %v1592_v46  ;;  %v6469_v46 = vld [vmem:[#allocation2 + $0x428] sm:$0xff] }
 0x331   :  { %5513 = vmatprep.subr.mxu1 %v1591_v47 }
 0x332   :  { %5514 = vmatpush3.msra.mxu1 %v1591_v47 }
 0x333   :  { %5518 = vmatprep.subr.mxu1 %v1684_v58 }
 0x3e6   :  { %v5477_v11 = vpop.f32.mrf.mxu1  ;;  %v5488_v12 = vpop.f32.mrf.mxu0 }
 0x3e7   :  { %v1431_v14 = vrot.slane %v5477_v11, 7  ;;  %v1350_v18 = vadd.f32 %v5488_v12, %v4785_v15  ;;  %v1786_v11 = vld [vmem:[#allocation2 + $0x3d8] sm:$0xff]  ;;  %v1876_v12 = vld [vmem:[#allocation2 + $0x400] sm:$0xff] }
 0x3e8   :  { %v1265_v13 = vpop.f32.mrf.mxu1  ;;  %v1344_v17 = vpop.f32.mrf.mxu0 }
 0x3e9   :  { %v1430_v16 = vrot.slane %v1265_v13, 7  ;;  %v1435_v19 = vsel %vm471_vm1, 0.0, %v1431_v14  ;;  %v1345_v20 = vadd.f32 %v4785_v15, %v1344_v17  ;;  %v4796_v13 = vld [vmem:[#allocation2 + $0x3d0] ss:$0 sm:$0xff] }
 0x3ea   :  { %v1437_v25 = vadd.f32 %v1435_v19, %v1350_v18 }
 0x3eb   :  { %v1434_v22 = vsel %vm471_vm1, 0.0, %v1430_v16 }
 0x3ec   :  { %v1436_v29 = vadd.f32 %v1434_v22, %v1345_v20  ;;  %v1777_v20 = vld [vmem:[#allocation2 + $0x558] sm:$0xff] }
 0x3ed   :  { %v4799_v22 = vld [vmem:[#allocation2 + $0x3f8] ss:$0 sm:$0xff] }
 0x3ee   :  { %v5499_v21 = vpop.f32.mrf.mxu1 }
 0x3ef   :  { %v1441_v23 = vrot.slane %v5499_v21, 1  ;;  %v1773_v21 = vld [vmem:[#allocation2 + $0x538] sm:$0xff] }
 0x3f0   :  { %v1419_v24 = vpop.f32.mrf.mxu1 }
 0x3f1   :  { %v1445_v26 = vsel %vm482_vm2, %v1441_v23, 0.0  ;;  %v1440_v27 = vrot.slane %v1419_v24, 1  ;;  %v4802_v23 = vld [vmem:[#allocation2 + $0x420] ss:$0 sm:$0xff] }
 0x3f2   :  { %v1447_v30 = vadd.f32 %v1445_v26, %v1437_v25 }
 0x3f3   :  { %v1444_v31 = vsel %vm482_vm2, %v1440_v27, 0.0 }
 0x3f4   :  { %v1446_v33 = vadd.f32 %v1444_v31, %v1436_v29  ;;  %v1449_v36 = vadd.f32 %v1447_v30, %v1190_v34  ;;  %v1779_v34 = vld [vmem:[#allocation2 + $0x568] sm:$0xff] }
 0x3f6   :  { %v1448_v35 = vadd.f32 %v1446_v33, %v1185_v32  ;;  %v1778_v32 = vld [vmem:[#allocation2 + $0x560] sm:$0xff] }
 0x3f7   :  { %v1774_v33 = vld [vmem:[#allocation2 + $0x540] sm:$0xff] }
 0x3f8   :  { %5508 = vmatprep.mubr.msk.f32.mxu0 %vm568_vm3, %v1448_v35  ;;  %v6427_v35 = vld [vmem:[#allocation2 + $0x460] sm:$0xff] }
 0x3f9   :  { %5509 = vmatmul.mubr.msk.f32.vlgmr.msra.gmra.mxu0 %vm568_vm3, %v1449_v36  ;;  %v1775_v36 = vld [vmem:[#allocation2 + $0x548] sm:$0xff] }
 0x3fa   :  { %5530 = vmatpush3.msra.mxu0 %v1789_v5 }
 0x3fb   :  { %5531 = vmatprep.subr.mxu0 %v1788_v7 }
 0x3fc   :  { %5532 = vmatpush3.msra.mxu0 %v1788_v7 }
 0x3fd   :  { %5533 = vmatprep.subr.mxu0 %v1787_v9 }
 0x3fe   :  { %5534 = vmatpush3.msra.mxu0 %v1787_v9 }
 0x3ff   :  { %5535 = vmatprep.subr.mxu0 %v1786_v11 }
 0x400   :  { %5536 = vmatpush3.msra.mxu0 %v1786_v11 }
 0x4b9   :  { %v5510_v37 = vpop.f32.mrf.mxu0 }
 0x4ba   :  { %v1537_v40 = vadd.f32 %v5510_v37, %v4790_v38  ;;  %v6206_v37 = vmov 0.0  }
 0x4bb   :  { %v1531_v39 = vpop.f32.mrf.mxu0 }
 0x4bc   :  { %v1532_v41 = vadd.f32 %v4790_v38, %v1531_v39  ;;  %v1541_v43 = vmax.f32 %v1537_v40, 0.0  ;;  %v6432_v38 = vld [vmem:[#allocation2 + $0x458] sm:$0xff]  ;;  %v1776_v39 = vld [vmem:[#allocation2 + $0x550] sm:$0xff] }
 0x4bd   :  { %v1780_v40 = vld [vmem:[#allocation2 + $0x570] sm:$0xff] }
 0x4be   :  { %v1540_v42 = vmax.f32 %v1532_v41, 0.0  ;;  %v1544_v45 = vsel %vm1542_vm4, %v1541_v43, 0.0  ;;  %v6438_v41 = vld [vmem:[#allocation2 + $0x450] sm:$0xff]  ;;  %v6451_v43 = vld [vmem:[#allocation2 + $0x440] sm:$0xff] }
 0x4c0   :  { %v1543_v44 = vsel %vm1542_vm4, %v1540_v42, 0.0  ;;  %v6444_v42 = vld [vmem:[#allocation2 + $0x448] sm:$0xff] }
 0x4c1   :  { %1545 = vxpose.xlu1.b32.start [1/2] (short) (narrow) %v1543_v44, 16  ;;  %v6457_v44 = vld [vmem:[#allocation2 + $0x438] sm:$0xff] }
 0x4c5   :  { %1546 = vxpose.xlu1.b32.end [2/2] (short) (narrow) %v1544_v45, 16  ;;  %v6463_v45 = vld [vmem:[#allocation2 + $0x430] sm:$0xff] }
 0x53d   :  { %v1561_v48 = vpop.trf.xlu1 }
 0x541   :  { %v1562_v49 = vpop.trf.xlu1 }
 0x542   :  { %1578 = vrot.lane.b32.xlu1 %v1562_v49, %s6204_s16  ;;  %s6209_s16 = smov 32  }
 0x546   :  { %1583 = vrot.lane.b32.xlu1 %v1561_v48, %s6205_s1 }
 0x5b4   :  { %v1579_v51 = vpop.permute.xlu1 %1578 }
 0x5b5   :  { %v1581_v52 = vsel %vm60_vm0, %v1561_v48, %v1579_v51 }
 0x5b6   :  { %v1589_v53 = vadd.f32 %v1587_v50, %v1581_v52 }
 0x5b8   :  { %5515 = vmatprep.mubr.msk.f32.mxu1 %vm1542_vm4, %v1589_v53  ;;  %v1584_v55 = vpop.permute.xlu1 %1583 }
 0x5b9   :  { %v1586_v56 = vsel %vm60_vm0, %v1584_v55, %v1562_v49 }
 0x5ba   :  { %v1590_v57 = vadd.f32 %v1588_v54, %v1586_v56 }
 0x5bc   :  { %5516 = vmatmul.mubr.msk.f32.vlgmr.msra.gmra.mxu1 %vm1542_vm4, %v1590_v57 }
 0x5bd   :  { %5519 = vmatpush3.msra.mxu1 %v1684_v58 }
 0x5be   :  { %5520 = vmatprep.subr.mxu1 %v1683_v59 }
 0x5bf   :  { %5521 = vmatpush3.msra.mxu1 %v1683_v59 }
 0x5c0   :  { %5522 = vmatprep.subr.mxu1 %v1682_v60 }
 0x5c1   :  { %5523 = vmatpush3.msra.mxu1 %v1682_v60 }
 0x5c2   :  { %5524 = vmatprep.subr.mxu1 %v1681_v61 }
 0x5c3   :  { %5525 = vmatpush3.msra.mxu1 %v1681_v61 }
 0x5c4   :  { %5540 = vmatprep.subr.mxu1 %v1879_v6 }
 0x67c   :  { %v5517_v63 = vpop.f32.mrf.mxu1 }
 0x67d   :  { %v1676_v0 = vadd.f32 %v5517_v63, %v4793_v62 }
 0x67e   :  { %v1670_v1 = vpop.f32.mrf.mxu1 }
 0x67f   :  { %v1671_v2 = vadd.f32 %v4793_v62, %v1670_v1  ;;  %v1680_v4 = vmax.f32 %v1676_v0, 0.0 }
 0x681   :  { %v1679_v3 = vmax.f32 %v1671_v2, 0.0 }
 0x683   :  { %5526 = vmatprep.mubr.msk.f32.mxu1 %vm568_vm3, %v1679_v3 }
 0x684   :  { %5527 = vmatmul.mubr.msk.f32.vlgmr.msra.gmra.mxu1 %vm568_vm3, %v1680_v4 }
 0x685   :  { %5541 = vmatpush3.msra.mxu1 %v1879_v6 }
 0x686   :  { %5542 = vmatprep.subr.mxu1 %v1878_v8 }
 0x687   :  { %5543 = vmatpush3.msra.mxu1 %v1878_v8 }
 0x688   :  { %5544 = vmatprep.subr.mxu1 %v1877_v10 }
 0x689   :  { %5545 = vmatpush3.msra.mxu1 %v1877_v10  ;;  %v6521_v10 = vld [vmem:[#allocation2 + $0x598] sm:$0xf] }
 0x68a   :  { %5546 = vmatprep.subr.mxu1 %v1876_v12 }
 0x68b   :  { %5547 = vmatpush3.msra.mxu1 %v1876_v12 }
 0x744   :  { %v5528_v14 = vpop.f32.mrf.mxu1 }
 0x745   :  { %v1768_v15 = vadd.f32 %v5528_v14, %v4796_v13 }
 0x746   :  { %v1762_v16 = vpop.f32.mrf.mxu1 }
 0x747   :  { %v1763_v17 = vadd.f32 %v4796_v13, %v1762_v16  ;;  %v1772_v19 = vmax.f32 %v1768_v15, 0.0 }
 0x749   :  { %v1771_v18 = vmax.f32 %v1763_v17, 0.0 }
 0x74b   :  { %5537 = vmatprep.mubr.msk.f32.mxu0 %vm568_vm3, %v1771_v18  ;;  %5548 = vmatprep.mubr.msk.f32.mxu1 %vm568_vm3, %v1771_v18 }
 0x74c   :  { %5538 = vmatmul.mubr.msk.f32.vlgmr.msra.gmra.mxu0 %vm568_vm3, %v1772_v19  ;;  %5549 = vmatmul.mubr.msk.f32.vlgmr.msra.gmra.mxu1 %vm568_vm3, %v1772_v19 }
 0x74d   :  { %5555 = vmatprep.mubr.msk.f32.mxu0 %vm1542_vm4, %v1777_v20  ;;  %5565 = vmatprep.mubr.msk.f32.mxu1 %vm1542_vm4, %v1773_v21 }
 0x80c   :  { %v5539_v24 = vpop.f32.mrf.mxu0  ;;  %v5550_v25 = vpop.f32.mrf.mxu1 }
 0x80d   :  { %v1873_v26 = vadd.f32 %v5539_v24, %v4799_v22  ;;  %v1957_v27 = vadd.f32 %v5550_v25, %v4802_v23 }
 0x80e   :  { %v1867_v28 = vpop.f32.mrf.mxu0  ;;  %v1951_v29 = vpop.f32.mrf.mxu1 }
 0x80f   :  { %v1868_v30 = vadd.f32 %v4799_v22, %v1867_v28  ;;  %v1952_v31 = vadd.f32 %v4802_v23, %v1951_v29  ;;  %5551 = vmatprep.subr.mxu0 %v1957_v27  ;;  %5561 = vmatprep.subr.mxu1 %v1873_v26 }
 0x810   :  { %5552 = vmatpush3.msra.mxu0 %v1957_v27  ;;  %5562 = vmatpush3.msra.mxu1 %v1873_v26 }
 0x811   :  { %5553 = vmatprep.subr.mxu0 %v1952_v31  ;;  %5563 = vmatprep.subr.mxu1 %v1868_v30 }
 0x812   :  { %5554 = vmatpush3.msra.mxu0 %v1952_v31  ;;  %5564 = vmatpush3.msra.mxu1 %v1868_v30 }
 0x813   :  { %5556 = vmatmul.mubr.msk.f32.vlgmr.msra.gmra.mxu0 %vm1542_vm4, %v1778_v32  ;;  %5566 = vmatmul.mubr.msk.f32.vlgmr.msra.gmra.mxu1 %vm1542_vm4, %v1774_v33 }
 0x814   :  { %5571 = vmatprep.subr.mxu0 %v6206_v37  ;;  %5558 = vmatprep.mubr.msk.f32.mxu0 %vm1542_vm4, %v1779_v34  ;;  %v6556_v34 = vrot.slane %v6521_v10, 4 }
 0x815   :  { %5572 = vmatpush3.msra.mxu0 %v6427_v35  ;;  %5568 = vmatprep.mubr.msk.f32.mxu1 %vm1542_vm4, %v1775_v36 }
 0x816   :  { %5573 = vmatprep.subr.mxu0 %v6206_v37  ;;  %5590 = vmatprep.subr.mxu1 %v6206_v37 }
 0x817   :  { %5574 = vmatpush3.msra.mxu0 %v6432_v38  ;;  %5569 = vmatmul.mubr.msk.f32.gmra.mxu1 %vm1542_vm4, %v1776_v39 }
 0x818   :  { %5575 = vmatprep.subr.mxu0 %v6206_v37  ;;  %5559 = vmatmul.mubr.msk.f32.gmra.mxu0 %vm1542_vm4, %v1780_v40 }
 0x819   :  { %5576 = vmatpush3.msra.mxu0 %v6438_v41  ;;  %5587 = vmatprep.mubr.msk.f32.mxu0 %vm6207_vm5, %v6206_v37 }
 0x81a   :  { %5577 = vmatprep.subr.mxu0 %v6206_v37  ;;  %5591 = vmatpush3.msra.mxu1 %v6427_v35 }
 0x81b   :  { %5578 = vmatpush3.msra.mxu0 %v6444_v42  ;;  %5592 = vmatprep.subr.mxu1 %v6206_v37 }
 0x81c   :  { %5579 = vmatprep.subr.mxu0 %v6206_v37  ;;  %5593 = vmatpush3.msra.mxu1 %v6432_v38 }
 0x81d   :  { %5580 = vmatpush3.msra.mxu0 %v6451_v43  ;;  %5594 = vmatprep.subr.mxu1 %v6206_v37 }
 0x81e   :  { %5581 = vmatprep.subr.mxu0 %v6206_v37  ;;  %5595 = vmatpush3.msra.mxu1 %v6438_v41 }
 0x81f   :  { %5582 = vmatpush3.msra.mxu0 %v6457_v44  ;;  %5596 = vmatprep.subr.mxu1 %v6206_v37 }
 0x820   :  { %5583 = vmatprep.subr.mxu0 %v6206_v37  ;;  %5597 = vmatpush3.msra.mxu1 %v6444_v42 }
 0x821   :  { %5584 = vmatpush3.msra.mxu0 %v6463_v45  ;;  %5598 = vmatprep.subr.mxu1 %v6206_v37 }
 0x822   :  { %5585 = vmatprep.subr.mxu0 %v6206_v37  ;;  %5599 = vmatpush3.msra.mxu1 %v6451_v43 }
 0x823   :  { %5586 = vmatpush3.msra.mxu0 %v6469_v46  ;;  %5600 = vmatprep.subr.mxu1 %v6206_v37 }
 0x824   :  { %5588 = vmatmul.mubr.f32.vlgmr.msra.gmra.mxu0 %v6206_v37  ;;  %5601 = vmatpush3.msra.mxu1 %v6457_v44 }
 0x825   :  { %5602 = vmatprep.subr.mxu1 %v6206_v37  ;;  %5606 = vmatprep.mubr.msk.f32.mxu1 %vm6207_vm5, %v6206_v37 }
 0x826   :  { %5603 = vmatpush3.msra.mxu1 %v6463_v45  ;;  %5609 = vmatprep.subr.mxu0 %v6206_v37 }
 0x827   :  { %5604 = vmatprep.subr.mxu1 %v6206_v37  ;;  %5610 = vmatpush3.msra.mxu0 %v6427_v35 }
 0x828   :  { %5605 = vmatpush3.msra.mxu1 %v6469_v46  ;;  %5611 = vmatprep.subr.mxu0 %v6206_v37 }
 0x829   :  { %5612 = vmatpush3.msra.mxu0 %v6432_v38  ;;  %5625 = vmatprep.mubr.msk.f32.mxu0 %vm6207_vm5, %v6206_v37 }
 0x82a   :  { %5613 = vmatprep.subr.mxu0 %v6206_v37  ;;  %5628 = vmatprep.subr.mxu1 %v6206_v37 }
 0x82b   :  { %5614 = vmatpush3.msra.mxu0 %v6438_v41 }
 0x82c   :  { %5615 = vmatprep.subr.mxu0 %v6206_v37 }
 0x82d   :  { %5616 = vmatpush3.msra.mxu0 %v6444_v42 }
 0x82e   :  { %5617 = vmatprep.subr.mxu0 %v6206_v37 }
 0x82f   :  { %5618 = vmatpush3.msra.mxu0 %v6451_v43 }
 0x830   :  { %5619 = vmatprep.subr.mxu0 %v6206_v37 }
 0x831   :  { %5620 = vmatpush3.msra.mxu0 %v6457_v44 }
 0x832   :  { %5621 = vmatprep.subr.mxu0 %v6206_v37 }
 0x833   :  { %5622 = vmatpush3.msra.mxu0 %v6463_v45 }
 0x834   :  { %5623 = vmatprep.subr.mxu0 %v6206_v37 }
 0x835   :  { %5624 = vmatpush3.msra.mxu0 %v6469_v46 }
 0x836   :  { %5647 = vmatprep.subr.mxu0 %v6206_v37 }
 0x8d3   :  { %v5557_v47 = vpop.f32.mrf.mxu0  ;;  %v5567_v48 = vpop.f32.mrf.mxu1 }
 0x8d4   :  { %v6506_v49 = vadd.f32 %v5567_v48, %v5557_v47 }
 0x8d5   :  { %v2038_v50 = vpop.f32.mrf.mxu0  ;;  %v2135_v51 = vpop.f32.mrf.mxu1 }
 0x8d6   :  { %v2136_v56 = vadd.f32 %v2135_v51, %v2038_v50 }
 0x8d7   :  { %v5570_v53 = vpop.f32.mrf.mxu1 }
 0x8d8   :  { %v5560_v52 = vpop.f32.mrf.mxu0 }
 0x8d9   :  { %v6508_v54 = vadd.f32 %v5570_v53, %v5560_v52  ;;  %v6544_v14 = vpop.f32.mrf.mxu1 }
 0x8da   :  { %v6510_v55 = vpop.f32.mrf.mxu0 }
 0x8e4   :  { %v2232_v57 = vpop.f32.mrf.mxu0 }
 0x8e5   :  { %v2236_v58 = vadd.f32 %v2232_v57, %v2136_v56 }
 0x8e6   :  { %v5589_v59 = vpop.f32.mrf.mxu0 }
 0x8e7   :  { %6041 = vtanh.f32 %v2236_v58  ;;  %v4813_v61 = vmul.f32 -1.442695, %v2236_v58 }
 0x8e9   :  { %6043 = vpow2.f32 %v4813_v61 }
 0x8f4   :  { %v6042_v60 = vpop.eup %6041 }
 0x8f5   :  { %2246 = vrot.lane.b32.xlu1 %v6042_v60, %s6208_s0 }
 0x8f6   :  { %v6044_v62 = vpop.eup %6043 }
 0x8f7   :  { %v2240_v63 = vadd.f32 1.0, %v6044_v62 }
 0x8f9   :  { %6045 = vrcp.f32 %v2240_v63 }
 0x906   :  { %v6046_v0 = vpop.eup %6045 }
 0x907   :  { %v2244_v3 = vmul.f32 0.0, %v6046_v0 }
 0x967   :  { %v2247_v1 = vpop.permute.xlu1 %2246 }
 0x968   :  { %v2249_v2 = vmul.f32 %v6046_v0, %v2247_v1 }
 0x96a   :  { %2251 = vrot.lane.b32.xlu1 %v2249_v2, %s6209_s16 }
 0x9dc   :  { %v2252_v4 = vpop.permute.xlu1 %2251 }
 0x9dd   :  { %v2254_v5 = vadd.f32 %v2252_v4, %v2244_v3 }
 0x9df   :  { %6047 = vtanh.f32 %v2254_v5  ;;  %v2355_v26 = vrot.slane %v2254_v5, 4 }
 0x9ec   :  { %v6048_v6 = vpop.eup %6047 }
 0x9ed   :  { %2257 = vrot.lane.b32.xlu1 %v6048_v6, %s6208_s0 }
 0xa5f   :  { %v2258_v7 = vpop.permute.xlu1 %2257 }
 0xa60   :  { %v6515_v8 = vmul.f32 %v6046_v0, %v2258_v7 }
 0xa62   :  { %2262 = vrot.lane.b32.xlu1 %v6515_v8, %s6209_s16 }
 0xa66   :  { %2265 = vrot.lane.b32.xlu1 %v6515_v8, %s6208_s0 }
 0xad4   :  { %v2263_v9 = vpop.permute.xlu1 %2262 }
 0xad8   :  { %v2266_v11 = vpop.permute.xlu1 %2265 }
 0xad9   :  { %v2268_v12 = vsel %vm568_vm3, %v2263_v9, %v2266_v11 }
 0xada   :  { %v2269_v13 = vmul.f32 %v2268_v12, %v6521_v10 }
 0xadc   :  { %5607 = vmatmul.mubr.msk.f32.vlgmr.msra.gmra.mxu1 %vm2162_vm6, %v2269_v13 }
 0xadd   :  { %5629 = vmatpush3.msra.mxu1 %v6427_v35  ;;  %5644 = vmatprep.mubr.msk.f32.mxu1 %vm6207_vm5, %v6206_v37 }
 0xade   :  { %5630 = vmatprep.subr.mxu1 %v6206_v37 }
 0xadf   :  { %5631 = vmatpush3.msra.mxu1 %v6432_v38 }
 0xae0   :  { %5632 = vmatprep.subr.mxu1 %v6206_v37 }
 0xae1   :  { %5633 = vmatpush3.msra.mxu1 %v6438_v41 }
 0xae2   :  { %5634 = vmatprep.subr.mxu1 %v6206_v37 }
 0xae3   :  { %5635 = vmatpush3.msra.mxu1 %v6444_v42 }
 0xae4   :  { %5636 = vmatprep.subr.mxu1 %v6206_v37 }
 0xae5   :  { %5637 = vmatpush3.msra.mxu1 %v6451_v43 }
 0xae6   :  { %5638 = vmatprep.subr.mxu1 %v6206_v37 }
 0xae7   :  { %5639 = vmatpush3.msra.mxu1 %v6457_v44 }
 0xae8   :  { %5640 = vmatprep.subr.mxu1 %v6206_v37 }
 0xae9   :  { %5641 = vmatpush3.msra.mxu1 %v6463_v45 }
 0xaea   :  { %5642 = vmatprep.subr.mxu1 %v6206_v37 }
 0xaeb   :  { %5643 = vmatpush3.msra.mxu1 %v6469_v46 }
 0xaec   :  { %5666 = vmatprep.subr.mxu1 %v6206_v37 }
 0xb9c   :  { %v2339_v15 = vpop.f32.mrf.mxu1 }
 0xb9d   :  { %v2344_v16 = vrot.slane %v2339_v15, 4 }
 0xb9e   :  { %v5608_v17 = vpop.f32.mrf.mxu1 }
 0xb9f   :  { %v2346_v18 = vadd.f32 %v2344_v16, %v2136_v56 }
 0xba1   :  { %6049 = vtanh.f32 %v2346_v18  ;;  %v4815_v20 = vmul.f32 -1.442695, %v2346_v18 }
 0xba3   :  { %6051 = vpow2.f32 %v4815_v20 }
 0xbae   :  { %v6050_v19 = vpop.eup %6049 }
 0xbaf   :  { %2359 = vrot.lane.b32.xlu1 %v6050_v19, %s6208_s0 }
 0xbb0   :  { %v6052_v21 = vpop.eup %6051 }
 0xbb1   :  { %v2350_v22 = vadd.f32 1.0, %v6052_v21 }
 0xbb3   :  { %6053 = vrcp.f32 %v2350_v22 }
 0xbc0   :  { %v6054_v23 = vpop.eup %6053 }
 0xbc1   :  { %v2357_v27 = vmul.f32 %v6054_v23, %v2355_v26 }
 0xc21   :  { %v2360_v24 = vpop.permute.xlu1 %2359 }
 0xc22   :  { %v2362_v25 = vmul.f32 %v6054_v23, %v2360_v24 }
 0xc24   :  { %2364 = vrot.lane.b32.xlu0 %v2362_v25, %s6209_s16 }
 0xc96   :  { %v2365_v28 = vpop.permute.xlu0 %2364 }
 0xc97   :  { %v2367_v29 = vadd.f32 %v2365_v28, %v2357_v27 }
 0xc99   :  { %6055 = vtanh.f32 %v2367_v29  ;;  %v2469_v61 = vrot.slane %v2367_v29, 4 }
 0xca6   :  { %v6056_v30 = vpop.eup %6055 }
 0xca7   :  { %2370 = vrot.lane.b32.xlu1 %v6056_v30, %s6208_s0 }
 0xd19   :  { %v2371_v31 = vpop.permute.xlu1 %2370 }
 0xd1a   :  { %v6549_v32 = vmul.f32 %v6054_v23, %v2371_v31 }
 0xd1c   :  { %2375 = vrot.lane.b32.xlu1 %v6549_v32, %s6209_s16 }
 0xd20   :  { %2378 = vrot.lane.b32.xlu1 %v6549_v32, %s6208_s0 }
 0xd8e   :  { %v2376_v33 = vpop.permute.xlu1 %2375 }
 0xd92   :  { %v2379_v36 = vpop.permute.xlu1 %2378 }
 0xd93   :  { %v2381_v39 = vsel %vm568_vm3, %v2376_v33, %v2379_v36  ;;  %v2146_v36 = vadd.f32 %v6544_v14, %v6510_v55 }
 0xd94   :  { %v2385_v40 = vmul.f32 %v6556_v34, %v2381_v39 }
 0xd96   :  { %v2387_v47 = vrot.slane %v2385_v40, 4 }
 0xd98   :  { %5626 = vmatmul.mubr.msk.f32.vlgmr.msra.gmra.mxu0 %vm2162_vm6, %v2387_v47 }
 0xd99   :  { %5648 = vmatpush3.msra.mxu0 %v6427_v35  ;;  %5663 = vmatprep.mubr.msk.f32.mxu0 %vm6207_vm5, %v6206_v37 }
 0xd9a   :  { %5649 = vmatprep.subr.mxu0 %v6206_v37 }
 0xd9b   :  { %5650 = vmatpush3.msra.mxu0 %v6432_v38 }
 0xd9c   :  { %5651 = vmatprep.subr.mxu0 %v6206_v37 }
 0xd9d   :  { %5652 = vmatpush3.msra.mxu0 %v6438_v41 }
 0xd9e   :  { %5653 = vmatprep.subr.mxu0 %v6206_v37 }
 0xd9f   :  { %5654 = vmatpush3.msra.mxu0 %v6444_v42 }
 0xda0   :  { %5655 = vmatprep.subr.mxu0 %v6206_v37 }
 0xda1   :  { %5656 = vmatpush3.msra.mxu0 %v6451_v43 }
 0xda2   :  { %5657 = vmatprep.subr.mxu0 %v6206_v37 }
 0xda3   :  { %5658 = vmatpush3.msra.mxu0 %v6457_v44 }
 0xda4   :  { %5659 = vmatprep.subr.mxu0 %v6206_v37 }
 0xda5   :  { %5660 = vmatpush3.msra.mxu0 %v6463_v45 }
 0xda6   :  { %5661 = vmatprep.subr.mxu0 %v6206_v37 }
 0xda7   :  { %5662 = vmatpush3.msra.mxu0 %v6469_v46 }
 0xda8   :  { %5685 = vmatprep.subr.mxu0 %v6206_v37 }
 0xe58   :  { %v2456_v48 = vpop.f32.mrf.mxu0 }
 0xe59   :  { %v2460_v50 = vadd.f32 %v2456_v48, %v6506_v49 }
 0xe5a   :  { %v5627_v51 = vpop.f32.mrf.mxu0 }
 0xe5b   :  { %6057 = vtanh.f32 %v2460_v50  ;;  %v4817_v53 = vmul.f32 -1.442695, %v2460_v50 }
 0xe5d   :  { %6059 = vpow2.f32 %v4817_v53 }
 0xe68   :  { %v6058_v52 = vpop.eup %6057 }
 0xe69   :  { %2473 = vrot.lane.b32.xlu1 %v6058_v52, %s6208_s0 }
 0xe6a   :  { %v6060_v56 = vpop.eup %6059 }
 0xe6b   :  { %v2464_v57 = vadd.f32 1.0, %v6060_v56 }
 0xe6d   :  { %6061 = vrcp.f32 %v2464_v57 }
 0xe7a   :  { %v6062_v58 = vpop.eup %6061 }
 0xe7b   :  { %v2471_v62 = vmul.f32 %v6062_v58, %v2469_v61 }
 0xedb   :  { %v2474_v59 = vpop.permute.xlu1 %2473 }
 0xedc   :  { %v2476_v60 = vmul.f32 %v6062_v58, %v2474_v59 }
 0xede   :  { %2478 = vrot.lane.b32.xlu1 %v2476_v60, %s6209_s16 }
 0xf50   :  { %v2479_v63 = vpop.permute.xlu1 %2478 }
 0xf51   :  { %v2481_v0 = vadd.f32 %v2479_v63, %v2471_v62 }
 0xf53   :  { %6063 = vtanh.f32 %v2481_v0  ;;  %v2582_v22 = vrot.slane %v2481_v0, 4 }
 0xf60   :  { %v6064_v1 = vpop.eup %6063 }
 0xf61   :  { %2484 = vrot.lane.b32.xlu1 %v6064_v1, %s6208_s0 }
 0xfd3   :  { %v2485_v2 = vpop.permute.xlu1 %2484 }
 0xfd4   :  { %v6583_v3 = vmul.f32 %v6062_v58, %v2485_v2 }
 0xfd6   :  { %2489 = vrot.lane.b32.xlu1 %v6583_v3, %s6209_s16 }
 0xfda   :  { %2492 = vrot.lane.b32.xlu1 %v6583_v3, %s6208_s0 }
0x1048   :  { %v2490_v4 = vpop.permute.xlu1 %2489 }
0x104c   :  { %v2493_v5 = vpop.permute.xlu1 %2492 }
0x104d   :  { %v2495_v6 = vsel %vm568_vm3, %v2490_v4, %v2493_v5 }
0x104e   :  { %v2496_v7 = vmul.f32 %v2495_v6, %v6521_v10 }
0x1050   :  { %5645 = vmatmul.mubr.msk.f32.vlgmr.msra.gmra.mxu1 %vm2162_vm6, %v2496_v7 }
0x1051   :  { %5667 = vmatpush3.msra.mxu1 %v6427_v35  ;;  %5682 = vmatprep.mubr.msk.f32.mxu1 %vm6207_vm5, %v6206_v37 }
0x1052   :  { %5668 = vmatprep.subr.mxu1 %v6206_v37 }
0x1053   :  { %5669 = vmatpush3.msra.mxu1 %v6432_v38 }
0x1054   :  { %5670 = vmatprep.subr.mxu1 %v6206_v37 }
0x1055   :  { %5671 = vmatpush3.msra.mxu1 %v6438_v41 }
0x1056   :  { %5672 = vmatprep.subr.mxu1 %v6206_v37 }
0x1057   :  { %5673 = vmatpush3.msra.mxu1 %v6444_v42 }
0x1058   :  { %5674 = vmatprep.subr.mxu1 %v6206_v37 }
0x1059   :  { %5675 = vmatpush3.msra.mxu1 %v6451_v43 }
0x105a   :  { %5676 = vmatprep.subr.mxu1 %v6206_v37 }
0x105b   :  { %5677 = vmatpush3.msra.mxu1 %v6457_v44 }
0x105c   :  { %5678 = vmatprep.subr.mxu1 %v6206_v37 }
0x105d   :  { %5679 = vmatpush3.msra.mxu1 %v6463_v45 }
0x105e   :  { %5680 = vmatprep.subr.mxu1 %v6206_v37 }
0x105f   :  { %5681 = vmatpush3.msra.mxu1 %v6469_v46 }
0x1060   :  { %5704 = vmatprep.subr.mxu1 %v6206_v37 }
0x1110   :  { %v2566_v9 = vpop.f32.mrf.mxu1 }
0x1111   :  { %v2571_v11 = vrot.slane %v2566_v9, 4 }
0x1112   :  { %v5646_v12 = vpop.f32.mrf.mxu1 }
0x1113   :  { %v2573_v13 = vadd.f32 %v2571_v11, %v6506_v49 }
0x1115   :  { %6065 = vtanh.f32 %v2573_v13  ;;  %v4819_v16 = vmul.f32 -1.442695, %v2573_v13 }
0x1117   :  { %6067 = vpow2.f32 %v4819_v16 }
0x1122   :  { %v6066_v15 = vpop.eup %6065 }
0x1123   :  { %2586 = vrot.lane.b32.xlu1 %v6066_v15, %s6208_s0 }
0x1124   :  { %v6068_v17 = vpop.eup %6067 }
0x1125   :  { %v2577_v18 = vadd.f32 1.0, %v6068_v17 }
0x1127   :  { %6069 = vrcp.f32 %v2577_v18 }
0x1134   :  { %v6070_v19 = vpop.eup %6069 }
0x1135   :  { %v2584_v23 = vmul.f32 %v6070_v19, %v2582_v22 }
0x1195   :  { %v2587_v20 = vpop.permute.xlu1 %2586 }
0x1196   :  { %v2589_v21 = vmul.f32 %v6070_v19, %v2587_v20 }
0x1198   :  { %2591 = vrot.lane.b32.xlu1 %v2589_v21, %s6209_s16 }
0x120a   :  { %v2592_v24 = vpop.permute.xlu1 %2591 }
0x120b   :  { %v2594_v25 = vadd.f32 %v2592_v24, %v2584_v23 }
0x120d   :  { %6071 = vtanh.f32 %v2594_v25  ;;  %v2693_v58 = vrot.slane %v2594_v25, 4 }
0x121a   :  { %v6072_v49 = vpop.eup %6071 }
0x121b   :  { %2597 = vrot.lane.b32.xlu0 %v6072_v49, %s6208_s0 }
0x128d   :  { %v2598_v26 = vpop.permute.xlu0 %2597 }
0x128e   :  { %v6614_v27 = vmul.f32 %v6070_v19, %v2598_v26 }
0x1290   :  { %2605 = vrot.lane.b32.xlu0 %v6614_v27, %s6208_s0  ;;  %2602 = vrot.lane.b32.xlu1 %v6614_v27, %s6209_s16 }
0x1302   :  { %v2606_v28 = vpop.permute.xlu0 %2605  ;;  %v2603_v29 = vpop.permute.xlu1 %2602 }
0x1303   :  { %v2608_v30 = vsel %vm568_vm3, %v2603_v29, %v2606_v28 }
0x1304   :  { %v2609_v31 = vmul.f32 %v2608_v30, %v6556_v34 }
0x1306   :  { %v2611_v33 = vrot.slane %v2609_v31, 4 }
0x1308   :  { %5664 = vmatmul.mubr.msk.f32.vlgmr.msra.gmra.mxu0 %vm2162_vm6, %v2611_v33 }
0x1309   :  { %5686 = vmatpush3.msra.mxu0 %v6427_v35  ;;  %5701 = vmatprep.mubr.msk.f32.mxu0 %vm6207_vm5, %v6206_v37 }
0x130a   :  { %5687 = vmatprep.subr.mxu0 %v6206_v37 }
0x130b   :  { %5688 = vmatpush3.msra.mxu0 %v6432_v38 }
0x130c   :  { %5689 = vmatprep.subr.mxu0 %v6206_v37 }
0x130d   :  { %5690 = vmatpush3.msra.mxu0 %v6438_v41 }
0x130e   :  { %5691 = vmatprep.subr.mxu0 %v6206_v37 }
0x130f   :  { %5692 = vmatpush3.msra.mxu0 %v6444_v42 }
0x1310   :  { %5693 = vmatprep.subr.mxu0 %v6206_v37 }
0x1311   :  { %5694 = vmatpush3.msra.mxu0 %v6451_v43 }
0x1312   :  { %5695 = vmatprep.subr.mxu0 %v6206_v37 }
0x1313   :  { %5696 = vmatpush3.msra.mxu0 %v6457_v44 }
0x1314   :  { %5697 = vmatprep.subr.mxu0 %v6206_v37 }
0x1315   :  { %5698 = vmatpush3.msra.mxu0 %v6463_v45 }
0x1316   :  { %5699 = vmatprep.subr.mxu0 %v6206_v37 }
0x1317   :  { %5700 = vmatpush3.msra.mxu0 %v6469_v46 }
0x13c8   :  { %v2680_v39 = vpop.f32.mrf.mxu0 }
0x13c9   :  { %v2684_v40 = vadd.f32 %v2680_v39, %v2146_v36 }
0x13ca   :  { %v5665_v47 = vpop.f32.mrf.mxu0 }
0x13cb   :  { %6073 = vtanh.f32 %v2684_v40  ;;  %v4821_v50 = vmul.f32 -1.442695, %v2684_v40 }
0x13cd   :  { %6075 = vpow2.f32 %v4821_v50 }
0x13d8   :  { %v6074_v48 = vpop.eup %6073 }
0x13d9   :  { %2697 = vrot.lane.b32.xlu1 %v6074_v48, %s6208_s0 }
0x13da   :  { %v6076_v51 = vpop.eup %6075 }
0x13db   :  { %v2688_v52 = vadd.f32 1.0, %v6076_v51 }
0x13dd   :  { %6077 = vrcp.f32 %v2688_v52 }
0x13ea   :  { %v6078_v53 = vpop.eup %6077 }
0x13eb   :  { %v2695_v59 = vmul.f32 %v6078_v53, %v2693_v58 }
0x144b   :  { %v2698_v56 = vpop.permute.xlu1 %2697 }
0x144c   :  { %v2700_v57 = vmul.f32 %v6078_v53, %v2698_v56 }
0x144e   :  { %2702 = vrot.lane.b32.xlu0 %v2700_v57, %s6209_s16 }
0x14c0   :  { %v2703_v55 = vpop.permute.xlu0 %2702 }
0x14c1   :  { %v2705_v14 = vadd.f32 %v2703_v55, %v2695_v59 }
0x14c3   :  { %6079 = vtanh.f32 %v2705_v14  ;;  %v2806_v9 = vrot.slane %v2705_v14, 4 }
0x14d0   :  { %v6080_v60 = vpop.eup %6079 }
0x14d1   :  { %2708 = vrot.lane.b32.xlu1 %v6080_v60, %s6208_s0 }
0x1543   :  { %v2709_v61 = vpop.permute.xlu1 %2708 }
0x1544   :  { %v6645_v62 = vmul.f32 %v6078_v53, %v2709_v61 }
0x1546   :  { %2716 = vrot.lane.b32.xlu1 %v6645_v62, %s6208_s0  ;;  %2713 = vrot.lane.b32.xlu0 %v6645_v62, %s6209_s16 }
0x15b8   :  { %v2717_v63 = vpop.permute.xlu1 %2716  ;;  %v2714_v0 = vpop.permute.xlu0 %2713 }
0x15b9   :  { %v2719_v1 = vsel %vm568_vm3, %v2714_v0, %v2717_v63 }
0x15ba   :  { %v2720_v2 = vmul.f32 %v2719_v1, %v6521_v10 }
0x15bc   :  { %5683 = vmatmul.mubr.msk.f32.vlgmr.msra.gmra.mxu1 %vm2162_vm6, %v2720_v2 }
0x15bd   :  { %5705 = vmatpush3.msra.mxu1 %v6427_v35  ;;  %5720 = vmatprep.mubr.msk.f32.mxu1 %vm6207_vm5, %v6206_v37 }
0x15be   :  { %5706 = vmatprep.subr.mxu1 %v6206_v37 }
0x15bf   :  { %5707 = vmatpush3.msra.mxu1 %v6432_v38 }
0x15c0   :  { %5708 = vmatprep.subr.mxu1 %v6206_v37 }
0x15c1   :  { %5709 = vmatpush3.msra.mxu1 %v6438_v41 }
0x15c2   :  { %5710 = vmatprep.subr.mxu1 %v6206_v37 }
0x15c3   :  { %5711 = vmatpush3.msra.mxu1 %v6444_v42 }
0x15c4   :  { %5712 = vmatprep.subr.mxu1 %v6206_v37 }
0x15c5   :  { %5713 = vmatpush3.msra.mxu1 %v6451_v43 }
0x15c6   :  { %5714 = vmatprep.subr.mxu1 %v6206_v37 }
0x15c7   :  { %5715 = vmatpush3.msra.mxu1 %v6457_v44 }
0x15c8   :  { %5716 = vmatprep.subr.mxu1 %v6206_v37 }
0x15c9   :  { %5717 = vmatpush3.msra.mxu1 %v6463_v45 }
0x15ca   :  { %5718 = vmatprep.subr.mxu1 %v6206_v37 }
0x15cb   :  { %5719 = vmatpush3.msra.mxu1 %v6469_v46 }
0x167c   :  { %v2790_v35 = vpop.f32.mrf.mxu1 }
0x167d   :  { %v2795_v38 = vrot.slane %v2790_v35, 4 }
0x167e   :  { %v5684_v41 = vpop.f32.mrf.mxu1 }
0x167f   :  { %v2797_v42 = vadd.f32 %v2795_v38, %v2146_v36 }
0x1681   :  { %6081 = vtanh.f32 %v2797_v42  ;;  %v4823_v43 = vmul.f32 -1.442695, %v2797_v42 }
0x1683   :  { %6083 = vpow2.f32 %v4823_v43  ;;  %v6704_v43 = vld [vmem:[#allocation2 + $0x588] sm:$0xff] }
0x168e   :  { %v6082_v4 = vpop.eup %6081 }
0x168f   :  { %2810 = vrot.lane.b32.xlu0 %v6082_v4, %s6208_s0  ;;  %v3050_v4 = vsel %vm3049_vm7, %v6515_v8, %v6549_v32  ;;  %v3051_v8 = vsel %vm3049_vm7, %v6583_v3, %v6614_v27  ;;  %v1782_v3 = vld [vmem:[#allocation2 + $0x580] sm:$0xff] }
0x1690   :  { %v6084_v5 = vpop.eup %6083  ;;  %v3249_v27 = vld [vmem:[#allocation2 + $0x4a0] sm:$0xff] }
0x1691   :  { %v2801_v44 = vadd.f32 1.0, %v6084_v5  ;;  %v6708_v5 = vld [vmem:[#allocation2 + $0x578] sm:$0xff] }
0x1693   :  { %6085 = vrcp.f32 %v2801_v44 }
0x16a0   :  { %v6086_v6 = vpop.eup %6085 }
0x16a1   :  { %v2808_v46 = vmul.f32 %v6086_v6, %v2806_v9 }
0x1701   :  { %v2811_v7 = vpop.permute.xlu0 %2810 }
0x1702   :  { %v2813_v45 = vmul.f32 %v6086_v6, %v2811_v7 }
0x1704   :  { %2815 = vrot.lane.b32.xlu1 %v2813_v45, %s6209_s16 }
0x1776   :  { %v2816_v11 = vpop.permute.xlu1 %2815 }
0x1777   :  { %v2818_v12 = vadd.f32 %v2816_v11, %v2808_v46  ;;  %v1784_v46 = vld [vmem:[#allocation2 + $0x590] sm:$0xff]  ;;  %v3343_v11 = vld [vmem:[#allocation2 + $0x4e8] sm:$0xff] }
0x1779   :  { %6087 = vtanh.f32 %v2818_v12  ;;  %v2917_v33 = vrot.slane %v2818_v12, 4  ;;  %v3248_v12 = vld [vmem:[#allocation2 + $0x498] sm:$0xff] }
0x1786   :  { %v6088_v13 = vpop.eup %6087 }
0x1787   :  { %2821 = vrot.lane.b32.xlu0 %v6088_v13, %s6208_s0  ;;  %v3342_v13 = vld [vmem:[#allocation2 + $0x4e0] sm:$0xff] }
0x17f9   :  { %v2822_v15 = vpop.permute.xlu0 %2821 }
0x17fa   :  { %v6674_v16 = vmul.f32 %v6086_v6, %v2822_v15  ;;  %v3247_v15 = vld [vmem:[#allocation2 + $0x490] sm:$0xff] }
0x17fc   :  { %2829 = vrot.lane.b32.xlu0 %v6674_v16, %s6208_s0  ;;  %2826 = vrot.lane.b32.xlu1 %v6674_v16, %s6209_s16  ;;  %v3052_v42 = vsel %vm3049_vm7, %v6645_v62, %v6674_v16  ;;  %v3341_v16 = vld [vmem:[#allocation2 + $0x4d8] sm:$0xff] }
0x186e   :  { %v2830_v17 = vpop.permute.xlu0 %2829  ;;  %v2827_v18 = vpop.permute.xlu1 %2826 }
0x186f   :  { %v2832_v19 = vsel %vm568_vm3, %v2827_v18, %v2830_v17  ;;  %v3246_v17 = vld [vmem:[#allocation2 + $0x488] sm:$0xff]  ;;  %v3340_v18 = vld [vmem:[#allocation2 + $0x4d0] sm:$0xff] }
0x1870   :  { %v2833_v20 = vmul.f32 %v2832_v19, %v6556_v34  ;;  %v3245_v19 = vld [vmem:[#allocation2 + $0x480] sm:$0xff] }
0x1872   :  { %v2835_v21 = vrot.slane %v2833_v20, 4  ;;  %v3339_v20 = vld [vmem:[#allocation2 + $0x4c8] sm:$0xff] }
0x1874   :  { %5702 = vmatmul.mubr.msk.f32.vlgmr.msra.gmra.mxu0 %vm2162_vm6, %v2835_v21  ;;  %v3244_v21 = vld [vmem:[#allocation2 + $0x478] sm:$0xff] }
0x1875   :  { %5731 = vmatprep.mubr.msk.f32.mxu0 %vm568_vm3, %v6708_v5 }
0x1934   :  { %v2904_v22 = vpop.f32.mrf.mxu0 }
0x1935   :  { %v2908_v23 = vadd.f32 %v2904_v22, %v6508_v54  ;;  %v3338_v22 = vld [vmem:[#allocation2 + $0x4c0] sm:$0xff] }
0x1936   :  { %v5703_v24 = vpop.f32.mrf.mxu0 }
0x1937   :  { %6089 = vtanh.f32 %v2908_v23  ;;  %v4825_v49 = vmul.f32 -1.442695, %v2908_v23  ;;  %v3243_v23 = vld [vmem:[#allocation2 + $0x470] sm:$0xff]  ;;  %v3337_v24 = vld [vmem:[#allocation2 + $0x4b8] sm:$0xff] }
0x1939   :  { %6091 = vpow2.f32 %v4825_v49  ;;  %v3336_v49 = vld [vmem:[#allocation2 + $0x4b0] sm:$0xff] }
0x1944   :  { %v6090_v25 = vpop.eup %6089 }
0x1945   :  { %2921 = vrot.lane.b32.xlu1 %v6090_v25, %s6208_s0  ;;  %v3242_v25 = vld [vmem:[#allocation2 + $0x468] sm:$0xff] }
0x1946   :  { %v6092_v26 = vpop.eup %6091 }
0x1947   :  { %v2912_v28 = vadd.f32 1.0, %v6092_v26 }
0x1949   :  { %6093 = vrcp.f32 %v2912_v28 }
0x1956   :  { %v6094_v29 = vpop.eup %6093 }
0x1957   :  { %v2919_v36 = vmul.f32 %v6094_v29, %v2917_v33 }
0x19b7   :  { %v2922_v30 = vpop.permute.xlu1 %2921 }
0x19b8   :  { %v2924_v31 = vmul.f32 %v6094_v29, %v2922_v30 }
0x19ba   :  { %2926 = vrot.lane.b32.xlu0 %v2924_v31, %s6209_s16 }
0x1a2c   :  { %v2927_v39 = vpop.permute.xlu0 %2926 }
0x1a2d   :  { %v2929_v40 = vadd.f32 %v2927_v39, %v2919_v36 }
0x1a2f   :  { %6095 = vtanh.f32 %v2929_v40 }
0x1a3c   :  { %v6096_v47 = vpop.eup %6095 }
0x1a3d   :  { %2932 = vrot.lane.b32.xlu1 %v6096_v47, %s6208_s0  ;;  %v6170_v47 = vld [vmem:[#allocation2 + $0x538] sm:$0xff] }
0x1aaf   :  { %v2933_v48 = vpop.permute.xlu1 %2932 }
0x1ab0   :  { %v2935_v50 = vmul.f32 %v6094_v29, %v2933_v48  ;;  %v4832_v48 = vld [vmem:[#allocation2 + $0x4a8] ss:$0 sm:$0xff] }
0x1ab2   :  { %2940 = vrot.lane.b32.xlu1 %v2935_v50, %s6208_s0  ;;  %2937 = vrot.lane.b32.xlu0 %v2935_v50, %s6209_s16 }
0x1b24   :  { %v2941_v51 = vpop.permute.xlu1 %2940  ;;  %v2938_v52 = vpop.permute.xlu0 %2937 }
0x1b25   :  { %v2943_v53 = vsel %vm568_vm3, %v2938_v52, %v2941_v51 }
0x1b26   :  { %v2944_v56 = vmul.f32 %v2943_v53, %v6521_v10  ;;  %v3030_v10 = vrot.slane %v2929_v40, 4  ;;  %v6169_v40 = vld [vmem:[#allocation2 + $0x558] sm:$0xff] }
0x1b28   :  { %5721 = vmatmul.mubr.msk.f32.vlgmr.msra.gmra.mxu1 %vm2162_vm6, %v2944_v56 }
0x1b29   :  { %5742 = vmatprep.mubr.msk.f32.mxu1 %vm568_vm3, %v6704_v43 }
0x1be8   :  { %v3014_v57 = vpop.f32.mrf.mxu1 }
0x1be9   :  { %v3019_v58 = vrot.slane %v3014_v57, 4 }
0x1bea   :  { %v5722_v59 = vpop.f32.mrf.mxu1 }
0x1beb   :  { %v3021_v55 = vadd.f32 %v3019_v58, %v6508_v54 }
0x1bed   :  { %6097 = vtanh.f32 %v3021_v55  ;;  %v4827_v60 = vmul.f32 -1.442695, %v3021_v55 }
0x1bef   :  { %6099 = vpow2.f32 %v4827_v60  ;;  %v6171_v60 = vld [vmem:[#allocation2 + $0x560] sm:$0xff] }
0x1bfa   :  { %v6098_v14 = vpop.eup %6097 }
0x1bfb   :  { %3034 = vrot.lane.b32.xlu0 %v6098_v14, %s6208_s0  ;;  %v6730_v14 = vld [vmem:[#allocation2 + $0x530] sm:$0xff] }
0x1bfc   :  { %v6100_v61 = vpop.eup %6099 }
0x1bfd   :  { %v3025_v63 = vadd.f32 1.0, %v6100_v61  ;;  %v6172_v61 = vld [vmem:[#allocation2 + $0x540] sm:$0xff] }
0x1bff   :  { %6101 = vrcp.f32 %v3025_v63  ;;  %v6735_v63 = vld [vmem:[#allocation2 + $0x528] sm:$0xff] }
0x1c0c   :  { %v6102_v0 = vpop.eup %6101 }
0x1c0d   :  { %v3032_v35 = vmul.f32 %v6102_v0, %v3030_v10  ;;  %v6175_v10 = vld [vmem:[#allocation2 + $0x550] sm:$0xff] }
0x1c6d   :  { %v3035_v1 = vpop.permute.xlu0 %3034 }
0x1c6e   :  { %v3037_v2 = vmul.f32 %v6102_v0, %v3035_v1  ;;  %v6174_v1 = vld [vmem:[#allocation2 + $0x548] sm:$0xff] }
0x1c70   :  { %3039 = vrot.lane.b32.xlu1 %v3037_v2, %s6209_s16  ;;  %v6741_v2 = vld [vmem:[#allocation2 + $0x520] sm:$0xff] }
0x1ce2   :  { %v3040_v38 = vpop.permute.xlu1 %3039 }
0x1ce3   :  { %v3042_v41 = vadd.f32 %v3040_v38, %v3032_v35  ;;  %v6747_v35 = vld [vmem:[#allocation2 + $0x518] sm:$0xff]  ;;  %v6176_v38 = vld [vmem:[#allocation2 + $0x570] sm:$0xff] }
0x1ce5   :  { %6103 = vtanh.f32 %v3042_v41  ;;  %v6754_v41 = vld [vmem:[#allocation2 + $0x510] sm:$0xff] }
0x1cf2   :  { %v6104_v54 = vpop.eup %6103 }
0x1cf3   :  { %3045 = vrot.lane.b32.xlu0 %v6104_v54, %s6208_s0  ;;  %v6760_v54 = vld [vmem:[#allocation2 + $0x508] sm:$0xff] }
0x1cf7   :  { %3062 = vrot.lane.b32.xlu0 %v3052_v42, %s6209_s16  ;;  %v6766_v42 = vld [vmem:[#allocation2 + $0x500] sm:$0xff] }
0x1cfb   :  { %3058 = vrot.lane.b32.xlu0 %v3050_v4, %s6209_s16  ;;  %v6772_v4 = vld [vmem:[#allocation2 + $0x4f8] sm:$0xff] }
0x1d65   :  { %v3046_v44 = vpop.permute.xlu0 %3045 }
0x1d66   :  { %v3048_v62 = vmul.f32 %v6102_v0, %v3046_v44  ;;  %v6173_v0 = vld [vmem:[#allocation2 + $0x568] sm:$0xff] }
0x1d68   :  { %v3053_v6 = vsel %vm3049_vm7, %v2935_v50, %v3048_v62  ;;  %v4835_v50 = vld [vmem:[#allocation2 + $0x4f0] ss:$0 sm:$0xff] }
0x1d69   :  { %3064 = vrot.lane.b32.xlu1 %v3053_v6, %s6209_s16  ;;  %v3063_v32 = vpop.permute.xlu0 %3062 }
0x1d6d   :  { %3060 = vrot.lane.b32.xlu1 %v3051_v8, %s6209_s16  ;;  %v3059_v9 = vpop.permute.xlu0 %3058 }
0x1ddb   :  { %v3065_v7 = vpop.permute.xlu1 %3064 }
0x1ddc   :  { %5723 = vmatprep.subr.mxu0 %v3065_v7  ;;  %5734 = vmatprep.subr.mxu1 %v3065_v7 }
0x1ddd   :  { %5724 = vmatpush3.msra.mxu0 %v3065_v7  ;;  %5735 = vmatpush3.msra.mxu1 %v3065_v7 }
0x1dde   :  { %5725 = vmatprep.subr.mxu0 %v3063_v32  ;;  %5736 = vmatprep.subr.mxu1 %v3063_v32 }
0x1ddf   :  { %v3061_v45 = vpop.permute.xlu1 %3060  ;;  %5726 = vmatpush3.msra.mxu0 %v3063_v32  ;;  %5737 = vmatpush3.msra.mxu1 %v3063_v32 }
0x1de0   :  { %5727 = vmatprep.subr.mxu0 %v3061_v45  ;;  %5738 = vmatprep.subr.mxu1 %v3061_v45 }
0x1de1   :  { %5728 = vmatpush3.msra.mxu0 %v3061_v45  ;;  %5739 = vmatpush3.msra.mxu1 %v3061_v45 }
0x1de2   :  { %5729 = vmatprep.subr.mxu0 %v3059_v9  ;;  %5740 = vmatprep.subr.mxu1 %v3059_v9 }
0x1de3   :  { %5730 = vmatpush3.msra.mxu0 %v3059_v9  ;;  %5741 = vmatpush3.msra.mxu1 %v3059_v9 }
0x1de4   :  { %5743 = vmatmul.mubr.msk.f32.vlgmr.msra.gmra.mxu1 %vm568_vm3, %v1784_v46  ;;  %5732 = vmatmul.mubr.msk.f32.vlgmr.msra.gmra.mxu0 %vm568_vm3, %v1782_v3 }
0x1de5   :  { %5745 = vmatprep.subr.mxu0 %v3249_v27  ;;  %5764 = vmatprep.subr.mxu1 %v3343_v11 }
0x1de6   :  { %5746 = vmatpush3.msra.mxu0 %v3249_v27  ;;  %5765 = vmatpush3.msra.mxu1 %v3343_v11 }
0x1de7   :  { %5747 = vmatprep.subr.mxu0 %v3248_v12  ;;  %5766 = vmatprep.subr.mxu1 %v3342_v13 }
0x1de8   :  { %5748 = vmatpush3.msra.mxu0 %v3248_v12  ;;  %5767 = vmatpush3.msra.mxu1 %v3342_v13 }
0x1de9   :  { %5749 = vmatprep.subr.mxu0 %v3247_v15  ;;  %5768 = vmatprep.subr.mxu1 %v3341_v16 }
0x1dea   :  { %5750 = vmatpush3.msra.mxu0 %v3247_v15  ;;  %5769 = vmatpush3.msra.mxu1 %v3341_v16 }
0x1deb   :  { %5751 = vmatprep.subr.mxu0 %v3246_v17  ;;  %5770 = vmatprep.subr.mxu1 %v3340_v18 }
0x1dec   :  { %5752 = vmatpush3.msra.mxu0 %v3246_v17  ;;  %5771 = vmatpush3.msra.mxu1 %v3340_v18 }
0x1ded   :  { %5753 = vmatprep.subr.mxu0 %v3245_v19  ;;  %5772 = vmatprep.subr.mxu1 %v3339_v20 }
0x1dee   :  { %5754 = vmatpush3.msra.mxu0 %v3245_v19  ;;  %5773 = vmatpush3.msra.mxu1 %v3339_v20 }
0x1def   :  { %5755 = vmatprep.subr.mxu0 %v3244_v21  ;;  %5774 = vmatprep.subr.mxu1 %v3338_v22 }
0x1df0   :  { %5756 = vmatpush3.msra.mxu0 %v3244_v21  ;;  %5775 = vmatpush3.msra.mxu1 %v3338_v22 }
0x1df1   :  { %5757 = vmatprep.subr.mxu0 %v3243_v23  ;;  %5776 = vmatprep.subr.mxu1 %v3337_v24 }
0x1df2   :  { %5758 = vmatpush3.msra.mxu0 %v3243_v23  ;;  %5777 = vmatpush3.msra.mxu1 %v3337_v24 }
0x1df3   :  { %5759 = vmatprep.subr.mxu0 %v3242_v25  ;;  %5778 = vmatprep.subr.mxu1 %v3336_v49 }
0x1df4   :  { %5760 = vmatpush3.msra.mxu0 %v3242_v25  ;;  %5779 = vmatpush3.msra.mxu1 %v3336_v49 }
0x1ea4   :  { %v5744_v26 = vpop.f32.mrf.mxu1  ;;  %v5733_v29 = vpop.f32.mrf.mxu0 }
0x1ea5   :  { %3236 = vrot.lane.b32.xlu0 %v5744_v26, %s6209_s16 }
0x1ea6   :  { %v3223_v28 = vpop.f32.mrf.mxu1  ;;  %v3142_v31 = vpop.f32.mrf.mxu0 }
0x1ea7   :  { %3234 = vrot.lane.b32.xlu1 %v3223_v28, %s6209_s16 }
0x1f17   :  { %v3237_v30 = vpop.permute.xlu0 %3236 }
0x1f18   :  { %v3241_v39 = vsel %vm568_vm3, %v5733_v29, %v3237_v30  ;;  %v6825_v30 = vld [vmem:[#allocation2 + $0x598] sm:$0xf] }
0x1f19   :  { %v3235_v33 = vpop.permute.xlu1 %3234 }
0x1f1a   :  { %v3240_v36 = vsel %vm568_vm3, %v3142_v31, %v3235_v33 }
0x1f1b   :  { %5761 = vmatprep.mubr.msk.f32.mxu0 %vm2162_vm6, %v3240_v36  ;;  %5780 = vmatprep.mubr.msk.f32.mxu1 %vm2162_vm6, %v3240_v36 }
0x1f1c   :  { %5762 = vmatmul.mubr.msk.f32.vlgmr.msra.gmra.mxu0 %vm2162_vm6, %v3241_v39  ;;  %5781 = vmatmul.mubr.msk.f32.vlgmr.msra.gmra.mxu1 %vm2162_vm6, %v3241_v39 }
0x1f1d   :  { %5787 = vmatprep.mubr.msk.f32.mxu0 %vm1542_vm4, %v6169_v40  ;;  %5797 = vmatprep.mubr.msk.f32.mxu1 %vm1542_vm4, %v6170_v47 }
0x1fdc   :  { %v5763_v51 = vpop.f32.mrf.mxu0  ;;  %v5782_v52 = vpop.f32.mrf.mxu1 }
0x1fdd   :  { %v3333_v53 = vadd.f32 %v5763_v51, %v4832_v48  ;;  %v3421_v56 = vadd.f32 %v5782_v52, %v4835_v50 }
0x1fde   :  { %v3327_v57 = vpop.f32.mrf.mxu0  ;;  %v3415_v58 = vpop.f32.mrf.mxu1 }
0x1fdf   :  { %v3328_v59 = vadd.f32 %v4832_v48, %v3327_v57  ;;  %v3416_v55 = vadd.f32 %v4835_v50, %v3415_v58  ;;  %5783 = vmatprep.subr.mxu0 %v3421_v56  ;;  %5793 = vmatprep.subr.mxu1 %v3333_v53 }
0x1fe0   :  { %5784 = vmatpush3.msra.mxu0 %v3421_v56  ;;  %5794 = vmatpush3.msra.mxu1 %v3333_v53 }
0x1fe1   :  { %5785 = vmatprep.subr.mxu0 %v3416_v55  ;;  %5795 = vmatprep.subr.mxu1 %v3328_v59 }
0x1fe2   :  { %5786 = vmatpush3.msra.mxu0 %v3416_v55  ;;  %5796 = vmatpush3.msra.mxu1 %v3328_v59 }
0x1fe3   :  { %5788 = vmatmul.mubr.msk.f32.vlgmr.msra.gmra.mxu0 %vm1542_vm4, %v6171_v60  ;;  %5798 = vmatmul.mubr.msk.f32.vlgmr.msra.gmra.mxu1 %vm1542_vm4, %v6172_v61 }
0x1fe4   :  { %5803 = vmatprep.subr.mxu0 %v6206_v37  ;;  %5790 = vmatprep.mubr.msk.f32.mxu0 %vm1542_vm4, %v6173_v0 }
0x1fe5   :  { %5804 = vmatpush3.msra.mxu0 %v6730_v14  ;;  %5800 = vmatprep.mubr.msk.f32.mxu1 %vm1542_vm4, %v6174_v1 }
0x1fe6   :  { %5805 = vmatprep.subr.mxu0 %v6206_v37  ;;  %5822 = vmatprep.subr.mxu1 %v6206_v37 }
0x1fe7   :  { %5806 = vmatpush3.msra.mxu0 %v6735_v63  ;;  %5801 = vmatmul.mubr.msk.f32.gmra.mxu1 %vm1542_vm4, %v6175_v10 }
0x1fe8   :  { %5807 = vmatprep.subr.mxu0 %v6206_v37  ;;  %5791 = vmatmul.mubr.msk.f32.gmra.mxu0 %vm1542_vm4, %v6176_v38 }
0x1fe9   :  { %5808 = vmatpush3.msra.mxu0 %v6741_v2  ;;  %5819 = vmatprep.mubr.msk.f32.mxu0 %vm6207_vm5, %v6206_v37 }
0x1fea   :  { %5809 = vmatprep.subr.mxu0 %v6206_v37  ;;  %5823 = vmatpush3.msra.mxu1 %v6730_v14 }
0x1feb   :  { %5810 = vmatpush3.msra.mxu0 %v6747_v35  ;;  %5824 = vmatprep.subr.mxu1 %v6206_v37 }
0x1fec   :  { %5811 = vmatprep.subr.mxu0 %v6206_v37  ;;  %5825 = vmatpush3.msra.mxu1 %v6735_v63 }
0x1fed   :  { %5812 = vmatpush3.msra.mxu0 %v6754_v41  ;;  %5826 = vmatprep.subr.mxu1 %v6206_v37 }
0x1fee   :  { %5813 = vmatprep.subr.mxu0 %v6206_v37  ;;  %5827 = vmatpush3.msra.mxu1 %v6741_v2 }
0x1fef   :  { %5814 = vmatpush3.msra.mxu0 %v6760_v54  ;;  %5828 = vmatprep.subr.mxu1 %v6206_v37 }
0x1ff0   :  { %5815 = vmatprep.subr.mxu0 %v6206_v37  ;;  %5829 = vmatpush3.msra.mxu1 %v6747_v35 }
0x1ff1   :  { %5816 = vmatpush3.msra.mxu0 %v6766_v42  ;;  %5830 = vmatprep.subr.mxu1 %v6206_v37 }
0x1ff2   :  { %5817 = vmatprep.subr.mxu0 %v6206_v37  ;;  %5831 = vmatpush3.msra.mxu1 %v6754_v41 }
0x1ff3   :  { %5818 = vmatpush3.msra.mxu0 %v6772_v4  ;;  %5832 = vmatprep.subr.mxu1 %v6206_v37 }
0x1ff4   :  { %5820 = vmatmul.mubr.f32.vlgmr.msra.gmra.mxu0 %v6206_v37  ;;  %5833 = vmatpush3.msra.mxu1 %v6760_v54 }
0x1ff5   :  { %5834 = vmatprep.subr.mxu1 %v6206_v37  ;;  %5838 = vmatprep.mubr.msk.f32.mxu1 %vm6207_vm5, %v6206_v37 }
0x1ff6   :  { %5835 = vmatpush3.msra.mxu1 %v6766_v42  ;;  %5841 = vmatprep.subr.mxu0 %v6206_v37 }
0x1ff7   :  { %5836 = vmatprep.subr.mxu1 %v6206_v37  ;;  %5842 = vmatpush3.msra.mxu0 %v6730_v14 }
0x1ff8   :  { %5837 = vmatpush3.msra.mxu1 %v6772_v4  ;;  %5843 = vmatprep.subr.mxu0 %v6206_v37 }
0x1ff9   :  { %5844 = vmatpush3.msra.mxu0 %v6735_v63  ;;  %5857 = vmatprep.mubr.msk.f32.mxu0 %vm6207_vm5, %v6206_v37 }
0x1ffa   :  { %5845 = vmatprep.subr.mxu0 %v6206_v37  ;;  %5860 = vmatprep.subr.mxu1 %v6206_v37 }
0x1ffb   :  { %5846 = vmatpush3.msra.mxu0 %v6741_v2 }
0x1ffc   :  { %5847 = vmatprep.subr.mxu0 %v6206_v37 }
0x1ffd   :  { %5848 = vmatpush3.msra.mxu0 %v6747_v35 }
0x1ffe   :  { %5849 = vmatprep.subr.mxu0 %v6206_v37 }
0x1fff   :  { %5850 = vmatpush3.msra.mxu0 %v6754_v41 }
0x2000   :  { %5851 = vmatprep.subr.mxu0 %v6206_v37 }
0x2001   :  { %5852 = vmatpush3.msra.mxu0 %v6760_v54 }
0x2002   :  { %5853 = vmatprep.subr.mxu0 %v6206_v37 }
0x2003   :  { %5854 = vmatpush3.msra.mxu0 %v6766_v42 }
0x2004   :  { %5855 = vmatprep.subr.mxu0 %v6206_v37 }
0x2005   :  { %5856 = vmatpush3.msra.mxu0 %v6772_v4 }
0x2006   :  { %5879 = vmatprep.subr.mxu0 %v6206_v37 }
0x20a3   :  { %v5789_v44 = vpop.f32.mrf.mxu0  ;;  %v5799_v62 = vpop.f32.mrf.mxu1 }
0x20a4   :  { %v6809_v6 = vadd.f32 %v5799_v62, %v5789_v44 }
0x20a5   :  { %v3490_v8 = vpop.f32.mrf.mxu0  ;;  %v3575_v32 = vpop.f32.mrf.mxu1 }
0x20a6   :  { %v3576_v3 = vadd.f32 %v3575_v32, %v3490_v8 }
0x20a7   :  { %v5802_v45 = vpop.f32.mrf.mxu1 }
0x20a8   :  { %v5792_v7 = vpop.f32.mrf.mxu0 }
0x20a9   :  { %v6811_v9 = vadd.f32 %v5802_v45, %v5792_v7  ;;  %v6847_v33 = vpop.f32.mrf.mxu1 }
0x20aa   :  { %v6813_v46 = vpop.f32.mrf.mxu0 }
0x20b4   :  { %v3668_v27 = vpop.f32.mrf.mxu0 }
0x20b5   :  { %v3672_v11 = vadd.f32 %v3668_v27, %v3576_v3 }
0x20b6   :  { %v5821_v12 = vpop.f32.mrf.mxu0 }
0x20b7   :  { %6105 = vtanh.f32 %v3672_v11  ;;  %v4846_v15 = vmul.f32 -1.442695, %v3672_v11 }
0x20b9   :  { %6107 = vpow2.f32 %v4846_v15 }
0x20c4   :  { %v6106_v13 = vpop.eup %6105 }
0x20c5   :  { %3682 = vrot.lane.b32.xlu1 %v6106_v13, %s6208_s0 }
0x20c6   :  { %v6108_v16 = vpop.eup %6107 }
0x20c7   :  { %v3676_v17 = vadd.f32 1.0, %v6108_v16 }
0x20c9   :  { %6109 = vrcp.f32 %v3676_v17 }
0x20d6   :  { %v6110_v18 = vpop.eup %6109 }
0x20d7   :  { %v3680_v21 = vmul.f32 0.0, %v6110_v18 }
0x2137   :  { %v3683_v19 = vpop.permute.xlu1 %3682 }
0x2138   :  { %v3685_v20 = vmul.f32 %v6110_v18, %v3683_v19 }
0x213a   :  { %3687 = vrot.lane.b32.xlu0 %v3685_v20, %s6209_s16 }
0x21ac   :  { %v3688_v22 = vpop.permute.xlu0 %3687 }
0x21ad   :  { %v3690_v23 = vadd.f32 %v3688_v22, %v3680_v21 }
0x21af   :  { %6111 = vtanh.f32 %v3690_v23  ;;  %v3791_v58 = vrot.slane %v3690_v23, 4 }
0x21bc   :  { %v6112_v24 = vpop.eup %6111 }
0x21bd   :  { %3693 = vrot.lane.b32.xlu1 %v6112_v24, %s6208_s0 }
0x222f   :  { %v3694_v25 = vpop.permute.xlu1 %3693 }
0x2230   :  { %v6818_v49 = vmul.f32 %v6110_v18, %v3694_v25 }
0x2232   :  { %3701 = vrot.lane.b32.xlu1 %v6818_v49, %s6208_s0  ;;  %3698 = vrot.lane.b32.xlu0 %v6818_v49, %s6209_s16 }
0x22a4   :  { %v3702_v26 = vpop.permute.xlu1 %3701  ;;  %v3699_v28 = vpop.permute.xlu0 %3698 }
0x22a5   :  { %v3704_v29 = vsel %vm568_vm3, %v3699_v28, %v3702_v26 }
0x22a6   :  { %v3705_v31 = vmul.f32 %v6825_v30, %v3704_v29 }
0x22a8   :  { %5839 = vmatmul.mubr.msk.f32.vlgmr.msra.gmra.mxu1 %vm2162_vm6, %v3705_v31 }
0x22a9   :  { %5861 = vmatpush3.msra.mxu1 %v6730_v14  ;;  %5876 = vmatprep.mubr.msk.f32.mxu1 %vm6207_vm5, %v6206_v37 }
0x22aa   :  { %5862 = vmatprep.subr.mxu1 %v6206_v37 }
0x22ab   :  { %5863 = vmatpush3.msra.mxu1 %v6735_v63 }
0x22ac   :  { %5864 = vmatprep.subr.mxu1 %v6206_v37 }
0x22ad   :  { %5865 = vmatpush3.msra.mxu1 %v6741_v2 }
0x22ae   :  { %5866 = vmatprep.subr.mxu1 %v6206_v37 }
0x22af   :  { %5867 = vmatpush3.msra.mxu1 %v6747_v35 }
0x22b0   :  { %5868 = vmatprep.subr.mxu1 %v6206_v37 }
0x22b1   :  { %5869 = vmatpush3.msra.mxu1 %v6754_v41 }
0x22b2   :  { %5870 = vmatprep.subr.mxu1 %v6206_v37 }
0x22b3   :  { %5871 = vmatpush3.msra.mxu1 %v6760_v54 }
0x22b4   :  { %5872 = vmatprep.subr.mxu1 %v6206_v37 }
0x22b5   :  { %5873 = vmatpush3.msra.mxu1 %v6766_v42 }
0x22b6   :  { %5874 = vmatprep.subr.mxu1 %v6206_v37 }
0x22b7   :  { %5875 = vmatpush3.msra.mxu1 %v6772_v4 }
0x22b8   :  { %5898 = vmatprep.subr.mxu1 %v6206_v37 }
0x2368   :  { %v3775_v36 = vpop.f32.mrf.mxu1 }
0x2369   :  { %v3780_v39 = vrot.slane %v3775_v36, 4 }
0x236a   :  { %v5840_v40 = vpop.f32.mrf.mxu1 }
0x236b   :  { %v3782_v47 = vadd.f32 %v3780_v39, %v3576_v3 }
0x236d   :  { %6113 = vtanh.f32 %v3782_v47  ;;  %v4848_v50 = vmul.f32 -1.442695, %v3782_v47 }
0x236f   :  { %6115 = vpow2.f32 %v4848_v50 }
0x237a   :  { %v6114_v48 = vpop.eup %6113 }
0x237b   :  { %3795 = vrot.lane.b32.xlu0 %v6114_v48, %s6208_s0 }
0x237c   :  { %v6116_v51 = vpop.eup %6115 }
0x237d   :  { %v3786_v52 = vadd.f32 1.0, %v6116_v51 }
0x237f   :  { %6117 = vrcp.f32 %v3786_v52 }
0x238c   :  { %v6118_v53 = vpop.eup %6117 }
0x238d   :  { %v3793_v59 = vmul.f32 %v6118_v53, %v3791_v58 }
0x23ed   :  { %v3796_v56 = vpop.permute.xlu0 %3795 }
0x23ee   :  { %v3798_v57 = vmul.f32 %v6118_v53, %v3796_v56 }
0x23f0   :  { %3800 = vrot.lane.b32.xlu1 %v3798_v57, %s6209_s16 }
0x2462   :  { %v3801_v55 = vpop.permute.xlu1 %3800 }
0x2463   :  { %v3803_v60 = vadd.f32 %v3801_v55, %v3793_v59 }
0x2465   :  { %6119 = vtanh.f32 %v3803_v60  ;;  %v3902_v17 = vrot.slane %v3803_v60, 4 }
0x2472   :  { %v6120_v61 = vpop.eup %6119 }
0x2473   :  { %3806 = vrot.lane.b32.xlu0 %v6120_v61, %s6208_s0 }
0x24e5   :  { %v3807_v0 = vpop.permute.xlu0 %3806 }
0x24e6   :  { %v6852_v1 = vmul.f32 %v6118_v53, %v3807_v0 }
0x24e8   :  { %3814 = vrot.lane.b32.xlu0 %v6852_v1, %s6208_s0  ;;  %3811 = vrot.lane.b32.xlu1 %v6852_v1, %s6209_s16 }
0x255a   :  { %v3815_v10 = vpop.permute.xlu0 %3814  ;;  %v3812_v38 = vpop.permute.xlu1 %3811 }
0x255b   :  { %v3817_v44 = vsel %vm568_vm3, %v3812_v38, %v3815_v10 }
0x255c   :  { %v3818_v62 = vmul.f32 %v3817_v44, %v6556_v34 }
0x255e   :  { %v3820_v8 = vrot.slane %v3818_v62, 4  ;;  %v3586_v62 = vadd.f32 %v6847_v33, %v6813_v46 }
0x2560   :  { %5858 = vmatmul.mubr.msk.f32.vlgmr.msra.gmra.mxu0 %vm2162_vm6, %v3820_v8 }
0x2561   :  { %5880 = vmatpush3.msra.mxu0 %v6730_v14  ;;  %5895 = vmatprep.mubr.msk.f32.mxu0 %vm6207_vm5, %v6206_v37 }
0x2562   :  { %5881 = vmatprep.subr.mxu0 %v6206_v37 }
0x2563   :  { %5882 = vmatpush3.msra.mxu0 %v6735_v63 }
0x2564   :  { %5883 = vmatprep.subr.mxu0 %v6206_v37 }
0x2565   :  { %5884 = vmatpush3.msra.mxu0 %v6741_v2 }
0x2566   :  { %5885 = vmatprep.subr.mxu0 %v6206_v37 }
0x2567   :  { %5886 = vmatpush3.msra.mxu0 %v6747_v35 }
0x2568   :  { %5887 = vmatprep.subr.mxu0 %v6206_v37 }
0x2569   :  { %5888 = vmatpush3.msra.mxu0 %v6754_v41 }
0x256a   :  { %5889 = vmatprep.subr.mxu0 %v6206_v37 }
0x256b   :  { %5890 = vmatpush3.msra.mxu0 %v6760_v54 }
0x256c   :  { %5891 = vmatprep.subr.mxu0 %v6206_v37 }
0x256d   :  { %5892 = vmatpush3.msra.mxu0 %v6766_v42 }
0x256e   :  { %5893 = vmatprep.subr.mxu0 %v6206_v37 }
0x256f   :  { %5894 = vmatpush3.msra.mxu0 %v6772_v4 }
0x2570   :  { %5917 = vmatprep.subr.mxu0 %v6206_v37 }
0x2620   :  { %v3889_v32 = vpop.f32.mrf.mxu0 }
0x2621   :  { %v3893_v7 = vadd.f32 %v3889_v32, %v6809_v6 }
0x2622   :  { %v5859_v45 = vpop.f32.mrf.mxu0 }
0x2623   :  { %6121 = vtanh.f32 %v3893_v7  ;;  %v4850_v27 = vmul.f32 -1.442695, %v3893_v7 }
0x2625   :  { %6123 = vpow2.f32 %v4850_v27 }
0x2630   :  { %v6122_v3 = vpop.eup %6121 }
0x2631   :  { %3906 = vrot.lane.b32.xlu1 %v6122_v3, %s6208_s0 }
0x2632   :  { %v6124_v11 = vpop.eup %6123 }
0x2633   :  { %v3897_v12 = vadd.f32 1.0, %v6124_v11 }
0x2635   :  { %6125 = vrcp.f32 %v3897_v12 }
0x2642   :  { %v6126_v13 = vpop.eup %6125 }
0x2643   :  { %v3904_v18 = vmul.f32 %v6126_v13, %v3902_v17 }
0x26a3   :  { %v3907_v15 = vpop.permute.xlu1 %3906 }
0x26a4   :  { %v3909_v16 = vmul.f32 %v6126_v13, %v3907_v15 }
0x26a6   :  { %3911 = vrot.lane.b32.xlu0 %v3909_v16, %s6209_s16 }
0x2718   :  { %v3912_v19 = vpop.permute.xlu0 %3911 }
0x2719   :  { %v3914_v20 = vadd.f32 %v3912_v19, %v3904_v18 }
0x271b   :  { %6127 = vtanh.f32 %v3914_v20  ;;  %v4015_v56 = vrot.slane %v3914_v20, 4 }
0x2728   :  { %v6128_v21 = vpop.eup %6127 }
0x2729   :  { %3917 = vrot.lane.b32.xlu1 %v6128_v21, %s6208_s0 }
0x279b   :  { %v3918_v22 = vpop.permute.xlu1 %3917 }
0x279c   :  { %v6883_v23 = vmul.f32 %v6126_v13, %v3918_v22 }
0x279e   :  { %3925 = vrot.lane.b32.xlu1 %v6883_v23, %s6208_s0  ;;  %3922 = vrot.lane.b32.xlu0 %v6883_v23, %s6209_s16 }
0x2810   :  { %v3926_v24 = vpop.permute.xlu1 %3925  ;;  %v3923_v25 = vpop.permute.xlu0 %3922 }
0x2811   :  { %v3928_v26 = vsel %vm568_vm3, %v3923_v25, %v3926_v24 }
0x2812   :  { %v3929_v28 = vmul.f32 %v6825_v30, %v3928_v26 }
0x2814   :  { %5877 = vmatmul.mubr.msk.f32.vlgmr.msra.gmra.mxu1 %vm2162_vm6, %v3929_v28 }
0x2815   :  { %5899 = vmatpush3.msra.mxu1 %v6730_v14  ;;  %5914 = vmatprep.mubr.msk.f32.mxu1 %vm6207_vm5, %v6206_v37 }
0x2816   :  { %5900 = vmatprep.subr.mxu1 %v6206_v37 }
0x2817   :  { %5901 = vmatpush3.msra.mxu1 %v6735_v63 }
0x2818   :  { %5902 = vmatprep.subr.mxu1 %v6206_v37 }
0x2819   :  { %5903 = vmatpush3.msra.mxu1 %v6741_v2 }
0x281a   :  { %5904 = vmatprep.subr.mxu1 %v6206_v37 }
0x281b   :  { %5905 = vmatpush3.msra.mxu1 %v6747_v35 }
0x281c   :  { %5906 = vmatprep.subr.mxu1 %v6206_v37 }
0x281d   :  { %5907 = vmatpush3.msra.mxu1 %v6754_v41 }
0x281e   :  { %5908 = vmatprep.subr.mxu1 %v6206_v37 }
0x281f   :  { %5909 = vmatpush3.msra.mxu1 %v6760_v54 }
0x2820   :  { %5910 = vmatprep.subr.mxu1 %v6206_v37 }
0x2821   :  { %5911 = vmatpush3.msra.mxu1 %v6766_v42 }
0x2822   :  { %5912 = vmatprep.subr.mxu1 %v6206_v37 }
0x2823   :  { %5913 = vmatpush3.msra.mxu1 %v6772_v4 }
0x2824   :  { %5936 = vmatprep.subr.mxu1 %v6206_v37 }
0x28d4   :  { %v3999_v29 = vpop.f32.mrf.mxu1 }
0x28d5   :  { %v4004_v31 = vrot.slane %v3999_v29, 4 }
0x28d6   :  { %v5878_v36 = vpop.f32.mrf.mxu1 }
0x28d7   :  { %v4006_v39 = vadd.f32 %v4004_v31, %v6809_v6 }
0x28d9   :  { %6129 = vtanh.f32 %v4006_v39  ;;  %v4852_v47 = vmul.f32 -1.442695, %v4006_v39 }
0x28db   :  { %6131 = vpow2.f32 %v4852_v47 }
0x28e6   :  { %v6130_v40 = vpop.eup %6129 }
0x28e7   :  { %4019 = vrot.lane.b32.xlu0 %v6130_v40, %s6208_s0 }
0x28e8   :  { %v6132_v48 = vpop.eup %6131 }
0x28e9   :  { %v4010_v50 = vadd.f32 1.0, %v6132_v48 }
0x28eb   :  { %6133 = vrcp.f32 %v4010_v50 }
0x28f8   :  { %v6134_v51 = vpop.eup %6133 }
0x28f9   :  { %v4017_v57 = vmul.f32 %v6134_v51, %v4015_v56 }
0x2959   :  { %v4020_v52 = vpop.permute.xlu0 %4019 }
0x295a   :  { %v4022_v53 = vmul.f32 %v6134_v51, %v4020_v52 }
0x295c   :  { %4024 = vrot.lane.b32.xlu1 %v4022_v53, %s6209_s16 }
0x29ce   :  { %v4025_v58 = vpop.permute.xlu1 %4024 }
0x29cf   :  { %v4027_v59 = vadd.f32 %v4025_v58, %v4017_v57 }
0x29d1   :  { %6135 = vtanh.f32 %v4027_v59  ;;  %v4126_v16 = vrot.slane %v4027_v59, 4 }
0x29de   :  { %v6136_v6 = vpop.eup %6135 }
0x29df   :  { %4030 = vrot.lane.b32.xlu0 %v6136_v6, %s6208_s0 }
0x2a51   :  { %v4031_v55 = vpop.permute.xlu0 %4030 }
0x2a52   :  { %v6914_v60 = vmul.f32 %v6134_v51, %v4031_v55 }
0x2a54   :  { %4038 = vrot.lane.b32.xlu0 %v6914_v60, %s6208_s0  ;;  %4035 = vrot.lane.b32.xlu1 %v6914_v60, %s6209_s16 }
0x2ac6   :  { %v4039_v61 = vpop.permute.xlu0 %4038  ;;  %v4036_v0 = vpop.permute.xlu1 %4035 }
0x2ac7   :  { %v4041_v10 = vsel %vm568_vm3, %v4036_v0, %v4039_v61 }
0x2ac8   :  { %v4042_v38 = vmul.f32 %v4041_v10, %v6556_v34 }
0x2aca   :  { %v4044_v44 = vrot.slane %v4042_v38, 4 }
0x2acc   :  { %5896 = vmatmul.mubr.msk.f32.vlgmr.msra.gmra.mxu0 %vm2162_vm6, %v4044_v44 }
0x2acd   :  { %5918 = vmatpush3.msra.mxu0 %v6730_v14  ;;  %5933 = vmatprep.mubr.msk.f32.mxu0 %vm6207_vm5, %v6206_v37 }
0x2ace   :  { %5919 = vmatprep.subr.mxu0 %v6206_v37 }
0x2acf   :  { %5920 = vmatpush3.msra.mxu0 %v6735_v63 }
0x2ad0   :  { %5921 = vmatprep.subr.mxu0 %v6206_v37 }
0x2ad1   :  { %5922 = vmatpush3.msra.mxu0 %v6741_v2 }
0x2ad2   :  { %5923 = vmatprep.subr.mxu0 %v6206_v37 }
0x2ad3   :  { %5924 = vmatpush3.msra.mxu0 %v6747_v35 }
0x2ad4   :  { %5925 = vmatprep.subr.mxu0 %v6206_v37 }
0x2ad5   :  { %5926 = vmatpush3.msra.mxu0 %v6754_v41 }
0x2ad6   :  { %5927 = vmatprep.subr.mxu0 %v6206_v37 }
0x2ad7   :  { %5928 = vmatpush3.msra.mxu0 %v6760_v54 }
0x2ad8   :  { %5929 = vmatprep.subr.mxu0 %v6206_v37 }
0x2ad9   :  { %5930 = vmatpush3.msra.mxu0 %v6766_v42 }
0x2ada   :  { %5931 = vmatprep.subr.mxu0 %v6206_v37 }
0x2adb   :  { %5932 = vmatpush3.msra.mxu0 %v6772_v4 }
0x2b8c   :  { %v4113_v8 = vpop.f32.mrf.mxu0 }
0x2b8d   :  { %v4117_v32 = vadd.f32 %v4113_v8, %v3586_v62 }
0x2b8e   :  { %v5897_v7 = vpop.f32.mrf.mxu0 }
0x2b8f   :  { %6137 = vtanh.f32 %v4117_v32  ;;  %v4854_v3 = vmul.f32 -1.442695, %v4117_v32 }
0x2b91   :  { %6139 = vpow2.f32 %v4854_v3 }
0x2b9c   :  { %v6138_v45 = vpop.eup %6137 }
0x2b9d   :  { %4130 = vrot.lane.b32.xlu1 %v6138_v45, %s6208_s0 }
0x2b9e   :  { %v6140_v27 = vpop.eup %6139 }
0x2b9f   :  { %v4121_v11 = vadd.f32 1.0, %v6140_v27 }
0x2ba1   :  { %6141 = vrcp.f32 %v4121_v11 }
0x2bae   :  { %v6142_v12 = vpop.eup %6141 }
0x2baf   :  { %v4128_v17 = vmul.f32 %v6142_v12, %v4126_v16 }
0x2c0f   :  { %v4131_v13 = vpop.permute.xlu1 %4130 }
0x2c10   :  { %v4133_v15 = vmul.f32 %v6142_v12, %v4131_v13 }
0x2c12   :  { %4135 = vrot.lane.b32.xlu0 %v4133_v15, %s6209_s16 }
0x2c84   :  { %v4136_v46 = vpop.permute.xlu0 %4135 }
0x2c85   :  { %v4138_v33 = vadd.f32 %v4136_v46, %v4128_v17 }
0x2c87   :  { %6143 = vtanh.f32 %v4138_v33 }
0x2c94   :  { %v6144_v18 = vpop.eup %6143 }
0x2c95   :  { %4141 = vrot.lane.b32.xlu1 %v6144_v18, %s6208_s0 }
0x2d07   :  { %v4142_v19 = vpop.permute.xlu1 %4141 }
0x2d08   :  { %v6945_v20 = vmul.f32 %v6142_v12, %v4142_v19 }
0x2d0a   :  { %4149 = vrot.lane.b32.xlu1 %v6945_v20, %s6208_s0  ;;  %4146 = vrot.lane.b32.xlu0 %v6945_v20, %s6209_s16 }
0x2d7c   :  { %v4150_v21 = vpop.permute.xlu1 %4149  ;;  %v4147_v22 = vpop.permute.xlu0 %4146 }
0x2d7d   :  { %v4152_v24 = vsel %vm568_vm3, %v4147_v22, %v4150_v21 }
0x2d7e   :  { %v4153_v25 = vmul.f32 %v6825_v30, %v4152_v24 }
0x2d80   :  { %5915 = vmatmul.mubr.msk.f32.vlgmr.msra.gmra.mxu1 %vm2162_vm6, %v4153_v25 }
0x2d81   :  { %5937 = vmatpush3.msra.mxu1 %v6730_v14  ;;  %5952 = vmatprep.mubr.msk.f32.mxu1 %vm6207_vm5, %v6206_v37 }
0x2d82   :  { %5938 = vmatprep.subr.mxu1 %v6206_v37 }
0x2d83   :  { %5939 = vmatpush3.msra.mxu1 %v6735_v63 }
0x2d84   :  { %5940 = vmatprep.subr.mxu1 %v6206_v37 }
0x2d85   :  { %5941 = vmatpush3.msra.mxu1 %v6741_v2 }
0x2d86   :  { %5942 = vmatprep.subr.mxu1 %v6206_v37 }
0x2d87   :  { %5943 = vmatpush3.msra.mxu1 %v6747_v35 }
0x2d88   :  { %5944 = vmatprep.subr.mxu1 %v6206_v37 }
0x2d89   :  { %5945 = vmatpush3.msra.mxu1 %v6754_v41 }
0x2d8a   :  { %5946 = vmatprep.subr.mxu1 %v6206_v37 }
0x2d8b   :  { %5947 = vmatpush3.msra.mxu1 %v6760_v54 }
0x2d8c   :  { %5948 = vmatprep.subr.mxu1 %v6206_v37 }
0x2d8d   :  { %5949 = vmatpush3.msra.mxu1 %v6766_v42 }
0x2d8e   :  { %5950 = vmatprep.subr.mxu1 %v6206_v37  ;;  %v4239_v37 = vrot.slane %v4138_v33, 4 }
0x2d8f   :  { %5951 = vmatpush3.msra.mxu1 %v6772_v4 }
0x2e40   :  { %v4223_v14 = vpop.f32.mrf.mxu1 }
0x2e41   :  { %v4228_v63 = vrot.slane %v4223_v14, 4 }
0x2e42   :  { %v5916_v2 = vpop.f32.mrf.mxu1 }
0x2e43   :  { %v4230_v35 = vadd.f32 %v4228_v63, %v3586_v62  ;;  %v4482_v2 = vsel %vm3049_vm7, %v6818_v49, %v6852_v1 }
0x2e45   :  { %6145 = vtanh.f32 %v4230_v35  ;;  %v4856_v41 = vmul.f32 -1.442695, %v4230_v35 }
0x2e47   :  { %6147 = vpow2.f32 %v4856_v41 }
0x2e52   :  { %v6146_v26 = vpop.eup %6145 }
0x2e53   :  { %4243 = vrot.lane.b32.xlu0 %v6146_v26, %s6208_s0 }
0x2e54   :  { %v6148_v28 = vpop.eup %6147 }
0x2e55   :  { %v4234_v54 = vadd.f32 1.0, %v6148_v28  ;;  %v4483_v28 = vsel %vm3049_vm7, %v6883_v23, %v6914_v60  ;;  %v6178_v23 = vld [vmem:[#allocation2 + $0x590] sm:$0xff]  ;;  %v6179_v60 = vld [vmem:[#allocation2 + $0x580] sm:$0xff] }
0x2e57   :  { %6149 = vrcp.f32 %v4234_v54 }
0x2e64   :  { %v6150_v29 = vpop.eup %6149 }
0x2e65   :  { %v4241_v4 = vmul.f32 %v6150_v29, %v4239_v37  ;;  %v4666_v37 = vld [vmem:[#allocation2 + $0x5c0] sm:$0xff] }
0x2ec5   :  { %v4244_v31 = vpop.permute.xlu0 %4243 }
0x2ec6   :  { %v4246_v42 = vmul.f32 %v6150_v29, %v4244_v31  ;;  %v4668_v31 = vld [vmem:[#allocation2 + $0x5d0] sm:$0xff] }
0x2ec8   :  { %4248 = vrot.lane.b32.xlu1 %v4246_v42, %s6209_s16  ;;  %v4667_v42 = vld [vmem:[#allocation2 + $0x5c8] sm:$0xff] }
0x2f3a   :  { %v4249_v36 = vpop.permute.xlu1 %4248 }
0x2f3b   :  { %v4251_v39 = vadd.f32 %v4249_v36, %v4241_v4  ;;  %v4665_v4 = vld [vmem:[#allocation2 + $0x5b8] sm:$0xff]  ;;  %v4664_v36 = vld [vmem:[#allocation2 + $0x5b0] sm:$0xff] }
0x2f3d   :  { %6151 = vtanh.f32 %v4251_v39  ;;  %v4350_v44 = vrot.slane %v4251_v39, 4  ;;  %v4663_v39 = vld [vmem:[#allocation2 + $0x5a8] sm:$0xff] }
0x2f4a   :  { %v6152_v40 = vpop.eup %6151 }
0x2f4b   :  { %4254 = vrot.lane.b32.xlu0 %v6152_v40, %s6208_s0  ;;  %v4662_v40 = vld [vmem:[#allocation2 + $0x5a0] sm:$0xff] }
0x2fbd   :  { %v4255_v47 = vpop.permute.xlu0 %4254 }
0x2fbe   :  { %v6974_v48 = vmul.f32 %v6150_v29, %v4255_v47  ;;  %v4669_v29 = vld [vmem:[#allocation2 + $0x5d8] sm:$0xff] }
0x2fc0   :  { %4262 = vrot.lane.b32.xlu0 %v6974_v48, %s6208_s0  ;;  %4259 = vrot.lane.b32.xlu1 %v6974_v48, %s6209_s16  ;;  %v4484_v63 = vsel %vm3049_vm7, %v6945_v20, %v6974_v48 }
0x3032   :  { %v4263_v50 = vpop.permute.xlu0 %4262  ;;  %v4260_v51 = vpop.permute.xlu1 %4259 }
0x3033   :  { %v4265_v52 = vsel %vm568_vm3, %v4260_v51, %v4263_v50 }
0x3034   :  { %v4266_v53 = vmul.f32 %v4265_v52, %v6556_v34 }
0x3036   :  { %v4268_v56 = vrot.slane %v4266_v53, 4 }
0x3038   :  { %5934 = vmatmul.mubr.msk.f32.vlgmr.msra.gmra.mxu0 %vm2162_vm6, %v4268_v56 }
0x3039   :  { %5963 = vmatprep.mubr.msk.f32.mxu0 %vm568_vm3, %v6708_v5 }
0x30f8   :  { %v4337_v57 = vpop.f32.mrf.mxu0 }
0x30f9   :  { %v4341_v58 = vadd.f32 %v4337_v57, %v6811_v9 }
0x30fa   :  { %v5935_v59 = vpop.f32.mrf.mxu0 }
0x30fb   :  { %6153 = vtanh.f32 %v4341_v58  ;;  %v4858_v55 = vmul.f32 -1.442695, %v4341_v58  ;;  %v4865_v58 = vld [vmem:[#allocation2 + $0x5e0] ss:$0 sm:$0xff] }
0x30fd   :  { %6155 = vpow2.f32 %v4858_v55 }
0x3108   :  { %v6154_v6 = vpop.eup %6153 }
0x3109   :  { %4354 = vrot.lane.b32.xlu1 %v6154_v6, %s6208_s0 }
0x310a   :  { %v6156_v61 = vpop.eup %6155 }
0x310b   :  { %v4345_v0 = vadd.f32 1.0, %v6156_v61 }
0x310d   :  { %6157 = vrcp.f32 %v4345_v0 }
0x311a   :  { %v6158_v34 = vpop.eup %6157 }
0x311b   :  { %v4352_v5 = vmul.f32 %v6158_v34, %v4350_v44 }
0x317b   :  { %v4355_v10 = vpop.permute.xlu1 %4354 }
0x317c   :  { %v4357_v38 = vmul.f32 %v6158_v34, %v4355_v10 }
0x317e   :  { %4359 = vrot.lane.b32.xlu0 %v4357_v38, %s6209_s16 }
0x31f0   :  { %v4360_v62 = vpop.permute.xlu0 %4359 }
0x31f1   :  { %v4362_v8 = vadd.f32 %v4360_v62, %v4352_v5 }
0x31f3   :  { %6159 = vtanh.f32 %v4362_v8 }
0x3200   :  { %v6160_v32 = vpop.eup %6159 }
0x3201   :  { %4365 = vrot.lane.b32.xlu1 %v6160_v32, %s6208_s0 }
0x3273   :  { %v4366_v7 = vpop.permute.xlu1 %4365 }
0x3274   :  { %v4368_v45 = vmul.f32 %v6158_v34, %v4366_v7 }
0x3276   :  { %4373 = vrot.lane.b32.xlu1 %v4368_v45, %s6208_s0  ;;  %4370 = vrot.lane.b32.xlu0 %v4368_v45, %s6209_s16 }
0x32e8   :  { %v4374_v3 = vpop.permute.xlu1 %4373  ;;  %v4371_v27 = vpop.permute.xlu0 %4370 }
0x32e9   :  { %v4376_v11 = vsel %vm568_vm3, %v4371_v27, %v4374_v3 }
0x32ea   :  { %v4377_v12 = vmul.f32 %v6825_v30, %v4376_v11 }
0x32ec   :  { %5953 = vmatmul.mubr.msk.f32.vlgmr.msra.gmra.mxu1 %vm2162_vm6, %v4377_v12 }
0x32ed   :  { %5974 = vmatprep.mubr.msk.f32.mxu1 %vm568_vm3, %v6704_v43  ;;  %v4463_v43 = vrot.slane %v4362_v8, 4 }
0x33ac   :  { %v4447_v13 = vpop.f32.mrf.mxu1 }
0x33ad   :  { %v4452_v15 = vrot.slane %v4447_v13, 4 }
0x33ae   :  { %v5954_v16 = vpop.f32.mrf.mxu1 }
0x33af   :  { %v4454_v17 = vadd.f32 %v4452_v15, %v6811_v9 }
0x33b1   :  { %6161 = vtanh.f32 %v4454_v17  ;;  %v4860_v33 = vmul.f32 -1.442695, %v4454_v17 }
0x33b3   :  { %6163 = vpow2.f32 %v4860_v33 }
0x33be   :  { %v6162_v46 = vpop.eup %6161 }
0x33bf   :  { %4467 = vrot.lane.b32.xlu0 %v6162_v46, %s6208_s0 }
0x33c0   :  { %v6164_v18 = vpop.eup %6163 }
0x33c1   :  { %v4458_v19 = vadd.f32 1.0, %v6164_v18 }
0x33c3   :  { %6165 = vrcp.f32 %v4458_v19 }
0x33d0   :  { %v6166_v30 = vpop.eup %6165 }
0x33d1   :  { %v4465_v24 = vmul.f32 %v6166_v30, %v4463_v43 }
0x3431   :  { %v4468_v21 = vpop.permute.xlu0 %4467 }
0x3432   :  { %v4470_v22 = vmul.f32 %v6166_v30, %v4468_v21 }
0x3434   :  { %4472 = vrot.lane.b32.xlu1 %v4470_v22, %s6209_s16 }
0x34a6   :  { %v4473_v25 = vpop.permute.xlu1 %4472 }
0x34a7   :  { %v4475_v14 = vadd.f32 %v4473_v25, %v4465_v24 }
0x34a9   :  { %6167 = vtanh.f32 %v4475_v14 }
0x34b6   :  { %v6168_v9 = vpop.eup %6167 }
0x34b7   :  { %4478 = vrot.lane.b32.xlu0 %v6168_v9, %s6208_s0 }
0x34bb   :  { %4494 = vrot.lane.b32.xlu0 %v4484_v63, %s6209_s16 }
0x34bf   :  { %4490 = vrot.lane.b32.xlu0 %v4482_v2, %s6209_s16 }
0x3529   :  { %v4479_v35 = vpop.permute.xlu0 %4478 }
0x352a   :  { %v4481_v26 = vmul.f32 %v6166_v30, %v4479_v35 }
0x352c   :  { %v4485_v41 = vsel %vm3049_vm7, %v4368_v45, %v4481_v26 }
0x352d   :  { %4496 = vrot.lane.b32.xlu1 %v4485_v41, %s6209_s16  ;;  %v4495_v20 = vpop.permute.xlu0 %4494 }
0x3531   :  { %4492 = vrot.lane.b32.xlu1 %v4483_v28, %s6209_s16  ;;  %v4491_v1 = vpop.permute.xlu0 %4490 }
0x359f   :  { %v4497_v54 = vpop.permute.xlu1 %4496 }
0x35a0   :  { %5955 = vmatprep.subr.mxu0 %v4497_v54  ;;  %5966 = vmatprep.subr.mxu1 %v4497_v54 }
0x35a1   :  { %5956 = vmatpush3.msra.mxu0 %v4497_v54  ;;  %5967 = vmatpush3.msra.mxu1 %v4497_v54 }
0x35a2   :  { %5957 = vmatprep.subr.mxu0 %v4495_v20  ;;  %5968 = vmatprep.subr.mxu1 %v4495_v20 }
0x35a3   :  { %v4493_v49 = vpop.permute.xlu1 %4492  ;;  %5958 = vmatpush3.msra.mxu0 %v4495_v20  ;;  %5969 = vmatpush3.msra.mxu1 %v4495_v20 }
0x35a4   :  { %5959 = vmatprep.subr.mxu0 %v4493_v49  ;;  %5970 = vmatprep.subr.mxu1 %v4493_v49 }
0x35a5   :  { %5960 = vmatpush3.msra.mxu0 %v4493_v49  ;;  %5971 = vmatpush3.msra.mxu1 %v4493_v49 }
0x35a6   :  { %5961 = vmatprep.subr.mxu0 %v4491_v1  ;;  %5972 = vmatprep.subr.mxu1 %v4491_v1 }
0x35a7   :  { %5962 = vmatpush3.msra.mxu0 %v4491_v1  ;;  %5973 = vmatpush3.msra.mxu1 %v4491_v1 }
0x35a8   :  { %5975 = vmatmul.mubr.msk.f32.vlgmr.msra.gmra.mxu1 %vm568_vm3, %v6178_v23  ;;  %5964 = vmatmul.mubr.msk.f32.vlgmr.msra.gmra.mxu0 %vm568_vm3, %v6179_v60 }
0x35a9   :  { %5977 = vmatprep.subr.mxu0 %v4669_v29 }
0x35aa   :  { %5978 = vmatpush3.msra.mxu0 %v4669_v29 }
0x35ab   :  { %5979 = vmatprep.subr.mxu0 %v4668_v31 }
0x35ac   :  { %5980 = vmatpush3.msra.mxu0 %v4668_v31 }
0x35ad   :  { %5981 = vmatprep.subr.mxu0 %v4667_v42 }
0x35ae   :  { %5982 = vmatpush3.msra.mxu0 %v4667_v42 }
0x35af   :  { %5983 = vmatprep.subr.mxu0 %v4666_v37 }
0x35b0   :  { %5984 = vmatpush3.msra.mxu0 %v4666_v37 }
0x35b1   :  { %5985 = vmatprep.subr.mxu0 %v4665_v4 }
0x35b2   :  { %5986 = vmatpush3.msra.mxu0 %v4665_v4 }
0x35b3   :  { %5987 = vmatprep.subr.mxu0 %v4664_v36 }
0x35b4   :  { %5988 = vmatpush3.msra.mxu0 %v4664_v36 }
0x35b5   :  { %5989 = vmatprep.subr.mxu0 %v4663_v39 }
0x35b6   :  { %5990 = vmatpush3.msra.mxu0 %v4663_v39 }
0x35b7   :  { %5991 = vmatprep.subr.mxu0 %v4662_v40 }
0x35b8   :  { %5992 = vmatpush3.msra.mxu0 %v4662_v40 }
0x3668   :  { %v5976_v47 = vpop.f32.mrf.mxu1  ;;  %v5965_v50 = vpop.f32.mrf.mxu0 }
0x3669   :  { %4656 = vrot.lane.b32.xlu0 %v5976_v47, %s6209_s16 }
0x366a   :  { %v4643_v48 = vpop.f32.mrf.mxu1  ;;  %v4568_v52 = vpop.f32.mrf.mxu0 }
0x366b   :  { %4654 = vrot.lane.b32.xlu1 %v4643_v48, %s6209_s16 }
0x36db   :  { %v4657_v51 = vpop.permute.xlu0 %4656 }
0x36dc   :  { %v4661_v57 = vsel %vm568_vm3, %v5965_v50, %v4657_v51 }
0x36dd   :  { %v4655_v53 = vpop.permute.xlu1 %4654 }
0x36de   :  { %v4660_v56 = vsel %vm568_vm3, %v4568_v52, %v4655_v53 }
0x36df   :  { %5993 = vmatprep.mubr.msk.f32.mxu0 %vm2162_vm6, %v4660_v56 }
0x36e0   :  { %5994 = vmatmul.mubr.msk.f32.vlgmr.msra.gmra.mxu0 %vm2162_vm6, %v4661_v57 }
0x37a0   :  { %v5995_v59 = vpop.f32.mrf.mxu0 }
0x37a1   :  { %v4753_v6 = vadd.f32 %v5995_v59, %v4865_v58 }
0x37a2   :  { %v4747_v55 = vpop.f32.mrf.mxu0 }
0x37a3   :  { %4758 = vst.msk [vmem:[%s7031_s3 + $0x8] sm:$0xff] %vm4756_vm8, %v4753_v6  ;;  %v4748_v61 = vadd.f32 %v4865_v58, %v4747_v55 }
0x37a5   :  { %4757 = vst.msk [vmem:[%s7031_s3] sm:$0xff] %vm4756_vm8, %v4748_v61 }
0x37a6   :  { %4763 = vsyncpa [#allocation3], 1 }

</bundles_post_ra>
